<compile_context>
chip_gen: v6e
topology: v6e:2x2x1
jax: 0.10.0
libtpu: 0.0.40
codegen_flags: <defaults>
</compile_context>

<pallas_src>
import math

import jax
import jax.numpy as jnp
from jax.experimental import pallas as pl
from jax.experimental.pallas import tpu as pltpu


_VMEM = pl.BlockSpec(memory_space=pltpu.MemorySpace.VMEM)


# ------------------------------ fused kernel --------------------------------

def _make_tdm_kernel(L, n_dec, T, B, H, latent_dim, out_dim, head_width):
    """Fused TDM forward.  LSTM gate columns pre-reordered to [i, f, o, g]."""
    N = T * B
    bf16 = jnp.bfloat16

    def kernel(*refs):
        it = iter(refs)
        # ---- inputs ----
        x_ref = next(it)                            # (N, Din)  f32 (time-major, flat)
        h0_ref = next(it)                           # (L, B, H) f32
        c0_ref = next(it)                           # (L, B, H) f32
        wih = [next(it) for _ in range(L)]          # (Din|H, 4H) bf16  [i,f,o,g]
        whh = [next(it) for _ in range(L)]          # (H, 4H)     bf16  [i,f,o,g]
        bias = [next(it) for _ in range(L)]         # (1, 4H)     f32   (b_ih+b_hh)
        w_lat = next(it)                            # (H, 2*latent) bf16
        b_lat = next(it)                            # (1, 2*latent) f32
        dec = [next(it) for _ in range(2 * n_dec)]  # (in,out) bf16 / (1,out) f32
        w_out = next(it)                            # (dec_last, 2*out) bf16
        b_out = next(it)                            # (1, 2*out)        f32
        # ---- outputs ----
        head_ref = next(it)                         # (N, head_width) f32
        hn_ref = next(it)                           # (L, B, H) f32
        cn_ref = next(it)                           # (L, B, H) f32
        # ---- scratch ----
        y_scr = next(it)                            # (N, H) bf16

        # Loop-invariant gate lane mask (hoisted: JAX does not CSE broadcasts).
        # Gate order [i, f, o, g]: lanes < 3H take sigmoid, last H lanes tanh.
        gate_is_sig = jax.lax.broadcasted_iota(jnp.int32, (B, 4 * H), 1) < 3 * H

        # ------------------------- LSTM stack -------------------------
        for l in range(L):
            xin = x_ref[...].astype(bf16) if l == 0 else y_scr[...]
            # Hoisted input projection for ALL timesteps (bias folded in),
            # kept as a value: only h @ W_hh + gate math on the serial path.
            xp = jnp.dot(xin, wih[l][...],
                         preferred_element_type=jnp.float32) + bias[l][...]
            whh_l = whh[l][...]
            last = (l == L - 1)

            # NOTE: a weight-stationary variant (pltpu.matmul_push_rhs /
            # matmul_acc_lhs / matmul_pop holding W_hh across steps) could
            # further shorten the chain; jnp.dot kept for portability at this
            # (H=32, 4H=128) RHS size.
            h = h0_ref[l]
            c = c0_ref[l]
            # Static fully-unrolled time loop (T small; static addressing).
            # For large T: lax.fori_loop with bounded unroll + VMEM xproj scratch.
            for t in range(T):
                gates = xp[t * B:(t + 1) * B, :] + jnp.dot(
                    h.astype(bf16), whh_l, preferred_element_type=jnp.float32)
                # 2 full-width EUP ops + 1 select instead of 4 quarter-vreg ops.
                act = jnp.where(gate_is_sig,
                                jax.nn.sigmoid(gates), jnp.tanh(gates))
                i_g = act[:, 0 * H:1 * H]
                f_g = act[:, 1 * H:2 * H]
                o_g = act[:, 2 * H:3 * H]
                g_g = act[:, 3 * H:4 * H]
                c = f_g * c + i_g * g_g
                h = o_g * jnp.tanh(c)
                # Last layer: fuse the head's tanh into per-step slack.
                # y_scr is bf16 (only consumed as bf16 matmul LHS).
                y_scr[t * B:(t + 1) * B, :] = (
                    jnp.tanh(h) if last else h).astype(bf16)
            hn_ref[l] = h
            cn_ref[l] = c

        # ---------------------------- head ----------------------------
        enc = y_scr[...]                             # (N, H) bf16, already tanh'd
        lat = jnp.dot(enc, w_lat[...],
                      preferred_element_type=jnp.float32) + b_lat[...]
        # softplus(+eps) only on the std half via a lane mask.
        lat_cols = jax.lax.broadcasted_iota(jnp.int32, lat.shape, 1)
        lat = jnp.where(lat_cols < latent_dim, lat,
                        jax.nn.softplus(lat) + 1e-4)

        # TODO(synk): training-mode d_dist.rsample() needs PRNG noise
        # (pltpu.prng_seed / prng_random_bits); eval path (d_dist.mean) here.
        xd = lat[:, :latent_dim]
        for i in range(n_dec):
            w = dec[2 * i][...]
            bb = dec[2 * i + 1][...]
            xd = jnp.tanh(jnp.dot(xd.astype(bf16), w,
                                  preferred_element_type=jnp.float32) + bb)

        out = jnp.dot(xd.astype(bf16), w_out[...],
                      preferred_element_type=jnp.float32) + b_out[...]
        out_cols = jax.lax.broadcasted_iota(jnp.int32, out.shape, 1)
        out = jnp.where(out_cols < out_dim, out,
                        jax.nn.softplus(out) + 1e-4)

        # Lane-dense output slab [o_mean | o_std | d_mean | d_std | 0-pad]:
        # last dim is a multiple of 128 -> one unmasked full-width store.
        parts = [out, lat]
        pad_w = head_width - (2 * out_dim + 2 * latent_dim)
        if pad_w > 0:
            parts.append(jnp.zeros((N, pad_w), jnp.float32))
        head_ref[...] = jnp.concatenate(parts, axis=-1)

    return kernel


# ------------------------------ parameters ----------------------------------

def _linear_params(key, in_dim, out_dim):
    k1, k2 = jax.random.split(key)
    bound = 1.0 / math.sqrt(in_dim)
    w = jax.random.uniform(k1, (out_dim, in_dim), jnp.float32, -bound, bound)
    b = jax.random.uniform(k2, (out_dim,), jnp.float32, -bound, bound)
    return w, b


def init_tdm_params(key, cfg):
    """PyTorch-layout parameters (gate order i, f, g, o)."""
    H = cfg['lstm_hidden']
    input_dim = cfg['num_joints'] * cfg['joint_dims'] + cfg['num_actions']
    params = {'lstm': [], 'decoder': []}
    bound = 1.0 / math.sqrt(H)
    for layer in range(cfg['num_lstm_layers']):
        in_k = input_dim if layer == 0 else H
        key, k1, k2, k3, k4 = jax.random.split(key, 5)
        params['lstm'].append({
            'w_ih': jax.random.uniform(k1, (4 * H, in_k), jnp.float32, -bound, bound),
            'w_hh': jax.random.uniform(k2, (4 * H, H), jnp.float32, -bound, bound),
            'b_ih': jax.random.uniform(k3, (4 * H,), jnp.float32, -bound, bound),
            'b_hh': jax.random.uniform(k4, (4 * H,), jnp.float32, -bound, bound),
        })
    key, k = jax.random.split(key)
    params['latent_mean'] = _linear_params(k, H, cfg['latent_dim'])
    key, k = jax.random.split(key)
    params['latent_std'] = _linear_params(k, H, cfg['latent_dim'])
    # Faithful to the (quirky) PyTorch construction: Linear(dec_sizes[i-1], dec_sizes[i])
    dec_sizes = [cfg['latent_dim']] + list(cfg['decoder_sizes'])
    for i in range(len(dec_sizes) - 1):
        key, k = jax.random.split(key)
        params['decoder'].append(_linear_params(k, dec_sizes[i - 1], dec_sizes[i]))
    key, k = jax.random.split(key)
    params['output_mean'] = _linear_params(k, dec_sizes[-1], cfg['output_dim'])
    key, k = jax.random.split(key)
    params['output_std'] = _linear_params(k, dec_sizes[-1], cfg['output_dim'])
    return params


def _reorder_gates(a, H):
    """Reorder fused gate columns [i, f, g, o] (PyTorch) -> [i, f, o, g]."""
    if a.ndim == 1:
        return jnp.concatenate([a[:2 * H], a[3 * H:], a[2 * H:3 * H]])
    return jnp.concatenate([a[:, :2 * H], a[:, 3 * H:], a[:, 2 * H:3 * H]], axis=1)


def prepare_tdm_params(params, matmul_dtype=jnp.bfloat16):
    """Pre-transpose / pre-fuse / pre-reorder parameters ONCE (not per call)."""
    H = int(params['lstm'][0]['w_hh'].shape[1])
    prep = {'lstm': [], 'decoder': []}
    for p in params['lstm']:
        prep['lstm'].append({
            'w_ih_t': _reorder_gates(p['w_ih'].T, H).astype(matmul_dtype),
            'w_hh_t': _reorder_gates(p['w_hh'].T, H).astype(matmul_dtype),
            'b': _reorder_gates(p['b_ih'] + p['b_hh'], H).reshape(1, -1).astype(jnp.float32),
        })
    wlm, blm = params['latent_mean']
    wls, bls = params['latent_std']
    prep['w_lat'] = jnp.concatenate([wlm.T, wls.T], axis=1).astype(matmul_dtype)
    prep['b_lat'] = jnp.concatenate([blm, bls]).reshape(1, -1).astype(jnp.float32)
    for (w, b) in params['decoder']:
        prep['decoder'].append((w.T.astype(matmul_dtype),
                                b.reshape(1, -1).astype(jnp.float32)))
    wom, bom = params['output_mean']
    wos, bos = params['output_std']
    prep['w_out'] = jnp.concatenate([wom.T, wos.T], axis=1).astype(matmul_dtype)
    prep['b_out'] = jnp.concatenate([bom, bos]).reshape(1, -1).astype(jnp.float32)
    prep['H'] = H
    prep['latent_dim'] = int(wlm.shape[0])
    prep['out_dim'] = int(wom.shape[0])
    return prep


# ------------------------------- forward ------------------------------------

def tdm_forward(prep, x, lstm_state=None):
    """Returns ((out_mean, out_std), d_samples, (d_mean, d_std), (h_n, c_n))."""
    B, T, Din = x.shape
    H = prep['H']
    L = len(prep['lstm'])
    latent_dim = prep['latent_dim']
    out_dim = prep['out_dim']
    n_dec = len(prep['decoder'])
    N = T * B
    width = 2 * out_dim + 2 * latent_dim
    head_width = ((width + 127) // 128) * 128          # lane-dense output slab

    if lstm_state is None:
        h0 = jnp.zeros((L, B, H), jnp.float32)
        c0 = jnp.zeros((L, B, H), jnp.float32)
    else:
        h0, c0 = lstm_state

    # time-major, flattened to (N, Din): no reshapes needed inside the kernel
    x_tm = jnp.transpose(x, (1, 0, 2)).astype(jnp.float32).reshape(N, Din)

    args = [x_tm, h0, c0]
    args += [p['w_ih_t'] for p in prep['lstm']]
    args += [p['w_hh_t'] for p in prep['lstm']]
    args += [p['b'] for p in prep['lstm']]
    args += [prep['w_lat'], prep['b_lat']]
    for (w, b) in prep['decoder']:
        args += [w, b]
    args += [prep['w_out'], prep['b_out']]

    head, h_n, c_n = pl.pallas_call(
        _make_tdm_kernel(L, n_dec, T, B, H, latent_dim, out_dim, head_width),
        out_shape=(jax.ShapeDtypeStruct((N, head_width), jnp.float32),
                   jax.ShapeDtypeStruct((L, B, H), jnp.float32),
                   jax.ShapeDtypeStruct((L, B, H), jnp.float32)),
        in_specs=[_VMEM] * len(args),
        out_specs=(_VMEM, _VMEM, _VMEM),
        scratch_shapes=[pltpu.VMEM((N, H), jnp.bfloat16)],
        compiler_params=pltpu.CompilerParams(vmem_limit_bytes=32 * 1024 * 1024),
    )(*args)

    def unflat(a):
        return jnp.transpose(a.reshape(T, B, -1), (1, 0, 2))

    o_mean = unflat(head[:, :out_dim])
    o_std = unflat(head[:, out_dim:2 * out_dim])
    d_mean = unflat(head[:, 2 * out_dim:2 * out_dim + latent_dim])
    d_std = unflat(head[:, 2 * out_dim + latent_dim:2 * out_dim + 2 * latent_dim])
    d_samples = d_mean   # eval mode: d_dist.mean
    return (o_mean, o_std), d_samples, (d_mean, d_std), (h_n, c_n)


# ------------------------- pure-JAX reference (check) -----------------------

def tdm_forward_ref(params, x):
    B, T, _ = x.shape
    H = params['lstm'][0]['w_hh'].shape[1]
    y = x
    for p in params['lstm']:
        h = jnp.zeros((B, H), jnp.float32)
        c = jnp.zeros((B, H), jnp.float32)
        outs = []
        for t in range(T):
            g = y[:, t, :] @ p['w_ih'].T + h @ p['w_hh'].T + p['b_ih'] + p['b_hh']
            i_g = jax.nn.sigmoid(g[:, :H])
            f_g = jax.nn.sigmoid(g[:, H:2 * H])
            g_g = jnp.tanh(g[:, 2 * H:3 * H])
            o_g = jax.nn.sigmoid(g[:, 3 * H:])
            c = f_g * c + i_g * g_g
            h = o_g * jnp.tanh(c)
            outs.append(h)
        y = jnp.stack(outs, axis=1)
    enc = jnp.tanh(y)
    lm = enc @ params['latent_mean'][0].T + params['latent_mean'][1]
    ls = jax.nn.softplus(enc @ params['latent_std'][0].T + params['latent_std'][1]) + 1e-4
    d = lm
    xd = d
    for (w, b) in params['decoder']:
        xd = jnp.tanh(xd @ w.T + b)
    om = xd @ params['output_mean'][0].T + params['output_mean'][1]
    osd = jax.nn.softplus(xd @ params['output_std'][0].T + params['output_std'][1]) + 1e-4
    return om, osd, d, lm, ls


# --------------------------------- main --------------------------------------

if __name__ == "__main__":
    cfg = dict(
        activation='Tanh',
        num_joints=4, joint_dims=3, num_actions=2,     # input_dim = 14
        num_lstm_layers=2, lstm_hidden=32,
        latent_dim=16, decoder_sizes=[16],             # consistent with module's indexing quirk
        output_dim=8,
    )
    # B=8 fills the f32 sublanes of every recurrent vector op (per perf review);
    # the serial recurrence cost is latency-bound and ~flat in B.
    B, T = 8, 8
    input_dim = cfg['num_joints'] * cfg['joint_dims'] + cfg['num_actions']

    key = jax.random.PRNGKey(0)
    kp, kx = jax.random.split(key)
    params = init_tdm_params(kp, cfg)
    prep = prepare_tdm_params(params)                  # pre-transposed / fused / reordered once
    x = jax.random.normal(kx, (B, T, input_dim), jnp.float32)

    (o_mean, o_std), d_samples, (d_mean, d_std), (h_n, c_n) = tdm_forward(prep, x)
    jax.block_until_ready((o_mean, o_std, d_samples, d_mean, d_std, h_n, c_n))

    # sanity check against a pure-JAX fp32 reference (loose tol: bf16 MXU inputs)
    r_om, r_os, r_d, r_dm, r_ds = tdm_forward_ref(params, x)
    for a, b in [(o_mean, r_om), (o_std, r_os), (d_samples, r_d),
                 (d_mean, r_dm), (d_std, r_ds)]:
        assert jnp.max(jnp.abs(a - b)) < 5e-2, float(jnp.max(jnp.abs(a - b)))

    assert o_mean.shape == (B, T, cfg['output_dim'])
    assert o_std.shape == (B, T, cfg['output_dim'])
    assert d_samples.shape == (B, T, cfg['latent_dim'])
    assert h_n.shape == (cfg['num_lstm_layers'], B, cfg['lstm_hidden'])
    assert c_n.shape == (cfg['num_lstm_layers'], B, cfg['lstm_hidden'])
    print("KERNEL_OK")
</pallas_src>

<mosaic_0001>
module attributes {stable_mosaic.version = 11 : i64} {
  func.func @kernel(%arg0: memref<64x14xf32, #tpu.memory_space<vmem>>, %arg1: memref<2x8x32xf32, #tpu.memory_space<vmem>>, %arg2: memref<2x8x32xf32, #tpu.memory_space<vmem>>, %arg3: memref<14x128xbf16, #tpu.memory_space<vmem>>, %arg4: memref<32x128xbf16, #tpu.memory_space<vmem>>, %arg5: memref<32x128xbf16, #tpu.memory_space<vmem>>, %arg6: memref<32x128xbf16, #tpu.memory_space<vmem>>, %arg7: memref<1x128xf32, #tpu.memory_space<vmem>>, %arg8: memref<1x128xf32, #tpu.memory_space<vmem>>, %arg9: memref<32x32xbf16, #tpu.memory_space<vmem>>, %arg10: memref<1x32xf32, #tpu.memory_space<vmem>>, %arg11: memref<16x16xbf16, #tpu.memory_space<vmem>>, %arg12: memref<1x16xf32, #tpu.memory_space<vmem>>, %arg13: memref<16x16xbf16, #tpu.memory_space<vmem>>, %arg14: memref<1x16xf32, #tpu.memory_space<vmem>>, %arg15: memref<64x128xf32, #tpu.memory_space<vmem>>, %arg16: memref<2x8x32xf32, #tpu.memory_space<vmem>>, %arg17: memref<2x8x32xf32, #tpu.memory_space<vmem>>, %arg18: memref<64x32xbf16, #tpu.memory_space<vmem>>) attributes {dimension_semantics = [], scalar_prefetch = 0 : i64, scratch_operands = 1 : i64, tpu.core_type = #tpu.core_type<tc>} {
    %0 = tpu.iota {dimensions = array<i32: 1>} : vector<8x128xi32>
    %c96_i32 = arith.constant 96 : i32
    %1 = vector.broadcast %c96_i32 : i32 to vector<8x128xi32>
    %2 = arith.cmpi slt, %0, %1 : vector<8x128xi32>
    %c0 = arith.constant 0 : index
    %c0_0 = arith.constant 0 : index
    %3 = vector.load %arg0[%c0, %c0_0] : memref<64x14xf32, #tpu.memory_space<vmem>>, vector<64x14xf32>
    %4 = arith.truncf %3 : vector<64x14xf32> to vector<64x14xbf16>
    %c0_1 = arith.constant 0 : index
    %c0_2 = arith.constant 0 : index
    %5 = vector.load %arg3[%c0_1, %c0_2] : memref<14x128xbf16, #tpu.memory_space<vmem>>, vector<14x128xbf16>
    %cst = arith.constant dense<0.000000e+00> : vector<64x128xf32>
    %6 = tpu.matmul %4, %5, %cst {dimension_numbers = #tpu.dot_dimension_numbers<[1], [0], [0], [1], [0, 0, 1, 1], [], []>} : vector<64x14xbf16>, vector<14x128xbf16>, vector<64x128xf32> -> vector<64x128xf32>
    %c0_3 = arith.constant 0 : index
    %c0_4 = arith.constant 0 : index
    %7 = vector.load %arg7[%c0_3, %c0_4] : memref<1x128xf32, #tpu.memory_space<vmem>>, vector<1x128xf32>
    %8 = vector.broadcast %7 : vector<1x128xf32> to vector<64x128xf32>
    %9 = arith.addf %6, %8 : vector<64x128xf32>
    %c0_5 = arith.constant 0 : index
    %c0_6 = arith.constant 0 : index
    %10 = vector.load %arg5[%c0_5, %c0_6] : memref<32x128xbf16, #tpu.memory_space<vmem>>, vector<32x128xbf16>
    %c0_7 = arith.constant 0 : index
    %c0_8 = arith.constant 0 : index
    %c0_9 = arith.constant 0 : index
    %11 = vector.load %arg1[%c0_7, %c0_8, %c0_9] : memref<2x8x32xf32, #tpu.memory_space<vmem>>, vector<1x8x32xf32>
    %12 = vector.shape_cast %11 : vector<1x8x32xf32> to vector<8x32xf32>
    %c0_10 = arith.constant 0 : index
    %c0_11 = arith.constant 0 : index
    %c0_12 = arith.constant 0 : index
    %13 = vector.load %arg2[%c0_10, %c0_11, %c0_12] : memref<2x8x32xf32, #tpu.memory_space<vmem>>, vector<1x8x32xf32>
    %14 = vector.shape_cast %13 : vector<1x8x32xf32> to vector<8x32xf32>
    %15 = vector.extract_strided_slice %9 {offsets = [0, 0], sizes = [8, 128], strides = [1, 1]} : vector<64x128xf32> to vector<8x128xf32>
    %16 = arith.truncf %12 : vector<8x32xf32> to vector<8x32xbf16>
    %cst_13 = arith.constant dense<0.000000e+00> : vector<8x128xf32>
    %17 = tpu.matmul %16, %10, %cst_13 {dimension_numbers = #tpu.dot_dimension_numbers<[1], [0], [0], [1], [0, 0, 1, 1], [], []>} : vector<8x32xbf16>, vector<32x128xbf16>, vector<8x128xf32> -> vector<8x128xf32>
    %18 = arith.addf %15, %17 : vector<8x128xf32>
    %19 = arith.negf %18 : vector<8x128xf32>
    %20 = math.exp %19 : vector<8x128xf32>
    %cst_14 = arith.constant 1.000000e+00 : f32
    %21 = vector.broadcast %cst_14 : f32 to vector<8x128xf32>
    %22 = arith.addf %21, %20 : vector<8x128xf32>
    %23 = arith.divf %21, %22 : vector<8x128xf32>
    %24 = math.tanh %18 : vector<8x128xf32>
    %25 = arith.select %2, %23, %24 : vector<8x128xi1>, vector<8x128xf32>
    %26 = vector.extract_strided_slice %25 {offsets = [0, 0], sizes = [8, 32], strides = [1, 1]} : vector<8x128xf32> to vector<8x32xf32>
    %27 = vector.extract_strided_slice %25 {offsets = [0, 32], sizes = [8, 32], strides = [1, 1]} : vector<8x128xf32> to vector<8x32xf32>
    %28 = vector.extract_strided_slice %25 {offsets = [0, 64], sizes = [8, 32], strides = [1, 1]} : vector<8x128xf32> to vector<8x32xf32>
    %29 = vector.extract_strided_slice %25 {offsets = [0, 96], sizes = [8, 32], strides = [1, 1]} : vector<8x128xf32> to vector<8x32xf32>
    %30 = arith.mulf %27, %14 : vector<8x32xf32>
    %31 = arith.mulf %26, %29 : vector<8x32xf32>
    %32 = arith.addf %30, %31 : vector<8x32xf32>
    %33 = math.tanh %32 : vector<8x32xf32>
    %34 = arith.mulf %28, %33 : vector<8x32xf32>
    %35 = arith.truncf %34 : vector<8x32xf32> to vector<8x32xbf16>
    %c0_15 = arith.constant 0 : index
    %c0_16 = arith.constant 0 : index
    %36 = vector.load %arg18[%c0_15, %c0_16] : memref<64x32xbf16, #tpu.memory_space<vmem>>, vector<8x32xbf16>
    tpu.vector_store %arg18[%c0_15, %c0_16], %35 {strides = array<i32>} : memref<64x32xbf16, #tpu.memory_space<vmem>>, vector<8x32xbf16>,
    %37 = vector.extract_strided_slice %9 {offsets = [8, 0], sizes = [8, 128], strides = [1, 1]} : vector<64x128xf32> to vector<8x128xf32>
    %38 = arith.truncf %34 : vector<8x32xf32> to vector<8x32xbf16>
    %cst_17 = arith.constant dense<0.000000e+00> : vector<8x128xf32>
    %39 = tpu.matmul %38, %10, %cst_17 {dimension_numbers = #tpu.dot_dimension_numbers<[1], [0], [0], [1], [0, 0, 1, 1], [], []>} : vector<8x32xbf16>, vector<32x128xbf16>, vector<8x128xf32> -> vector<8x128xf32>
    %40 = arith.addf %37, %39 : vector<8x128xf32>
    %41 = arith.negf %40 : vector<8x128xf32>
    %42 = math.exp %41 : vector<8x128xf32>
    %cst_18 = arith.constant 1.000000e+00 : f32
    %43 = vector.broadcast %cst_18 : f32 to vector<8x128xf32>
    %44 = arith.addf %43, %42 : vector<8x128xf32>
    %45 = arith.divf %43, %44 : vector<8x128xf32>
    %46 = math.tanh %40 : vector<8x128xf32>
    %47 = arith.select %2, %45, %46 : vector<8x128xi1>, vector<8x128xf32>
    %48 = vector.extract_strided_slice %47 {offsets = [0, 0], sizes = [8, 32], strides = [1, 1]} : vector<8x128xf32> to vector<8x32xf32>
    %49 = vector.extract_strided_slice %47 {offsets = [0, 32], sizes = [8, 32], strides = [1, 1]} : vector<8x128xf32> to vector<8x32xf32>
    %50 = vector.extract_strided_slice %47 {offsets = [0, 64], sizes = [8, 32], strides = [1, 1]} : vector<8x128xf32> to vector<8x32xf32>
    %51 = vector.extract_strided_slice %47 {offsets = [0, 96], sizes = [8, 32], strides = [1, 1]} : vector<8x128xf32> to vector<8x32xf32>
    %52 = arith.mulf %49, %32 : vector<8x32xf32>
    %53 = arith.mulf %48, %51 : vector<8x32xf32>
    %54 = arith.addf %52, %53 : vector<8x32xf32>
    %55 = math.tanh %54 : vector<8x32xf32>
    %56 = arith.mulf %50, %55 : vector<8x32xf32>
    %57 = arith.truncf %56 : vector<8x32xf32> to vector<8x32xbf16>
    %c8 = arith.constant 8 : index
    %c0_19 = arith.constant 0 : index
    %58 = vector.load %arg18[%c8, %c0_19] : memref<64x32xbf16, #tpu.memory_space<vmem>>, vector<8x32xbf16>
    tpu.vector_store %arg18[%c8, %c0_19], %57 {strides = array<i32>} : memref<64x32xbf16, #tpu.memory_space<vmem>>, vector<8x32xbf16>,
    %59 = vector.extract_strided_slice %9 {offsets = [16, 0], sizes = [8, 128], strides = [1, 1]} : vector<64x128xf32> to vector<8x128xf32>
    %60 = arith.truncf %56 : vector<8x32xf32> to vector<8x32xbf16>
    %cst_20 = arith.constant dense<0.000000e+00> : vector<8x128xf32>
    %61 = tpu.matmul %60, %10, %cst_20 {dimension_numbers = #tpu.dot_dimension_numbers<[1], [0], [0], [1], [0, 0, 1, 1], [], []>} : vector<8x32xbf16>, vector<32x128xbf16>, vector<8x128xf32> -> vector<8x128xf32>
    %62 = arith.addf %59, %61 : vector<8x128xf32>
    %63 = arith.negf %62 : vector<8x128xf32>
    %64 = math.exp %63 : vector<8x128xf32>
    %cst_21 = arith.constant 1.000000e+00 : f32
    %65 = vector.broadcast %cst_21 : f32 to vector<8x128xf32>
    %66 = arith.addf %65, %64 : vector<8x128xf32>
    %67 = arith.divf %65, %66 : vector<8x128xf32>
    %68 = math.tanh %62 : vector<8x128xf32>
    %69 = arith.select %2, %67, %68 : vector<8x128xi1>, vector<8x128xf32>
    %70 = vector.extract_strided_slice %69 {offsets = [0, 0], sizes = [8, 32], strides = [1, 1]} : vector<8x128xf32> to vector<8x32xf32>
    %71 = vector.extract_strided_slice %69 {offsets = [0, 32], sizes = [8, 32], strides = [1, 1]} : vector<8x128xf32> to vector<8x32xf32>
    %72 = vector.extract_strided_slice %69 {offsets = [0, 64], sizes = [8, 32], strides = [1, 1]} : vector<8x128xf32> to vector<8x32xf32>
    %73 = vector.extract_strided_slice %69 {offsets = [0, 96], sizes = [8, 32], strides = [1, 1]} : vector<8x128xf32> to vector<8x32xf32>
    %74 = arith.mulf %71, %54 : vector<8x32xf32>
    %75 = arith.mulf %70, %73 : vector<8x32xf32>
    %76 = arith.addf %74, %75 : vector<8x32xf32>
    %77 = math.tanh %76 : vector<8x32xf32>
    %78 = arith.mulf %72, %77 : vector<8x32xf32>
    %79 = arith.truncf %78 : vector<8x32xf32> to vector<8x32xbf16>
    %c16 = arith.constant 16 : index
    %c0_22 = arith.constant 0 : index
    %80 = vector.load %arg18[%c16, %c0_22] : memref<64x32xbf16, #tpu.memory_space<vmem>>, vector<8x32xbf16>
    tpu.vector_store %arg18[%c16, %c0_22], %79 {strides = array<i32>} : memref<64x32xbf16, #tpu.memory_space<vmem>>, vector<8x32xbf16>,
    %81 = vector.extract_strided_slice %9 {offsets = [24, 0], sizes = [8, 128], strides = [1, 1]} : vector<64x128xf32> to vector<8x128xf32>
    %82 = arith.truncf %78 : vector<8x32xf32> to vector<8x32xbf16>
    %cst_23 = arith.constant dense<0.000000e+00> : vector<8x128xf32>
    %83 = tpu.matmul %82, %10, %cst_23 {dimension_numbers = #tpu.dot_dimension_numbers<[1], [0], [0], [1], [0, 0, 1, 1], [], []>} : vector<8x32xbf16>, vector<32x128xbf16>, vector<8x128xf32> -> vector<8x128xf32>
    %84 = arith.addf %81, %83 : vector<8x128xf32>
    %85 = arith.negf %84 : vector<8x128xf32>
    %86 = math.exp %85 : vector<8x128xf32>
    %cst_24 = arith.constant 1.000000e+00 : f32
    %87 = vector.broadcast %cst_24 : f32 to vector<8x128xf32>
    %88 = arith.addf %87, %86 : vector<8x128xf32>
    %89 = arith.divf %87, %88 : vector<8x128xf32>
    %90 = math.tanh %84 : vector<8x128xf32>
    %91 = arith.select %2, %89, %90 : vector<8x128xi1>, vector<8x128xf32>
    %92 = vector.extract_strided_slice %91 {offsets = [0, 0], sizes = [8, 32], strides = [1, 1]} : vector<8x128xf32> to vector<8x32xf32>
    %93 = vector.extract_strided_slice %91 {offsets = [0, 32], sizes = [8, 32], strides = [1, 1]} : vector<8x128xf32> to vector<8x32xf32>
    %94 = vector.extract_strided_slice %91 {offsets = [0, 64], sizes = [8, 32], strides = [1, 1]} : vector<8x128xf32> to vector<8x32xf32>
    %95 = vector.extract_strided_slice %91 {offsets = [0, 96], sizes = [8, 32], strides = [1, 1]} : vector<8x128xf32> to vector<8x32xf32>
    %96 = arith.mulf %93, %76 : vector<8x32xf32>
    %97 = arith.mulf %92, %95 : vector<8x32xf32>
    %98 = arith.addf %96, %97 : vector<8x32xf32>
    %99 = math.tanh %98 : vector<8x32xf32>
    %100 = arith.mulf %94, %99 : vector<8x32xf32>
    %101 = arith.truncf %100 : vector<8x32xf32> to vector<8x32xbf16>
    %c24 = arith.constant 24 : index
    %c0_25 = arith.constant 0 : index
    %102 = vector.load %arg18[%c24, %c0_25] : memref<64x32xbf16, #tpu.memory_space<vmem>>, vector<8x32xbf16>
    tpu.vector_store %arg18[%c24, %c0_25], %101 {strides = array<i32>} : memref<64x32xbf16, #tpu.memory_space<vmem>>, vector<8x32xbf16>,
    %103 = vector.extract_strided_slice %9 {offsets = [32, 0], sizes = [8, 128], strides = [1, 1]} : vector<64x128xf32> to vector<8x128xf32>
    %104 = arith.truncf %100 : vector<8x32xf32> to vector<8x32xbf16>
    %cst_26 = arith.constant dense<0.000000e+00> : vector<8x128xf32>
    %105 = tpu.matmul %104, %10, %cst_26 {dimension_numbers = #tpu.dot_dimension_numbers<[1], [0], [0], [1], [0, 0, 1, 1], [], []>} : vector<8x32xbf16>, vector<32x128xbf16>, vector<8x128xf32> -> vector<8x128xf32>
    %106 = arith.addf %103, %105 : vector<8x128xf32>
    %107 = arith.negf %106 : vector<8x128xf32>
    %108 = math.exp %107 : vector<8x128xf32>
    %cst_27 = arith.constant 1.000000e+00 : f32
    %109 = vector.broadcast %cst_27 : f32 to vector<8x128xf32>
    %110 = arith.addf %109, %108 : vector<8x128xf32>
    %111 = arith.divf %109, %110 : vector<8x128xf32>
    %112 = math.tanh %106 : vector<8x128xf32>
    %113 = arith.select %2, %111, %112 : vector<8x128xi1>, vector<8x128xf32>
    %114 = vector.extract_strided_slice %113 {offsets = [0, 0], sizes = [8, 32], strides = [1, 1]} : vector<8x128xf32> to vector<8x32xf32>
    %115 = vector.extract_strided_slice %113 {offsets = [0, 32], sizes = [8, 32], strides = [1, 1]} : vector<8x128xf32> to vector<8x32xf32>
    %116 = vector.extract_strided_slice %113 {offsets = [0, 64], sizes = [8, 32], strides = [1, 1]} : vector<8x128xf32> to vector<8x32xf32>
    %117 = vector.extract_strided_slice %113 {offsets = [0, 96], sizes = [8, 32], strides = [1, 1]} : vector<8x128xf32> to vector<8x32xf32>
    %118 = arith.mulf %115, %98 : vector<8x32xf32>
    %119 = arith.mulf %114, %117 : vector<8x32xf32>
    %120 = arith.addf %118, %119 : vector<8x32xf32>
    %121 = math.tanh %120 : vector<8x32xf32>
    %122 = arith.mulf %116, %121 : vector<8x32xf32>
    %123 = arith.truncf %122 : vector<8x32xf32> to vector<8x32xbf16>
    %c32 = arith.constant 32 : index
    %c0_28 = arith.constant 0 : index
    %124 = vector.load %arg18[%c32, %c0_28] : memref<64x32xbf16, #tpu.memory_space<vmem>>, vector<8x32xbf16>
    tpu.vector_store %arg18[%c32, %c0_28], %123 {strides = array<i32>} : memref<64x32xbf16, #tpu.memory_space<vmem>>, vector<8x32xbf16>,
    %125 = vector.extract_strided_slice %9 {offsets = [40, 0], sizes = [8, 128], strides = [1, 1]} : vector<64x128xf32> to vector<8x128xf32>
    %126 = arith.truncf %122 : vector<8x32xf32> to vector<8x32xbf16>
    %cst_29 = arith.constant dense<0.000000e+00> : vector<8x128xf32>
    %127 = tpu.matmul %126, %10, %cst_29 {dimension_numbers = #tpu.dot_dimension_numbers<[1], [0], [0], [1], [0, 0, 1, 1], [], []>} : vector<8x32xbf16>, vector<32x128xbf16>, vector<8x128xf32> -> vector<8x128xf32>
    %128 = arith.addf %125, %127 : vector<8x128xf32>
    %129 = arith.negf %128 : vector<8x128xf32>
    %130 = math.exp %129 : vector<8x128xf32>
    %cst_30 = arith.constant 1.000000e+00 : f32
    %131 = vector.broadcast %cst_30 : f32 to vector<8x128xf32>
    %132 = arith.addf %131, %130 : vector<8x128xf32>
    %133 = arith.divf %131, %132 : vector<8x128xf32>
    %134 = math.tanh %128 : vector<8x128xf32>
    %135 = arith.select %2, %133, %134 : vector<8x128xi1>, vector<8x128xf32>
    %136 = vector.extract_strided_slice %135 {offsets = [0, 0], sizes = [8, 32], strides = [1, 1]} : vector<8x128xf32> to vector<8x32xf32>
    %137 = vector.extract_strided_slice %135 {offsets = [0, 32], sizes = [8, 32], strides = [1, 1]} : vector<8x128xf32> to vector<8x32xf32>
    %138 = vector.extract_strided_slice %135 {offsets = [0, 64], sizes = [8, 32], strides = [1, 1]} : vector<8x128xf32> to vector<8x32xf32>
    %139 = vector.extract_strided_slice %135 {offsets = [0, 96], sizes = [8, 32], strides = [1, 1]} : vector<8x128xf32> to vector<8x32xf32>
    %140 = arith.mulf %137, %120 : vector<8x32xf32>
    %141 = arith.mulf %136, %139 : vector<8x32xf32>
    %142 = arith.addf %140, %141 : vector<8x32xf32>
    %143 = math.tanh %142 : vector<8x32xf32>
    %144 = arith.mulf %138, %143 : vector<8x32xf32>
    %145 = arith.truncf %144 : vector<8x32xf32> to vector<8x32xbf16>
    %c40 = arith.constant 40 : index
    %c0_31 = arith.constant 0 : index
    %146 = vector.load %arg18[%c40, %c0_31] : memref<64x32xbf16, #tpu.memory_space<vmem>>, vector<8x32xbf16>
    tpu.vector_store %arg18[%c40, %c0_31], %145 {strides = array<i32>} : memref<64x32xbf16, #tpu.memory_space<vmem>>, vector<8x32xbf16>,
    %147 = vector.extract_strided_slice %9 {offsets = [48, 0], sizes = [8, 128], strides = [1, 1]} : vector<64x128xf32> to vector<8x128xf32>
    %148 = arith.truncf %144 : vector<8x32xf32> to vector<8x32xbf16>
    %cst_32 = arith.constant dense<0.000000e+00> : vector<8x128xf32>
    %149 = tpu.matmul %148, %10, %cst_32 {dimension_numbers = #tpu.dot_dimension_numbers<[1], [0], [0], [1], [0, 0, 1, 1], [], []>} : vector<8x32xbf16>, vector<32x128xbf16>, vector<8x128xf32> -> vector<8x128xf32>
    %150 = arith.addf %147, %149 : vector<8x128xf32>
    %151 = arith.negf %150 : vector<8x128xf32>
    %152 = math.exp %151 : vector<8x128xf32>
    %cst_33 = arith.constant 1.000000e+00 : f32
    %153 = vector.broadcast %cst_33 : f32 to vector<8x128xf32>
    %154 = arith.addf %153, %152 : vector<8x128xf32>
    %155 = arith.divf %153, %154 : vector<8x128xf32>
    %156 = math.tanh %150 : vector<8x128xf32>
    %157 = arith.select %2, %155, %156 : vector<8x128xi1>, vector<8x128xf32>
    %158 = vector.extract_strided_slice %157 {offsets = [0, 0], sizes = [8, 32], strides = [1, 1]} : vector<8x128xf32> to vector<8x32xf32>
    %159 = vector.extract_strided_slice %157 {offsets = [0, 32], sizes = [8, 32], strides = [1, 1]} : vector<8x128xf32> to vector<8x32xf32>
    %160 = vector.extract_strided_slice %157 {offsets = [0, 64], sizes = [8, 32], strides = [1, 1]} : vector<8x128xf32> to vector<8x32xf32>
    %161 = vector.extract_strided_slice %157 {offsets = [0, 96], sizes = [8, 32], strides = [1, 1]} : vector<8x128xf32> to vector<8x32xf32>
    %162 = arith.mulf %159, %142 : vector<8x32xf32>
    %163 = arith.mulf %158, %161 : vector<8x32xf32>
    %164 = arith.addf %162, %163 : vector<8x32xf32>
    %165 = math.tanh %164 : vector<8x32xf32>
    %166 = arith.mulf %160, %165 : vector<8x32xf32>
    %167 = arith.truncf %166 : vector<8x32xf32> to vector<8x32xbf16>
    %c48 = arith.constant 48 : index
    %c0_34 = arith.constant 0 : index
    %168 = vector.load %arg18[%c48, %c0_34] : memref<64x32xbf16, #tpu.memory_space<vmem>>, vector<8x32xbf16>
    tpu.vector_store %arg18[%c48, %c0_34], %167 {strides = array<i32>} : memref<64x32xbf16, #tpu.memory_space<vmem>>, vector<8x32xbf16>,
    %169 = vector.extract_strided_slice %9 {offsets = [56, 0], sizes = [8, 128], strides = [1, 1]} : vector<64x128xf32> to vector<8x128xf32>
    %170 = arith.truncf %166 : vector<8x32xf32> to vector<8x32xbf16>
    %cst_35 = arith.constant dense<0.000000e+00> : vector<8x128xf32>
    %171 = tpu.matmul %170, %10, %cst_35 {dimension_numbers = #tpu.dot_dimension_numbers<[1], [0], [0], [1], [0, 0, 1, 1], [], []>} : vector<8x32xbf16>, vector<32x128xbf16>, vector<8x128xf32> -> vector<8x128xf32>
    %172 = arith.addf %169, %171 : vector<8x128xf32>
    %173 = arith.negf %172 : vector<8x128xf32>
    %174 = math.exp %173 : vector<8x128xf32>
    %cst_36 = arith.constant 1.000000e+00 : f32
    %175 = vector.broadcast %cst_36 : f32 to vector<8x128xf32>
    %176 = arith.addf %175, %174 : vector<8x128xf32>
    %177 = arith.divf %175, %176 : vector<8x128xf32>
    %178 = math.tanh %172 : vector<8x128xf32>
    %179 = arith.select %2, %177, %178 : vector<8x128xi1>, vector<8x128xf32>
    %180 = vector.extract_strided_slice %179 {offsets = [0, 0], sizes = [8, 32], strides = [1, 1]} : vector<8x128xf32> to vector<8x32xf32>
    %181 = vector.extract_strided_slice %179 {offsets = [0, 32], sizes = [8, 32], strides = [1, 1]} : vector<8x128xf32> to vector<8x32xf32>
    %182 = vector.extract_strided_slice %179 {offsets = [0, 64], sizes = [8, 32], strides = [1, 1]} : vector<8x128xf32> to vector<8x32xf32>
    %183 = vector.extract_strided_slice %179 {offsets = [0, 96], sizes = [8, 32], strides = [1, 1]} : vector<8x128xf32> to vector<8x32xf32>
    %184 = arith.mulf %181, %164 : vector<8x32xf32>
    %185 = arith.mulf %180, %183 : vector<8x32xf32>
    %186 = arith.addf %184, %185 : vector<8x32xf32>
    %187 = math.tanh %186 : vector<8x32xf32>
    %188 = arith.mulf %182, %187 : vector<8x32xf32>
    %189 = arith.truncf %188 : vector<8x32xf32> to vector<8x32xbf16>
    %c56 = arith.constant 56 : index
    %c0_37 = arith.constant 0 : index
    %190 = vector.load %arg18[%c56, %c0_37] : memref<64x32xbf16, #tpu.memory_space<vmem>>, vector<8x32xbf16>
    tpu.vector_store %arg18[%c56, %c0_37], %189 {strides = array<i32>} : memref<64x32xbf16, #tpu.memory_space<vmem>>, vector<8x32xbf16>,
    %c0_38 = arith.constant 0 : index
    %c0_39 = arith.constant 0 : index
    %c0_40 = arith.constant 0 : index
    %191 = vector.load %arg16[%c0_38, %c0_39, %c0_40] : memref<2x8x32xf32, #tpu.memory_space<vmem>>, vector<1x8x32xf32>
    %192 = vector.shape_cast %191 : vector<1x8x32xf32> to vector<8x32xf32>
    %193 = vector.shape_cast %188 : vector<8x32xf32> to vector<1x8x32xf32>
    tpu.vector_store %arg16[%c0_38, %c0_39, %c0_40], %193 {strides = array<i32>} : memref<2x8x32xf32, #tpu.memory_space<vmem>>, vector<1x8x32xf32>,
    %c0_41 = arith.constant 0 : index
    %c0_42 = arith.constant 0 : index
    %c0_43 = arith.constant 0 : index
    %194 = vector.load %arg17[%c0_41, %c0_42, %c0_43] : memref<2x8x32xf32, #tpu.memory_space<vmem>>, vector<1x8x32xf32>
    %195 = vector.shape_cast %194 : vector<1x8x32xf32> to vector<8x32xf32>
    %196 = vector.shape_cast %186 : vector<8x32xf32> to vector<1x8x32xf32>
    tpu.vector_store %arg17[%c0_41, %c0_42, %c0_43], %196 {strides = array<i32>} : memref<2x8x32xf32, #tpu.memory_space<vmem>>, vector<1x8x32xf32>,
    %c0_44 = arith.constant 0 : index
    %c0_45 = arith.constant 0 : index
    %197 = vector.load %arg18[%c0_44, %c0_45] : memref<64x32xbf16, #tpu.memory_space<vmem>>, vector<64x32xbf16>
    %c0_46 = arith.constant 0 : index
    %c0_47 = arith.constant 0 : index
    %198 = vector.load %arg4[%c0_46, %c0_47] : memref<32x128xbf16, #tpu.memory_space<vmem>>, vector<32x128xbf16>
    %cst_48 = arith.constant dense<0.000000e+00> : vector<64x128xf32>
    %199 = tpu.matmul %197, %198, %cst_48 {dimension_numbers = #tpu.dot_dimension_numbers<[1], [0], [0], [1], [0, 0, 1, 1], [], []>} : vector<64x32xbf16>, vector<32x128xbf16>, vector<64x128xf32> -> vector<64x128xf32>
    %c0_49 = arith.constant 0 : index
    %c0_50 = arith.constant 0 : index
    %200 = vector.load %arg8[%c0_49, %c0_50] : memref<1x128xf32, #tpu.memory_space<vmem>>, vector<1x128xf32>
    %201 = vector.broadcast %200 : vector<1x128xf32> to vector<64x128xf32>
    %202 = arith.addf %199, %201 : vector<64x128xf32>
    %c0_51 = arith.constant 0 : index
    %c0_52 = arith.constant 0 : index
    %203 = vector.load %arg6[%c0_51, %c0_52] : memref<32x128xbf16, #tpu.memory_space<vmem>>, vector<32x128xbf16>
    %c1 = arith.constant 1 : index
    %c0_53 = arith.constant 0 : index
    %c0_54 = arith.constant 0 : index
    %204 = vector.load %arg1[%c1, %c0_53, %c0_54] : memref<2x8x32xf32, #tpu.memory_space<vmem>>, vector<1x8x32xf32>
    %205 = vector.shape_cast %204 : vector<1x8x32xf32> to vector<8x32xf32>
    %c1_55 = arith.constant 1 : index
    %c0_56 = arith.constant 0 : index
    %c0_57 = arith.constant 0 : index
    %206 = vector.load %arg2[%c1_55, %c0_56, %c0_57] : memref<2x8x32xf32, #tpu.memory_space<vmem>>, vector<1x8x32xf32>
    %207 = vector.shape_cast %206 : vector<1x8x32xf32> to vector<8x32xf32>
    %208 = vector.extract_strided_slice %202 {offsets = [0, 0], sizes = [8, 128], strides = [1, 1]} : vector<64x128xf32> to vector<8x128xf32>
    %209 = arith.truncf %205 : vector<8x32xf32> to vector<8x32xbf16>
    %cst_58 = arith.constant dense<0.000000e+00> : vector<8x128xf32>
    %210 = tpu.matmul %209, %203, %cst_58 {dimension_numbers = #tpu.dot_dimension_numbers<[1], [0], [0], [1], [0, 0, 1, 1], [], []>} : vector<8x32xbf16>, vector<32x128xbf16>, vector<8x128xf32> -> vector<8x128xf32>
    %211 = arith.addf %208, %210 : vector<8x128xf32>
    %212 = arith.negf %211 : vector<8x128xf32>
    %213 = math.exp %212 : vector<8x128xf32>
    %cst_59 = arith.constant 1.000000e+00 : f32
    %214 = vector.broadcast %cst_59 : f32 to vector<8x128xf32>
    %215 = arith.addf %214, %213 : vector<8x128xf32>
    %216 = arith.divf %214, %215 : vector<8x128xf32>
    %217 = math.tanh %211 : vector<8x128xf32>
    %218 = arith.select %2, %216, %217 : vector<8x128xi1>, vector<8x128xf32>
    %219 = vector.extract_strided_slice %218 {offsets = [0, 0], sizes = [8, 32], strides = [1, 1]} : vector<8x128xf32> to vector<8x32xf32>
    %220 = vector.extract_strided_slice %218 {offsets = [0, 32], sizes = [8, 32], strides = [1, 1]} : vector<8x128xf32> to vector<8x32xf32>
    %221 = vector.extract_strided_slice %218 {offsets = [0, 64], sizes = [8, 32], strides = [1, 1]} : vector<8x128xf32> to vector<8x32xf32>
    %222 = vector.extract_strided_slice %218 {offsets = [0, 96], sizes = [8, 32], strides = [1, 1]} : vector<8x128xf32> to vector<8x32xf32>
    %223 = arith.mulf %220, %207 : vector<8x32xf32>
    %224 = arith.mulf %219, %222 : vector<8x32xf32>
    %225 = arith.addf %223, %224 : vector<8x32xf32>
    %226 = math.tanh %225 : vector<8x32xf32>
    %227 = arith.mulf %221, %226 : vector<8x32xf32>
    %228 = math.tanh %227 : vector<8x32xf32>
    %229 = arith.truncf %228 : vector<8x32xf32> to vector<8x32xbf16>
    %c0_60 = arith.constant 0 : index
    %c0_61 = arith.constant 0 : index
    %230 = vector.load %arg18[%c0_60, %c0_61] : memref<64x32xbf16, #tpu.memory_space<vmem>>, vector<8x32xbf16>
    tpu.vector_store %arg18[%c0_60, %c0_61], %229 {strides = array<i32>} : memref<64x32xbf16, #tpu.memory_space<vmem>>, vector<8x32xbf16>,
    %231 = vector.extract_strided_slice %202 {offsets = [8, 0], sizes = [8, 128], strides = [1, 1]} : vector<64x128xf32> to vector<8x128xf32>
    %232 = arith.truncf %227 : vector<8x32xf32> to vector<8x32xbf16>
    %cst_62 = arith.constant dense<0.000000e+00> : vector<8x128xf32>
    %233 = tpu.matmul %232, %203, %cst_62 {dimension_numbers = #tpu.dot_dimension_numbers<[1], [0], [0], [1], [0, 0, 1, 1], [], []>} : vector<8x32xbf16>, vector<32x128xbf16>, vector<8x128xf32> -> vector<8x128xf32>
    %234 = arith.addf %231, %233 : vector<8x128xf32>
    %235 = arith.negf %234 : vector<8x128xf32>
    %236 = math.exp %235 : vector<8x128xf32>
    %cst_63 = arith.constant 1.000000e+00 : f32
    %237 = vector.broadcast %cst_63 : f32 to vector<8x128xf32>
    %238 = arith.addf %237, %236 : vector<8x128xf32>
    %239 = arith.divf %237, %238 : vector<8x128xf32>
    %240 = math.tanh %234 : vector<8x128xf32>
    %241 = arith.select %2, %239, %240 : vector<8x128xi1>, vector<8x128xf32>
    %242 = vector.extract_strided_slice %241 {offsets = [0, 0], sizes = [8, 32], strides = [1, 1]} : vector<8x128xf32> to vector<8x32xf32>
    %243 = vector.extract_strided_slice %241 {offsets = [0, 32], sizes = [8, 32], strides = [1, 1]} : vector<8x128xf32> to vector<8x32xf32>
    %244 = vector.extract_strided_slice %241 {offsets = [0, 64], sizes = [8, 32], strides = [1, 1]} : vector<8x128xf32> to vector<8x32xf32>
    %245 = vector.extract_strided_slice %241 {offsets = [0, 96], sizes = [8, 32], strides = [1, 1]} : vector<8x128xf32> to vector<8x32xf32>
    %246 = arith.mulf %243, %225 : vector<8x32xf32>
    %247 = arith.mulf %242, %245 : vector<8x32xf32>
    %248 = arith.addf %246, %247 : vector<8x32xf32>
    %249 = math.tanh %248 : vector<8x32xf32>
    %250 = arith.mulf %244, %249 : vector<8x32xf32>
    %251 = math.tanh %250 : vector<8x32xf32>
    %252 = arith.truncf %251 : vector<8x32xf32> to vector<8x32xbf16>
    %c8_64 = arith.constant 8 : index
    %c0_65 = arith.constant 0 : index
    %253 = vector.load %arg18[%c8_64, %c0_65] : memref<64x32xbf16, #tpu.memory_space<vmem>>, vector<8x32xbf16>
    tpu.vector_store %arg18[%c8_64, %c0_65], %252 {strides = array<i32>} : memref<64x32xbf16, #tpu.memory_space<vmem>>, vector<8x32xbf16>,
    %254 = vector.extract_strided_slice %202 {offsets = [16, 0], sizes = [8, 128], strides = [1, 1]} : vector<64x128xf32> to vector<8x128xf32>
    %255 = arith.truncf %250 : vector<8x32xf32> to vector<8x32xbf16>
    %cst_66 = arith.constant dense<0.000000e+00> : vector<8x128xf32>
    %256 = tpu.matmul %255, %203, %cst_66 {dimension_numbers = #tpu.dot_dimension_numbers<[1], [0], [0], [1], [0, 0, 1, 1], [], []>} : vector<8x32xbf16>, vector<32x128xbf16>, vector<8x128xf32> -> vector<8x128xf32>
    %257 = arith.addf %254, %256 : vector<8x128xf32>
    %258 = arith.negf %257 : vector<8x128xf32>
    %259 = math.exp %258 : vector<8x128xf32>
    %cst_67 = arith.constant 1.000000e+00 : f32
    %260 = vector.broadcast %cst_67 : f32 to vector<8x128xf32>
    %261 = arith.addf %260, %259 : vector<8x128xf32>
    %262 = arith.divf %260, %261 : vector<8x128xf32>
    %263 = math.tanh %257 : vector<8x128xf32>
    %264 = arith.select %2, %262, %263 : vector<8x128xi1>, vector<8x128xf32>
    %265 = vector.extract_strided_slice %264 {offsets = [0, 0], sizes = [8, 32], strides = [1, 1]} : vector<8x128xf32> to vector<8x32xf32>
    %266 = vector.extract_strided_slice %264 {offsets = [0, 32], sizes = [8, 32], strides = [1, 1]} : vector<8x128xf32> to vector<8x32xf32>
    %267 = vector.extract_strided_slice %264 {offsets = [0, 64], sizes = [8, 32], strides = [1, 1]} : vector<8x128xf32> to vector<8x32xf32>
    %268 = vector.extract_strided_slice %264 {offsets = [0, 96], sizes = [8, 32], strides = [1, 1]} : vector<8x128xf32> to vector<8x32xf32>
    %269 = arith.mulf %266, %248 : vector<8x32xf32>
    %270 = arith.mulf %265, %268 : vector<8x32xf32>
    %271 = arith.addf %269, %270 : vector<8x32xf32>
    %272 = math.tanh %271 : vector<8x32xf32>
    %273 = arith.mulf %267, %272 : vector<8x32xf32>
    %274 = math.tanh %273 : vector<8x32xf32>
    %275 = arith.truncf %274 : vector<8x32xf32> to vector<8x32xbf16>
    %c16_68 = arith.constant 16 : index
    %c0_69 = arith.constant 0 : index
    %276 = vector.load %arg18[%c16_68, %c0_69] : memref<64x32xbf16, #tpu.memory_space<vmem>>, vector<8x32xbf16>
    tpu.vector_store %arg18[%c16_68, %c0_69], %275 {strides = array<i32>} : memref<64x32xbf16, #tpu.memory_space<vmem>>, vector<8x32xbf16>,
    %277 = vector.extract_strided_slice %202 {offsets = [24, 0], sizes = [8, 128], strides = [1, 1]} : vector<64x128xf32> to vector<8x128xf32>
    %278 = arith.truncf %273 : vector<8x32xf32> to vector<8x32xbf16>
    %cst_70 = arith.constant dense<0.000000e+00> : vector<8x128xf32>
    %279 = tpu.matmul %278, %203, %cst_70 {dimension_numbers = #tpu.dot_dimension_numbers<[1], [0], [0], [1], [0, 0, 1, 1], [], []>} : vector<8x32xbf16>, vector<32x128xbf16>, vector<8x128xf32> -> vector<8x128xf32>
    %280 = arith.addf %277, %279 : vector<8x128xf32>
    %281 = arith.negf %280 : vector<8x128xf32>
    %282 = math.exp %281 : vector<8x128xf32>
    %cst_71 = arith.constant 1.000000e+00 : f32
    %283 = vector.broadcast %cst_71 : f32 to vector<8x128xf32>
    %284 = arith.addf %283, %282 : vector<8x128xf32>
    %285 = arith.divf %283, %284 : vector<8x128xf32>
    %286 = math.tanh %280 : vector<8x128xf32>
    %287 = arith.select %2, %285, %286 : vector<8x128xi1>, vector<8x128xf32>
    %288 = vector.extract_strided_slice %287 {offsets = [0, 0], sizes = [8, 32], strides = [1, 1]} : vector<8x128xf32> to vector<8x32xf32>
    %289 = vector.extract_strided_slice %287 {offsets = [0, 32], sizes = [8, 32], strides = [1, 1]} : vector<8x128xf32> to vector<8x32xf32>
    %290 = vector.extract_strided_slice %287 {offsets = [0, 64], sizes = [8, 32], strides = [1, 1]} : vector<8x128xf32> to vector<8x32xf32>
    %291 = vector.extract_strided_slice %287 {offsets = [0, 96], sizes = [8, 32], strides = [1, 1]} : vector<8x128xf32> to vector<8x32xf32>
    %292 = arith.mulf %289, %271 : vector<8x32xf32>
    %293 = arith.mulf %288, %291 : vector<8x32xf32>
    %294 = arith.addf %292, %293 : vector<8x32xf32>
    %295 = math.tanh %294 : vector<8x32xf32>
    %296 = arith.mulf %290, %295 : vector<8x32xf32>
    %297 = math.tanh %296 : vector<8x32xf32>
    %298 = arith.truncf %297 : vector<8x32xf32> to vector<8x32xbf16>
    %c24_72 = arith.constant 24 : index
    %c0_73 = arith.constant 0 : index
    %299 = vector.load %arg18[%c24_72, %c0_73] : memref<64x32xbf16, #tpu.memory_space<vmem>>, vector<8x32xbf16>
    tpu.vector_store %arg18[%c24_72, %c0_73], %298 {strides = array<i32>} : memref<64x32xbf16, #tpu.memory_space<vmem>>, vector<8x32xbf16>,
    %300 = vector.extract_strided_slice %202 {offsets = [32, 0], sizes = [8, 128], strides = [1, 1]} : vector<64x128xf32> to vector<8x128xf32>
    %301 = arith.truncf %296 : vector<8x32xf32> to vector<8x32xbf16>
    %cst_74 = arith.constant dense<0.000000e+00> : vector<8x128xf32>
    %302 = tpu.matmul %301, %203, %cst_74 {dimension_numbers = #tpu.dot_dimension_numbers<[1], [0], [0], [1], [0, 0, 1, 1], [], []>} : vector<8x32xbf16>, vector<32x128xbf16>, vector<8x128xf32> -> vector<8x128xf32>
    %303 = arith.addf %300, %302 : vector<8x128xf32>
    %304 = arith.negf %303 : vector<8x128xf32>
    %305 = math.exp %304 : vector<8x128xf32>
    %cst_75 = arith.constant 1.000000e+00 : f32
    %306 = vector.broadcast %cst_75 : f32 to vector<8x128xf32>
    %307 = arith.addf %306, %305 : vector<8x128xf32>
    %308 = arith.divf %306, %307 : vector<8x128xf32>
    %309 = math.tanh %303 : vector<8x128xf32>
    %310 = arith.select %2, %308, %309 : vector<8x128xi1>, vector<8x128xf32>
    %311 = vector.extract_strided_slice %310 {offsets = [0, 0], sizes = [8, 32], strides = [1, 1]} : vector<8x128xf32> to vector<8x32xf32>
    %312 = vector.extract_strided_slice %310 {offsets = [0, 32], sizes = [8, 32], strides = [1, 1]} : vector<8x128xf32> to vector<8x32xf32>
    %313 = vector.extract_strided_slice %310 {offsets = [0, 64], sizes = [8, 32], strides = [1, 1]} : vector<8x128xf32> to vector<8x32xf32>
    %314 = vector.extract_strided_slice %310 {offsets = [0, 96], sizes = [8, 32], strides = [1, 1]} : vector<8x128xf32> to vector<8x32xf32>
    %315 = arith.mulf %312, %294 : vector<8x32xf32>
    %316 = arith.mulf %311, %314 : vector<8x32xf32>
    %317 = arith.addf %315, %316 : vector<8x32xf32>
    %318 = math.tanh %317 : vector<8x32xf32>
    %319 = arith.mulf %313, %318 : vector<8x32xf32>
    %320 = math.tanh %319 : vector<8x32xf32>
    %321 = arith.truncf %320 : vector<8x32xf32> to vector<8x32xbf16>
    %c32_76 = arith.constant 32 : index
    %c0_77 = arith.constant 0 : index
    %322 = vector.load %arg18[%c32_76, %c0_77] : memref<64x32xbf16, #tpu.memory_space<vmem>>, vector<8x32xbf16>
    tpu.vector_store %arg18[%c32_76, %c0_77], %321 {strides = array<i32>} : memref<64x32xbf16, #tpu.memory_space<vmem>>, vector<8x32xbf16>,
    %323 = vector.extract_strided_slice %202 {offsets = [40, 0], sizes = [8, 128], strides = [1, 1]} : vector<64x128xf32> to vector<8x128xf32>
    %324 = arith.truncf %319 : vector<8x32xf32> to vector<8x32xbf16>
    %cst_78 = arith.constant dense<0.000000e+00> : vector<8x128xf32>
    %325 = tpu.matmul %324, %203, %cst_78 {dimension_numbers = #tpu.dot_dimension_numbers<[1], [0], [0], [1], [0, 0, 1, 1], [], []>} : vector<8x32xbf16>, vector<32x128xbf16>, vector<8x128xf32> -> vector<8x128xf32>
    %326 = arith.addf %323, %325 : vector<8x128xf32>
    %327 = arith.negf %326 : vector<8x128xf32>
    %328 = math.exp %327 : vector<8x128xf32>
    %cst_79 = arith.constant 1.000000e+00 : f32
    %329 = vector.broadcast %cst_79 : f32 to vector<8x128xf32>
    %330 = arith.addf %329, %328 : vector<8x128xf32>
    %331 = arith.divf %329, %330 : vector<8x128xf32>
    %332 = math.tanh %326 : vector<8x128xf32>
    %333 = arith.select %2, %331, %332 : vector<8x128xi1>, vector<8x128xf32>
    %334 = vector.extract_strided_slice %333 {offsets = [0, 0], sizes = [8, 32], strides = [1, 1]} : vector<8x128xf32> to vector<8x32xf32>
    %335 = vector.extract_strided_slice %333 {offsets = [0, 32], sizes = [8, 32], strides = [1, 1]} : vector<8x128xf32> to vector<8x32xf32>
    %336 = vector.extract_strided_slice %333 {offsets = [0, 64], sizes = [8, 32], strides = [1, 1]} : vector<8x128xf32> to vector<8x32xf32>
    %337 = vector.extract_strided_slice %333 {offsets = [0, 96], sizes = [8, 32], strides = [1, 1]} : vector<8x128xf32> to vector<8x32xf32>
    %338 = arith.mulf %335, %317 : vector<8x32xf32>
    %339 = arith.mulf %334, %337 : vector<8x32xf32>
    %340 = arith.addf %338, %339 : vector<8x32xf32>
    %341 = math.tanh %340 : vector<8x32xf32>
    %342 = arith.mulf %336, %341 : vector<8x32xf32>
    %343 = math.tanh %342 : vector<8x32xf32>
    %344 = arith.truncf %343 : vector<8x32xf32> to vector<8x32xbf16>
    %c40_80 = arith.constant 40 : index
    %c0_81 = arith.constant 0 : index
    %345 = vector.load %arg18[%c40_80, %c0_81] : memref<64x32xbf16, #tpu.memory_space<vmem>>, vector<8x32xbf16>
    tpu.vector_store %arg18[%c40_80, %c0_81], %344 {strides = array<i32>} : memref<64x32xbf16, #tpu.memory_space<vmem>>, vector<8x32xbf16>,
    %346 = vector.extract_strided_slice %202 {offsets = [48, 0], sizes = [8, 128], strides = [1, 1]} : vector<64x128xf32> to vector<8x128xf32>
    %347 = arith.truncf %342 : vector<8x32xf32> to vector<8x32xbf16>
    %cst_82 = arith.constant dense<0.000000e+00> : vector<8x128xf32>
    %348 = tpu.matmul %347, %203, %cst_82 {dimension_numbers = #tpu.dot_dimension_numbers<[1], [0], [0], [1], [0, 0, 1, 1], [], []>} : vector<8x32xbf16>, vector<32x128xbf16>, vector<8x128xf32> -> vector<8x128xf32>
    %349 = arith.addf %346, %348 : vector<8x128xf32>
    %350 = arith.negf %349 : vector<8x128xf32>
    %351 = math.exp %350 : vector<8x128xf32>
    %cst_83 = arith.constant 1.000000e+00 : f32
    %352 = vector.broadcast %cst_83 : f32 to vector<8x128xf32>
    %353 = arith.addf %352, %351 : vector<8x128xf32>
    %354 = arith.divf %352, %353 : vector<8x128xf32>
    %355 = math.tanh %349 : vector<8x128xf32>
    %356 = arith.select %2, %354, %355 : vector<8x128xi1>, vector<8x128xf32>
    %357 = vector.extract_strided_slice %356 {offsets = [0, 0], sizes = [8, 32], strides = [1, 1]} : vector<8x128xf32> to vector<8x32xf32>
    %358 = vector.extract_strided_slice %356 {offsets = [0, 32], sizes = [8, 32], strides = [1, 1]} : vector<8x128xf32> to vector<8x32xf32>
    %359 = vector.extract_strided_slice %356 {offsets = [0, 64], sizes = [8, 32], strides = [1, 1]} : vector<8x128xf32> to vector<8x32xf32>
    %360 = vector.extract_strided_slice %356 {offsets = [0, 96], sizes = [8, 32], strides = [1, 1]} : vector<8x128xf32> to vector<8x32xf32>
    %361 = arith.mulf %358, %340 : vector<8x32xf32>
    %362 = arith.mulf %357, %360 : vector<8x32xf32>
    %363 = arith.addf %361, %362 : vector<8x32xf32>
    %364 = math.tanh %363 : vector<8x32xf32>
    %365 = arith.mulf %359, %364 : vector<8x32xf32>
    %366 = math.tanh %365 : vector<8x32xf32>
    %367 = arith.truncf %366 : vector<8x32xf32> to vector<8x32xbf16>
    %c48_84 = arith.constant 48 : index
    %c0_85 = arith.constant 0 : index
    %368 = vector.load %arg18[%c48_84, %c0_85] : memref<64x32xbf16, #tpu.memory_space<vmem>>, vector<8x32xbf16>
    tpu.vector_store %arg18[%c48_84, %c0_85], %367 {strides = array<i32>} : memref<64x32xbf16, #tpu.memory_space<vmem>>, vector<8x32xbf16>,
    %369 = vector.extract_strided_slice %202 {offsets = [56, 0], sizes = [8, 128], strides = [1, 1]} : vector<64x128xf32> to vector<8x128xf32>
    %370 = arith.truncf %365 : vector<8x32xf32> to vector<8x32xbf16>
    %cst_86 = arith.constant dense<0.000000e+00> : vector<8x128xf32>
    %371 = tpu.matmul %370, %203, %cst_86 {dimension_numbers = #tpu.dot_dimension_numbers<[1], [0], [0], [1], [0, 0, 1, 1], [], []>} : vector<8x32xbf16>, vector<32x128xbf16>, vector<8x128xf32> -> vector<8x128xf32>
    %372 = arith.addf %369, %371 : vector<8x128xf32>
    %373 = arith.negf %372 : vector<8x128xf32>
    %374 = math.exp %373 : vector<8x128xf32>
    %cst_87 = arith.constant 1.000000e+00 : f32
    %375 = vector.broadcast %cst_87 : f32 to vector<8x128xf32>
    %376 = arith.addf %375, %374 : vector<8x128xf32>
    %377 = arith.divf %375, %376 : vector<8x128xf32>
    %378 = math.tanh %372 : vector<8x128xf32>
    %379 = arith.select %2, %377, %378 : vector<8x128xi1>, vector<8x128xf32>
    %380 = vector.extract_strided_slice %379 {offsets = [0, 0], sizes = [8, 32], strides = [1, 1]} : vector<8x128xf32> to vector<8x32xf32>
    %381 = vector.extract_strided_slice %379 {offsets = [0, 32], sizes = [8, 32], strides = [1, 1]} : vector<8x128xf32> to vector<8x32xf32>
    %382 = vector.extract_strided_slice %379 {offsets = [0, 64], sizes = [8, 32], strides = [1, 1]} : vector<8x128xf32> to vector<8x32xf32>
    %383 = vector.extract_strided_slice %379 {offsets = [0, 96], sizes = [8, 32], strides = [1, 1]} : vector<8x128xf32> to vector<8x32xf32>
    %384 = arith.mulf %381, %363 : vector<8x32xf32>
    %385 = arith.mulf %380, %383 : vector<8x32xf32>
    %386 = arith.addf %384, %385 : vector<8x32xf32>
    %387 = math.tanh %386 : vector<8x32xf32>
    %388 = arith.mulf %382, %387 : vector<8x32xf32>
    %389 = math.tanh %388 : vector<8x32xf32>
    %390 = arith.truncf %389 : vector<8x32xf32> to vector<8x32xbf16>
    %c56_88 = arith.constant 56 : index
    %c0_89 = arith.constant 0 : index
    %391 = vector.load %arg18[%c56_88, %c0_89] : memref<64x32xbf16, #tpu.memory_space<vmem>>, vector<8x32xbf16>
    tpu.vector_store %arg18[%c56_88, %c0_89], %390 {strides = array<i32>} : memref<64x32xbf16, #tpu.memory_space<vmem>>, vector<8x32xbf16>,
    %c1_90 = arith.constant 1 : index
    %c0_91 = arith.constant 0 : index
    %c0_92 = arith.constant 0 : index
    %392 = vector.load %arg16[%c1_90, %c0_91, %c0_92] : memref<2x8x32xf32, #tpu.memory_space<vmem>>, vector<1x8x32xf32>
    %393 = vector.shape_cast %392 : vector<1x8x32xf32> to vector<8x32xf32>
    %394 = vector.shape_cast %388 : vector<8x32xf32> to vector<1x8x32xf32>
    tpu.vector_store %arg16[%c1_90, %c0_91, %c0_92], %394 {strides = array<i32>} : memref<2x8x32xf32, #tpu.memory_space<vmem>>, vector<1x8x32xf32>,
    %c1_93 = arith.constant 1 : index
    %c0_94 = arith.constant 0 : index
    %c0_95 = arith.constant 0 : index
    %395 = vector.load %arg17[%c1_93, %c0_94, %c0_95] : memref<2x8x32xf32, #tpu.memory_space<vmem>>, vector<1x8x32xf32>
    %396 = vector.shape_cast %395 : vector<1x8x32xf32> to vector<8x32xf32>
    %397 = vector.shape_cast %386 : vector<8x32xf32> to vector<1x8x32xf32>
    tpu.vector_store %arg17[%c1_93, %c0_94, %c0_95], %397 {strides = array<i32>} : memref<2x8x32xf32, #tpu.memory_space<vmem>>, vector<1x8x32xf32>,
    %c0_96 = arith.constant 0 : index
    %c0_97 = arith.constant 0 : index
    %398 = vector.load %arg18[%c0_96, %c0_97] : memref<64x32xbf16, #tpu.memory_space<vmem>>, vector<64x32xbf16>
    %c0_98 = arith.constant 0 : index
    %c0_99 = arith.constant 0 : index
    %399 = vector.load %arg9[%c0_98, %c0_99] : memref<32x32xbf16, #tpu.memory_space<vmem>>, vector<32x32xbf16>
    %cst_100 = arith.constant dense<0.000000e+00> : vector<64x32xf32>
    %400 = tpu.matmul %398, %399, %cst_100 {dimension_numbers = #tpu.dot_dimension_numbers<[1], [0], [0], [1], [0, 0, 1, 1], [], []>} : vector<64x32xbf16>, vector<32x32xbf16>, vector<64x32xf32> -> vector<64x32xf32>
    %c0_101 = arith.constant 0 : index
    %c0_102 = arith.constant 0 : index
    %401 = vector.load %arg10[%c0_101, %c0_102] : memref<1x32xf32, #tpu.memory_space<vmem>>, vector<1x32xf32>
    %402 = vector.broadcast %401 : vector<1x32xf32> to vector<64x32xf32>
    %403 = arith.addf %400, %402 : vector<64x32xf32>
    %404 = tpu.iota {dimensions = array<i32: 1>} : vector<64x32xi32>
    %c16_i32 = arith.constant 16 : i32
    %405 = vector.broadcast %c16_i32 : i32 to vector<64x32xi32>
    %406 = arith.cmpi slt, %404, %405 : vector<64x32xi32>
    %cst_103 = arith.constant 0.000000e+00 : f32
    %407 = vector.broadcast %cst_103 : f32 to vector<64x32xf32>
    %408 = arith.maximumf %403, %407 : vector<64x32xf32>
    %409 = vector.broadcast %cst_103 : f32 to vector<64x32xf32>
    %410 = arith.subf %403, %409 : vector<64x32xf32>
    %411 = arith.cmpf one, %410, %410 : vector<64x32xf32>
    %412 = vector.broadcast %cst_103 : f32 to vector<64x32xf32>
    %413 = arith.addf %403, %412 : vector<64x32xf32>
    %414 = math.absf %410 : vector<64x32xf32>
    %cst_104 = arith.constant 0.000000e+00 : f32
    %415 = vector.broadcast %cst_104 : f32 to vector<64x32xf32>
    %416 = arith.subf %415, %414 : vector<64x32xf32>
    %417 = math.exp %416 : vector<64x32xf32>
    %418 = math.log1p %417 : vector<64x32xf32>
    %419 = arith.addf %408, %418 : vector<64x32xf32>
    %420 = arith.select %411, %413, %419 : vector<64x32xi1>, vector<64x32xf32>
    %cst_105 = arith.constant 9.99999974E-5 : f32
    %421 = vector.broadcast %cst_105 : f32 to vector<64x32xf32>
    %422 = arith.addf %420, %421 : vector<64x32xf32>
    %423 = arith.select %406, %403, %422 : vector<64x32xi1>, vector<64x32xf32>
    %424 = vector.extract_strided_slice %423 {offsets = [0, 0], sizes = [64, 16], strides = [1, 1]} : vector<64x32xf32> to vector<64x16xf32>
    %c0_106 = arith.constant 0 : index
    %c0_107 = arith.constant 0 : index
    %425 = vector.load %arg11[%c0_106, %c0_107] : memref<16x16xbf16, #tpu.memory_space<vmem>>, vector<16x16xbf16>
    %c0_108 = arith.constant 0 : index
    %c0_109 = arith.constant 0 : index
    %426 = vector.load %arg12[%c0_108, %c0_109] : memref<1x16xf32, #tpu.memory_space<vmem>>, vector<1x16xf32>
    %427 = arith.truncf %424 : vector<64x16xf32> to vector<64x16xbf16>
    %cst_110 = arith.constant dense<0.000000e+00> : vector<64x16xf32>
    %428 = tpu.matmul %427, %425, %cst_110 {dimension_numbers = #tpu.dot_dimension_numbers<[1], [0], [0], [1], [0, 0, 1, 1], [], []>} : vector<64x16xbf16>, vector<16x16xbf16>, vector<64x16xf32> -> vector<64x16xf32>
    %429 = vector.broadcast %426 : vector<1x16xf32> to vector<64x16xf32>
    %430 = arith.addf %428, %429 : vector<64x16xf32>
    %431 = math.tanh %430 : vector<64x16xf32>
    %432 = arith.truncf %431 : vector<64x16xf32> to vector<64x16xbf16>
    %c0_111 = arith.constant 0 : index
    %c0_112 = arith.constant 0 : index
    %433 = vector.load %arg13[%c0_111, %c0_112] : memref<16x16xbf16, #tpu.memory_space<vmem>>, vector<16x16xbf16>
    %cst_113 = arith.constant dense<0.000000e+00> : vector<64x16xf32>
    %434 = tpu.matmul %432, %433, %cst_113 {dimension_numbers = #tpu.dot_dimension_numbers<[1], [0], [0], [1], [0, 0, 1, 1], [], []>} : vector<64x16xbf16>, vector<16x16xbf16>, vector<64x16xf32> -> vector<64x16xf32>
    %c0_114 = arith.constant 0 : index
    %c0_115 = arith.constant 0 : index
    %435 = vector.load %arg14[%c0_114, %c0_115] : memref<1x16xf32, #tpu.memory_space<vmem>>, vector<1x16xf32>
    %436 = vector.broadcast %435 : vector<1x16xf32> to vector<64x16xf32>
    %437 = arith.addf %434, %436 : vector<64x16xf32>
    %438 = tpu.iota {dimensions = array<i32: 1>} : vector<64x16xi32>
    %c8_i32 = arith.constant 8 : i32
    %439 = vector.broadcast %c8_i32 : i32 to vector<64x16xi32>
    %440 = arith.cmpi slt, %438, %439 : vector<64x16xi32>
    %cst_116 = arith.constant 0.000000e+00 : f32
    %441 = vector.broadcast %cst_116 : f32 to vector<64x16xf32>
    %442 = arith.maximumf %437, %441 : vector<64x16xf32>
    %443 = vector.broadcast %cst_116 : f32 to vector<64x16xf32>
    %444 = arith.subf %437, %443 : vector<64x16xf32>
    %445 = arith.cmpf one, %444, %444 : vector<64x16xf32>
    %446 = vector.broadcast %cst_116 : f32 to vector<64x16xf32>
    %447 = arith.addf %437, %446 : vector<64x16xf32>
    %448 = math.absf %444 : vector<64x16xf32>
    %cst_117 = arith.constant 0.000000e+00 : f32
    %449 = vector.broadcast %cst_117 : f32 to vector<64x16xf32>
    %450 = arith.subf %449, %448 : vector<64x16xf32>
    %451 = math.exp %450 : vector<64x16xf32>
    %452 = math.log1p %451 : vector<64x16xf32>
    %453 = arith.addf %442, %452 : vector<64x16xf32>
    %454 = arith.select %445, %447, %453 : vector<64x16xi1>, vector<64x16xf32>
    %cst_118 = arith.constant 9.99999974E-5 : f32
    %455 = vector.broadcast %cst_118 : f32 to vector<64x16xf32>
    %456 = arith.addf %454, %455 : vector<64x16xf32>
    %457 = arith.select %440, %437, %456 : vector<64x16xi1>, vector<64x16xf32>
    %cst_119 = arith.constant 0.000000e+00 : f32
    %458 = vector.broadcast %cst_119 : f32 to vector<64x80xf32>
    %459 = tpu.concatenate %457, %423, %458 in 1 : vector<64x16xf32>, vector<64x32xf32>, vector<64x80xf32> -> vector<64x128xf32>
    %c0_120 = arith.constant 0 : index
    %c0_121 = arith.constant 0 : index
    %460 = vector.load %arg15[%c0_120, %c0_121] : memref<64x128xf32, #tpu.memory_space<vmem>>, vector<64x128xf32>
    tpu.vector_store %arg15[%c0_120, %c0_121], %459 {strides = array<i32>} : memref<64x128xf32, #tpu.memory_space<vmem>>, vector<64x128xf32>,
    return
  }
}

</mosaic_0001>

<bundles_post_ra>
// kernel: tpu_custom_call.1
= control target key start
LH: loop header
LB: loop body
LE: loop exit
PB: predicated region body
PF: predicated region fallthrough
CT: control target
= control target key end

     0   :  { %s4122_s0 = inlined_call_operand.vmem [shape: f32[64,14], index: 0, kind: input, shape index: {}]   ;;  %s4123_s1 = inlined_call_operand.vmem [shape: f32[2,8,32], index: 1, kind: input, shape index: {}]   ;;  %s4124_s2 = inlined_call_operand.vmem [shape: f32[2,8,32], index: 2, kind: input, shape index: {}]   ;;  %s4125_s3 = inlined_call_operand.hbm [shape: bf16[14,128], index: 3, kind: input, shape index: {}]   ;;  %s4126_s4 = inlined_call_operand.vmem [shape: bf16[32,128], index: 4, kind: input, shape index: {}]   ;;  %s4127_s5 = inlined_call_operand.vmem [shape: bf16[32,128], index: 5, kind: input, shape index: {}]   ;;  %s4128_s6 = inlined_call_operand.vmem [shape: bf16[32,128], index: 6, kind: input, shape index: {}]   ;;  %s4129_s7 = inlined_call_operand.hbm [shape: f32[1,128], index: 7, kind: input, shape index: {}]   ;;  %s4130_s8 = inlined_call_operand.hbm [shape: f32[1,128], index: 8, kind: input, shape index: {}]   ;;  %s4131_s9 = inlined_call_operand.vmem [shape: bf16[32,32], index: 9, kind: input, shape index: {}]   ;;  %s4132_s10 = inlined_call_operand.vmem [shape: f32[1,32], index: 10, kind: input, shape index: {}]   ;;  %s4133_s11 = inlined_call_operand.hbm [shape: bf16[16,16], index: 11, kind: input, shape index: {}]   ;;  %s4134_s12 = inlined_call_operand.vmem [shape: f32[1,16], index: 12, kind: input, shape index: {}]   ;;  %s4135_s13 = inlined_call_operand.hbm [shape: bf16[16,16], index: 13, kind: input, shape index: {}]   ;;  %s4136_s14 = inlined_call_operand.vmem [shape: f32[1,16], index: 14, kind: input, shape index: {}]   ;;  %s4137_s15 = inlined_call_operand.hbm [shape: f32[64,128], index: 15, kind: output, shape index: {0}]   ;;  %s4138_s16 = inlined_call_operand.hbm [shape: f32[2,8,32], index: 16, kind: output, shape index: {1}]   ;;  %s4139_s17 = inlined_call_operand.hbm [shape: f32[2,8,32], index: 17, kind: output, shape index: {2}]  }
   0x1   :  { %4142 = sst [smem:[#allocation21_spill]] %s4122_s0 }
   0x2   :  { %4143 = sst [smem:[#allocation22_spill]] %s4123_s1 }
   0x3   :  { %23 = vsyncpa [#allocation4], 0 }
   0x4   :  { %24 = vsyncpa [#allocation7], 0 }
   0x5   :  { %25 = vsyncpa [#allocation10], 0 }
   0x6   :  { %26 = vsyncpa [#allocation5], 0 }
   0x7   :  { %27 = vsyncpa [#allocation14], 0  ;;  %s3272_s24 = smov [#allocation6]  }
   0x8   :  { %s58_s25 = sshll.u32 %s3272_s24, 4  ;;  %s59_s25 = int_to_ptr.vmem [resolvable:$true] %s58_s25 }
   0x9   :  { %s3110_s26 = scalar_lea.vmem %s59_s25, 16  ;;  %s3114_s27 = scalar_lea.vmem %s59_s25, 32 }
   0xa   :  { %p3111_p0 = scmp.ne.s32.totalorder %s59_s25, %s3110_s26  ;;  %p3115_p1 = scmp.lt.s32.totalorder %s59_s25, %s59_s25 }
   0xb   :  { %p3116_p2 = scmp.lt.s32.totalorder %s3114_s27, %s3110_s26 }
   0xd   :  { %p3117_p3 = por %p3116_p2, %p3115_p1 }
   0xf   :  { %p3118_p4 = pnand %p3117_p3, %p3111_p0 }
  0x11   :  { %3121 = shalt.err (!%p3118_p4)
}
  0x12   :  { %61 = dma.hbm_to_vmem [thread:$0]  %s4129_s7, 16, %s59_s25, [#allocation7]  }
  0x13   :  { %s3273_s0 = smov [#allocation9]   ;;  %s3274_s18 = smov [#allocation3]  }
  0x14   :  { %s81_s30 = sshll.u32 %s3273_s0, 4  ;;  %s39_s19 = sshll.u32 %s3274_s18, 4  ;;  %s82_s30 = int_to_ptr.vmem [resolvable:$true] %s81_s30  ;;  %s40_s19 = int_to_ptr.vmem [resolvable:$true] %s39_s19 }
  0x15   :  { %s3130_s1 = scalar_lea.vmem %s82_s30, 128  ;;  %p3135_p6 = scmp.lt.s32.totalorder %s82_s30, %s82_s30 }
  0x16   :  { %p3131_p5 = scmp.ne.s32.totalorder %s82_s30, %s3130_s1  ;;  %p3136_p7 = scmp.lt.s32.totalorder %s3130_s1, %s3130_s1 }
  0x18   :  { %p3137_p8 = por %p3136_p7, %p3135_p6 }
  0x1a   :  { %p3138_p9 = pnand %p3137_p8, %p3131_p5 }
  0x1c   :  { %3141 = shalt.err (!%p3138_p9)
}
  0x1d   :  { %s3275_s20 = smov 64   ;;  %s3276_s21 = smov 4  }
  0x1e   :  { %87 = dma.hbm_to_vmem [thread:$0]  %s4133_s11, 128, %s82_s30, [#allocation10], %s3275_s20, %s3275_s20, %s3276_s21  }
  0x1f   :  { %s3150_s7 = scalar_lea.vmem %s40_s19, 128  ;;  %p3155_p11 = scmp.lt.s32.totalorder %s40_s19, %s40_s19 }
  0x20   :  { %p3151_p10 = scmp.ne.s32.totalorder %s40_s19, %s3150_s7  ;;  %p3156_p12 = scmp.lt.s32.totalorder %s3150_s7, %s3150_s7 }
  0x22   :  { %p3157_p13 = por %p3156_p12, %p3155_p11 }
  0x24   :  { %p3158_p0 = pnand %p3157_p13, %p3151_p10 }
  0x26   :  { %3161 = shalt.err (!%p3158_p0)
}
  0x27   :  { %45 = dma.hbm_to_vmem [thread:$0]  %s4125_s3, 128, %s40_s19, [#allocation4], %s3275_s20, %s3275_s20, %s3276_s21  }
  0x28   :  { %s3277_s26 = smov [#allocation8]   ;;  %s3278_s28 = smov [#allocation11]  }
  0x29   :  { %s68_s27 = sshll.u32 %s3277_s26, 4  ;;  %s95_s11 = sshll.u32 %s3278_s28, 4  ;;  %s69_s27 = int_to_ptr.vmem [resolvable:$true] %s68_s27  ;;  %s96_s11 = int_to_ptr.vmem [resolvable:$true] %s95_s11 }
  0x2a   :  { %s3170_s29 = scalar_lea.vmem %s69_s27, 16  ;;  %s3174_s0 = scalar_lea.vmem %s69_s27, 32 }
  0x2b   :  { %p3171_p1 = scmp.ne.s32.totalorder %s69_s27, %s3170_s29  ;;  %p3175_p2 = scmp.lt.s32.totalorder %s69_s27, %s69_s27 }
  0x2c   :  { %p3176_p3 = scmp.lt.s32.totalorder %s3174_s0, %s3170_s29 }
  0x2e   :  { %p3177_p4 = por %p3176_p3, %p3175_p2 }
  0x30   :  { %p3178_p5 = pnand %p3177_p4, %p3171_p1 }
  0x32   :  { %3181 = shalt.err (!%p3178_p5)
}
  0x33   :  { %71 = dma.hbm_to_vmem [thread:$0]  %s4130_s8, 16, %s69_s27, [#allocation7]  }
  0x34   :  { %s3190_s1 = scalar_lea.vmem %s96_s11, 128  ;;  %p3195_p7 = scmp.lt.s32.totalorder %s96_s11, %s96_s11 }
  0x35   :  { %p3191_p6 = scmp.ne.s32.totalorder %s96_s11, %s3190_s1  ;;  %p3196_p8 = scmp.lt.s32.totalorder %s3190_s1, %s3190_s1 }
  0x37   :  { %p3197_p9 = por %p3196_p8, %p3195_p7 }
  0x39   :  { %p3198_p10 = pnand %p3197_p9, %p3191_p6 }
  0x3b   :  { %3201 = shalt.err (!%p3198_p10)
}
  0x3c   :  { %101 = dma.hbm_to_vmem [thread:$0]  %s4135_s13, 128, %s96_s11, [#allocation10], %s3275_s20, %s3275_s20, %s3276_s21  }
  0x3d   :  { %3262 = dma.done.wait [#allocation4], 128  }
  0x3e   :  { %3263 = vsyncadd [#allocation4], 4294967168 }
  0x3f   :  { %3264 = dma.done.wait [#allocation7], 32  }
  0x40   :  { %3265 = vsyncadd [#allocation7], 4294967264 }
  0x41   :  { %3266 = dma.done.wait [#allocation10], 256  }
  0x42   :  { %3267 = vsyncadd [#allocation10], 4294967040  ;;  %vm162_vm0 = vcmask 1046528   ;;  %v2859_v0 = vld [vmem:[#allocation3] sm:$0x7f]   ;;  %s4144_s23 = sld [smem:[#allocation21_spill]]  ;;  %v120_v42 = vlaneseq }
  0x43   :  { %vm149_vm1 = vcmask 113664   ;;  %2840 = vmatprep.subr.msk.bf16.mxu0 %vm162_vm0, %v2859_v0  ;;  %2841 = vmatprep.subr.msk.bf16.mxu1 %vm162_vm0, %v2859_v0  ;;  %v164_v4 = vsel %vm162_vm0, %v2859_v0, 0  ;;  %v3279_v14 = vmov 0.0   ;;  %v3432_v15 = vld [vmem:[%s4127_s5 + $0x8] sm:$0xff]   ;;  %v3438_v16 = vld [vmem:[%s4127_s5] sm:$0xff]   ;;  %s4145_s24 = sld [smem:[#allocation22_spill]] }
  0x44   :  { %2657 = vmatpush3.bf16.msra.mxu0 %v164_v4  ;;  %2839 = vmatpush3.bf16.msra.mxu1 %v164_v4  ;;  %vm3280_vm2 = vmmov 0   ;;  %vm250_vm3 = vcmask 261120   ;;  %v2471_v19 = vld [vmem:[#allocation6] ss:$0 sm:$0xff]  ;;  %v3477_v43 = vand.u32 127, %v120_v42  ;;  %s3281_s5 = smov 32  }
  0x45   :  { %2666 = vmatprep.subr.bf16.mxu1 %v3279_v14  ;;  %2682 = vmatprep.subr.bf16.mxu0 %v3279_v14  ;;  %v236_v47 = vld [vmem:[%s4124_s2] sm:$0xff]  ;;  %vm331_vm5 = vcmask 257024   ;;  %vm2021_vm15 = vcmask 130048  }
  0x46   :  { %vm122_vm4 = vcmp.lt.s32.totalorder %v3477_v43, 96  ;;  %vm1841_vm13 = vcmp.lt.s32.totalorder %v3477_v43, 16 }
  0x48   :  { %v123_v1 = vld [vmem:[%s4144_s23] sm:$0xff]  ;;  %v124_v2 = vld [vmem:[%s4144_s23 + $0x8] sm:$0xff]  ;;  %v125_v7 = vld [vmem:[%s4144_s23 + $0x10] sm:$0xff] }
  0x49   :  { %v127_v3 = vld [vmem:[%s4144_s23 + $0x20] sm:$0xff]  ;;  %v131_v5 = vpack.c.bf16 %v124_v2, %v123_v1  ;;  %v128_v6 = vld [vmem:[%s4144_s23 + $0x28] sm:$0xff]  ;;  %v126_v8 = vld [vmem:[%s4144_s23 + $0x18] sm:$0xff] }
  0x4a   :  { %v133_v9 = vpack.c.bf16 %v128_v6, %v127_v3  ;;  %v132_v10 = vpack.c.bf16 %v126_v8, %v125_v7  ;;  %v129_v11 = vld [vmem:[%s4144_s23 + $0x30] sm:$0xff]  ;;  %v130_v12 = vld [vmem:[%s4144_s23 + $0x38] sm:$0xff]  ;;  %v235_v17 = vld [vmem:[%s4145_s24] sm:$0xff] }
  0x4b   :  { %2658 = vmatprep.mubr.msk.bf16.mxu0 %vm149_vm1, %v131_v5  ;;  %v134_v13 = vpack.c.bf16 %v130_v12, %v129_v11  ;;  %v237_v18 = vpack.c.bf16 %v235_v17, %v235_v17 }
  0x4c   :  { %2662 = vmatprep.mubr.msk.bf16.mxu1 %vm149_vm1, %v133_v9  ;;  %2659 = vmatmul.mubr.msk.bf16.vlgmr.msra.gmra.mxu0 %vm149_vm1, %v132_v10 }
  0x4d   :  { %2663 = vmatmul.mubr.msk.bf16.vlgmr.msra.gmra.mxu1 %vm149_vm1, %v134_v13  ;;  %2683 = vmatpush3.bf16.msra.mxu0 %v3432_v15 }
  0x4e   :  { %2667 = vmatpush3.bf16.msra.mxu1 %v3432_v15  ;;  %2670 = vmatprep.mubr.msk.bf16.mxu1 %vm3280_vm2, %v3279_v14 }
  0x4f   :  { %2668 = vmatprep.subr.bf16.mxu1 %v3279_v14  ;;  %2684 = vmatprep.subr.bf16.mxu0 %v3279_v14 }
  0x50   :  { %2686 = vmatprep.mubr.msk.bf16.mxu0 %vm3280_vm2, %v3279_v14 }
  0x51   :  { %2685 = vmatpush3.bf16.msra.mxu0 %v3438_v16 }
  0x52   :  { %2669 = vmatpush3.bf16.msra.mxu1 %v3438_v16  ;;  %2698 = vmatprep.subr.bf16.mxu0 %v3279_v14 }
  0x53   :  { %2674 = vmatprep.subr.bf16.mxu1 %v3279_v14 }
  0x55   :  { %2671 = vmatmul.mubr.msk.bf16.vlgmr.msra.gmra.mxu1 %vm250_vm3, %v237_v18 }
  0x56   :  { %2675 = vmatpush3.bf16.msra.mxu1 %v3432_v15  ;;  %2678 = vmatprep.mubr.msk.bf16.mxu1 %vm3280_vm2, %v3279_v14 }
  0x57   :  { %2676 = vmatprep.subr.bf16.mxu1 %v3279_v14 }
  0x5a   :  { %2677 = vmatpush3.bf16.msra.mxu1 %v3438_v16 }
  0x5b   :  { %2690 = vmatprep.subr.bf16.mxu1 %v3279_v14 }
 0x10c   :  { %v2660_v20 = vpop.f32.mrf.mxu0 }
 0x10d   :  { %v2664_v21 = vpop.f32.mrf.mxu1  ;;  %v3465_v22 = vadd.f32 %v2660_v20, %v2471_v19 }
 0x10e   :  { %v3467_v23 = vadd.f32 %v2664_v21, %v2471_v19  ;;  %v200_v24 = vpop.f32.mrf.mxu0 }
 0x10f   :  { %v216_v25 = vpop.f32.mrf.mxu1  ;;  %v201_v32 = vadd.f32 %v2471_v19, %v200_v24 }
 0x110   :  { %v3469_v26 = vadd.f32 %v2471_v19, %v216_v25  ;;  %v2661_v27 = vpop.f32.mrf.mxu0 }
 0x111   :  { %v2665_v28 = vpop.f32.mrf.mxu1  ;;  %v3471_v29 = vadd.f32 %v2661_v27, %v2471_v19 }
 0x112   :  { %v3473_v30 = vadd.f32 %v2665_v28, %v2471_v19  ;;  %v203_v59 = vpop.f32.mrf.mxu0 }
 0x113   :  { %v219_v31 = vpop.f32.mrf.mxu1  ;;  %v204_v60 = vadd.f32 %v2471_v19, %v203_v59 }
 0x114   :  { %v3475_v33 = vadd.f32 %v2471_v19, %v219_v31 }
 0x115   :  { %v288_v34 = vpop.f32.mrf.mxu1 }
 0x116   :  { %v294_v35 = vadd.f32 %v288_v34, %v201_v32 }
 0x117   :  { %v2672_v36 = vpop.f32.mrf.mxu1 }
 0x118   :  { %v2480_v37 = vmul.f32 -1.442695, %v294_v35 }
 0x119   :  { %v291_v38 = vpop.f32.mrf.mxu1 }
 0x11a   :  { %2878 = vpow2.f32 %v2480_v37 }
 0x11b   :  { %v2673_v39 = vpop.f32.mrf.mxu1  ;;  %2880 = vtanh.f32 %v294_v35 }
 0x127   :  { %v2879_v40 = vpop.eup %2878 }
 0x128   :  { %v298_v41 = vadd.f32 1.0, %v2879_v40  ;;  %v2881_v44 = vpop.eup %2880 }
 0x12a   :  { %2882 = vrcp.f32 %v298_v41 }
 0x137   :  { %v2883_v45 = vpop.eup %2882 }
 0x138   :  { %v302_v46 = vsel %vm122_vm4, %v2883_v45, %v2881_v44 }
 0x139   :  { %309 = vrot.lane.b32.xlu0 %v302_v46, %s3281_s5 }
 0x13d   :  { %304 = vrot.lane.b32.xlu0 %v236_v47, %s3281_s5 }
 0x1ab   :  { %v310_v48 = vpop.permute.xlu0 %309 }
 0x1ac   :  { %v312_v49 = vmul.f32 %v310_v48, %v302_v46 }
 0x1ae   :  { %314 = vrot.lane.b32.xlu1 %v312_v49, %s3281_s5 }
 0x1af   :  { %v305_v50 = vpop.permute.xlu0 %304 }
 0x1b0   :  { %v307_v51 = vmul.f32 %v305_v50, %v302_v46 }
 0x220   :  { %v315_v52 = vpop.permute.xlu1 %314 }
 0x221   :  { %v317_v53 = vadd.f32 %v315_v52, %v307_v51 }
 0x223   :  { %2884 = vtanh.f32 %v317_v53 }
 0x230   :  { %v2885_v54 = vpop.eup %2884 }
 0x231   :  { %320 = vrot.lane.b32.xlu1 %v2885_v54, %s3281_s5 }
 0x2a3   :  { %v321_v55 = vpop.permute.xlu1 %320 }
 0x2a4   :  { %v323_v56 = vmul.f32 %v321_v55, %v302_v46 }
 0x2a6   :  { %v3489_v57 = vpack.c.bf16 %v323_v56, %v323_v56 }
 0x2a8   :  { %333 = vrot.lane.b32.xlu0 %v3489_v57, %s3275_s20 }
 0x31a   :  { %v334_v58 = vpop.permute.xlu0 %333 }
 0x31b   :  { %2679 = vmatmul.mubr.msk.bf16.vlgmr.msra.gmra.mxu1 %vm250_vm3, %v334_v58 }
 0x31c   :  { %2691 = vmatpush3.bf16.msra.mxu1 %v3432_v15  ;;  %2694 = vmatprep.mubr.msk.bf16.mxu1 %vm3280_vm2, %v3279_v14 }
 0x31d   :  { %2692 = vmatprep.subr.bf16.mxu1 %v3279_v14 }
 0x320   :  { %2693 = vmatpush3.bf16.msra.mxu1 %v3438_v16 }
 0x321   :  { %2706 = vmatprep.subr.bf16.mxu1 %v3279_v14 }
 0x3db   :  { %v372_v61 = vpop.f32.mrf.mxu1 }
 0x3dc   :  { %v378_v62 = vadd.f32 %v372_v61, %v204_v60 }
 0x3dd   :  { %v2680_v63 = vpop.f32.mrf.mxu1 }
 0x3de   :  { %v2483_v0 = vmul.f32 -1.442695, %v378_v62 }
 0x3df   :  { %v375_v1 = vpop.f32.mrf.mxu1 }
 0x3e0   :  { %2886 = vpow2.f32 %v2483_v0 }
 0x3e1   :  { %v2681_v2 = vpop.f32.mrf.mxu1  ;;  %2888 = vtanh.f32 %v378_v62 }
 0x3ed   :  { %v2887_v3 = vpop.eup %2886 }
 0x3ee   :  { %v382_v4 = vadd.f32 1.0, %v2887_v3  ;;  %v2889_v5 = vpop.eup %2888 }
 0x3f0   :  { %2890 = vrcp.f32 %v382_v4 }
 0x3fd   :  { %v2891_v6 = vpop.eup %2890 }
 0x3fe   :  { %v386_v7 = vsel %vm122_vm4, %v2891_v6, %v2889_v5 }
 0x3ff   :  { %389 = vrot.lane.b32.xlu1 %v386_v7, %s3281_s5  ;;  %v387_v10 = vmul.f32 %v386_v7, %v317_v53 }
 0x471   :  { %v390_v8 = vpop.permute.xlu1 %389 }
 0x472   :  { %v392_v9 = vmul.f32 %v390_v8, %v386_v7 }
 0x474   :  { %394 = vrot.lane.b32.xlu0 %v392_v9, %s3281_s5 }
 0x4e6   :  { %v395_v11 = vpop.permute.xlu0 %394 }
 0x4e7   :  { %v397_v12 = vadd.f32 %v395_v11, %v387_v10 }
 0x4e9   :  { %2892 = vtanh.f32 %v397_v12 }
 0x4f6   :  { %v2893_v13 = vpop.eup %2892 }
 0x4f7   :  { %400 = vrot.lane.b32.xlu1 %v2893_v13, %s3281_s5 }
 0x569   :  { %v401_v17 = vpop.permute.xlu1 %400 }
 0x56a   :  { %v403_v18 = vmul.f32 %v401_v17, %v386_v7 }
 0x56c   :  { %v3505_v19 = vpack.c.bf16 %v403_v18, %v403_v18 }
 0x56e   :  { %412 = vrot.lane.b32.xlu0 %v3505_v19, %s3275_s20 }
 0x5e0   :  { %v413_v20 = vpop.permute.xlu0 %412 }
 0x5e1   :  { %2687 = vmatmul.mubr.msk.bf16.vlgmr.msra.gmra.mxu0 %vm250_vm3, %v413_v20 }
 0x5e2   :  { %2699 = vmatpush3.bf16.msra.mxu0 %v3432_v15  ;;  %2702 = vmatprep.mubr.msk.bf16.mxu0 %vm3280_vm2, %v3279_v14 }
 0x5e3   :  { %2700 = vmatprep.subr.bf16.mxu0 %v3279_v14 }
 0x5e6   :  { %2701 = vmatpush3.bf16.msra.mxu0 %v3438_v16 }
 0x5e7   :  { %2714 = vmatprep.subr.bf16.mxu0 %v3279_v14 }
 0x6a1   :  { %v451_v21 = vpop.f32.mrf.mxu0 }
 0x6a2   :  { %v457_v24 = vadd.f32 %v451_v21, %v3465_v22 }
 0x6a3   :  { %v2688_v25 = vpop.f32.mrf.mxu0 }
 0x6a4   :  { %v2486_v27 = vmul.f32 -1.442695, %v457_v24 }
 0x6a5   :  { %v454_v28 = vpop.f32.mrf.mxu0 }
 0x6a6   :  { %2894 = vpow2.f32 %v2486_v27 }
 0x6a7   :  { %v2689_v31 = vpop.f32.mrf.mxu0  ;;  %2896 = vtanh.f32 %v457_v24 }
 0x6b3   :  { %v2895_v32 = vpop.eup %2894 }
 0x6b4   :  { %v461_v34 = vadd.f32 1.0, %v2895_v32  ;;  %v2897_v35 = vpop.eup %2896 }
 0x6b6   :  { %2898 = vrcp.f32 %v461_v34 }
 0x6c3   :  { %v2899_v36 = vpop.eup %2898 }
 0x6c4   :  { %v465_v37 = vsel %vm122_vm4, %v2899_v36, %v2897_v35 }
 0x6c5   :  { %468 = vrot.lane.b32.xlu1 %v465_v37, %s3281_s5  ;;  %v466_v22 = vmul.f32 %v465_v37, %v397_v12 }
 0x737   :  { %v469_v38 = vpop.permute.xlu1 %468 }
 0x738   :  { %v471_v39 = vmul.f32 %v469_v38, %v465_v37 }
 0x73a   :  { %473 = vrot.lane.b32.xlu0 %v471_v39, %s3281_s5 }
 0x7ac   :  { %v474_v40 = vpop.permute.xlu0 %473 }
 0x7ad   :  { %v476_v41 = vadd.f32 %v474_v40, %v466_v22 }
 0x7af   :  { %2900 = vtanh.f32 %v476_v41 }
 0x7bc   :  { %v2901_v42 = vpop.eup %2900 }
 0x7bd   :  { %479 = vrot.lane.b32.xlu1 %v2901_v42, %s3281_s5 }
 0x82f   :  { %v480_v44 = vpop.permute.xlu1 %479 }
 0x830   :  { %v482_v45 = vmul.f32 %v480_v44, %v465_v37 }
 0x832   :  { %v3522_v46 = vpack.c.bf16 %v482_v45, %v482_v45 }
 0x834   :  { %491 = vrot.lane.b32.xlu0 %v3522_v46, %s3275_s20 }
 0x8a6   :  { %v492_v47 = vpop.permute.xlu0 %491 }
 0x8a7   :  { %2695 = vmatmul.mubr.msk.bf16.vlgmr.msra.gmra.mxu1 %vm250_vm3, %v492_v47 }
 0x8a8   :  { %2707 = vmatpush3.bf16.msra.mxu1 %v3432_v15  ;;  %2710 = vmatprep.mubr.msk.bf16.mxu1 %vm3280_vm2, %v3279_v14 }
 0x8a9   :  { %2708 = vmatprep.subr.bf16.mxu1 %v3279_v14 }
 0x8ac   :  { %2709 = vmatpush3.bf16.msra.mxu1 %v3438_v16 }
 0x8ad   :  { %2722 = vmatprep.subr.bf16.mxu1 %v3279_v14 }
 0x967   :  { %v530_v48 = vpop.f32.mrf.mxu1 }
 0x968   :  { %v536_v49 = vadd.f32 %v530_v48, %v3471_v29 }
 0x969   :  { %v2696_v50 = vpop.f32.mrf.mxu1 }
 0x96a   :  { %v2489_v51 = vmul.f32 -1.442695, %v536_v49 }
 0x96b   :  { %v533_v52 = vpop.f32.mrf.mxu1 }
 0x96c   :  { %2902 = vpow2.f32 %v2489_v51 }
 0x96d   :  { %v2697_v53 = vpop.f32.mrf.mxu1  ;;  %2904 = vtanh.f32 %v536_v49 }
 0x979   :  { %v2903_v54 = vpop.eup %2902 }
 0x97a   :  { %v540_v55 = vadd.f32 1.0, %v2903_v54  ;;  %v2905_v56 = vpop.eup %2904 }
 0x97c   :  { %2906 = vrcp.f32 %v540_v55 }
 0x989   :  { %v2907_v58 = vpop.eup %2906 }
 0x98a   :  { %v544_v59 = vsel %vm122_vm4, %v2907_v58, %v2905_v56 }
 0x98b   :  { %547 = vrot.lane.b32.xlu1 %v544_v59, %s3281_s5  ;;  %v545_v29 = vmul.f32 %v544_v59, %v476_v41 }
 0x9fd   :  { %v548_v60 = vpop.permute.xlu1 %547 }
 0x9fe   :  { %v550_v61 = vmul.f32 %v548_v60, %v544_v59 }
 0xa00   :  { %552 = vrot.lane.b32.xlu0 %v550_v61, %s3281_s5 }
 0xa72   :  { %v553_v62 = vpop.permute.xlu0 %552 }
 0xa73   :  { %v555_v63 = vadd.f32 %v553_v62, %v545_v29 }
 0xa75   :  { %2908 = vtanh.f32 %v555_v63 }
 0xa82   :  { %v2909_v0 = vpop.eup %2908 }
 0xa83   :  { %558 = vrot.lane.b32.xlu1 %v2909_v0, %s3281_s5 }
 0xaf5   :  { %v559_v1 = vpop.permute.xlu1 %558 }
 0xaf6   :  { %v561_v2 = vmul.f32 %v559_v1, %v544_v59 }
 0xaf8   :  { %v3539_v3 = vpack.c.bf16 %v561_v2, %v561_v2 }
 0xafa   :  { %570 = vrot.lane.b32.xlu0 %v3539_v3, %s3275_s20 }
 0xb6c   :  { %v571_v4 = vpop.permute.xlu0 %570 }
 0xb6d   :  { %2703 = vmatmul.mubr.msk.bf16.vlgmr.msra.gmra.mxu0 %vm250_vm3, %v571_v4 }
 0xb6e   :  { %2715 = vmatpush3.bf16.msra.mxu0 %v3432_v15  ;;  %2718 = vmatprep.mubr.msk.bf16.mxu0 %vm3280_vm2, %v3279_v14 }
 0xb6f   :  { %2716 = vmatprep.subr.bf16.mxu0 %v3279_v14 }
 0xb72   :  { %2717 = vmatpush3.bf16.msra.mxu0 %v3438_v16 }
 0xc2d   :  { %v609_v5 = vpop.f32.mrf.mxu0 }
 0xc2e   :  { %v615_v6 = vadd.f32 %v609_v5, %v3469_v26 }
 0xc2f   :  { %v2704_v7 = vpop.f32.mrf.mxu0 }
 0xc30   :  { %v2492_v8 = vmul.f32 -1.442695, %v615_v6 }
 0xc31   :  { %v612_v9 = vpop.f32.mrf.mxu0 }
 0xc32   :  { %2910 = vpow2.f32 %v2492_v8 }
 0xc33   :  { %v2705_v10 = vpop.f32.mrf.mxu0  ;;  %2912 = vtanh.f32 %v615_v6 }
 0xc3f   :  { %v2911_v11 = vpop.eup %2910 }
 0xc40   :  { %v619_v12 = vadd.f32 1.0, %v2911_v11  ;;  %v2913_v13 = vpop.eup %2912 }
 0xc42   :  { %2914 = vrcp.f32 %v619_v12 }
 0xc4f   :  { %v2915_v17 = vpop.eup %2914 }
 0xc50   :  { %v623_v18 = vsel %vm122_vm4, %v2915_v17, %v2913_v13 }
 0xc51   :  { %626 = vrot.lane.b32.xlu1 %v623_v18, %s3281_s5  ;;  %v624_v26 = vmul.f32 %v623_v18, %v555_v63 }
 0xcc3   :  { %v627_v20 = vpop.permute.xlu1 %626 }
 0xcc4   :  { %v629_v21 = vmul.f32 %v627_v20, %v623_v18  ;;  %v2515_v20 = vld [vmem:[%s4124_s2 + $0x8] sm:$0xff] }
 0xcc6   :  { %631 = vrot.lane.b32.xlu0 %v629_v21, %s3281_s5 }
 0xd38   :  { %v632_v24 = vpop.permute.xlu0 %631 }
 0xd39   :  { %v634_v25 = vadd.f32 %v632_v24, %v624_v26  ;;  %v2514_v26 = vld [vmem:[%s4145_s24 + $0x8] sm:$0xff] }
 0xd3a   :  { %v1032_v24 = vpack.c.bf16 %v2514_v26, %v2514_v26 }
 0xd3b   :  { %2916 = vtanh.f32 %v634_v25 }
 0xd48   :  { %v2917_v27 = vpop.eup %2916 }
 0xd49   :  { %637 = vrot.lane.b32.xlu1 %v2917_v27, %s3281_s5 }
 0xdbb   :  { %v638_v28 = vpop.permute.xlu1 %637 }
 0xdbc   :  { %v640_v31 = vmul.f32 %v638_v28, %v623_v18  ;;  %v3621_v18 = vld [vmem:[%s4128_s6] sm:$0xff]  }
 0xdbe   :  { %v3555_v32 = vpack.c.bf16 %v640_v31, %v640_v31 }
 0xdc0   :  { %649 = vrot.lane.b32.xlu0 %v3555_v32, %s3275_s20 }
 0xe32   :  { %v650_v34 = vpop.permute.xlu0 %649 }
 0xe33   :  { %2711 = vmatmul.mubr.msk.bf16.vlgmr.msra.gmra.mxu1 %vm250_vm3, %v650_v34 }
 0xe34   :  { %2723 = vmatpush3.bf16.msra.mxu1 %v3432_v15  ;;  %2726 = vmatprep.mubr.msk.bf16.mxu1 %vm3280_vm2, %v3279_v14 }
 0xe35   :  { %2724 = vmatprep.subr.bf16.mxu1 %v3279_v14 }
 0xe38   :  { %2725 = vmatpush3.bf16.msra.mxu1 %v3438_v16 }
 0xe39   :  { %2742 = vmatprep.subr.bf16.mxu1 %v3279_v14 }
 0xef3   :  { %v688_v35 = vpop.f32.mrf.mxu1 }
 0xef4   :  { %v694_v36 = vadd.f32 %v688_v35, %v3475_v33 }
 0xef5   :  { %v2712_v37 = vpop.f32.mrf.mxu1 }
 0xef6   :  { %v2495_v38 = vmul.f32 -1.442695, %v694_v36 }
 0xef7   :  { %v691_v39 = vpop.f32.mrf.mxu1 }
 0xef8   :  { %2918 = vpow2.f32 %v2495_v38 }
 0xef9   :  { %v2713_v22 = vpop.f32.mrf.mxu1  ;;  %2920 = vtanh.f32 %v694_v36  ;;  %v3649_v36 = vld [vmem:[#allocation8] ss:$0 sm:$0xff] }
 0xf05   :  { %v2919_v40 = vpop.eup %2918 }
 0xf06   :  { %v698_v41 = vadd.f32 1.0, %v2919_v40  ;;  %v2921_v15 = vpop.eup %2920 }
 0xf08   :  { %2922 = vrcp.f32 %v698_v41 }
 0xf15   :  { %v2923_v42 = vpop.eup %2922 }
 0xf16   :  { %v702_v44 = vsel %vm122_vm4, %v2923_v42, %v2921_v15 }
 0xf17   :  { %705 = vrot.lane.b32.xlu1 %v702_v44, %s3281_s5  ;;  %v703_v33 = vmul.f32 %v702_v44, %v634_v25 }
 0xf89   :  { %v706_v16 = vpop.permute.xlu1 %705 }
 0xf8a   :  { %v708_v45 = vmul.f32 %v706_v16, %v702_v44 }
 0xf8c   :  { %710 = vrot.lane.b32.xlu0 %v708_v45, %s3281_s5 }
 0xffe   :  { %v711_v47 = vpop.permute.xlu0 %710 }
 0xfff   :  { %v713_v48 = vadd.f32 %v711_v47, %v703_v33 }
0x1001   :  { %2924 = vtanh.f32 %v713_v48 }
0x100e   :  { %v2925_v49 = vpop.eup %2924 }
0x100f   :  { %716 = vrot.lane.b32.xlu1 %v2925_v49, %s3281_s5 }
0x1081   :  { %v717_v50 = vpop.permute.xlu1 %716 }
0x1082   :  { %v719_v51 = vmul.f32 %v717_v50, %v702_v44 }
0x1084   :  { %v3572_v52 = vpack.c.bf16 %v719_v51, %v719_v51 }
0x1086   :  { %728 = vrot.lane.b32.xlu0 %v3572_v52, %s3275_s20 }
0x10f8   :  { %v729_v53 = vpop.permute.xlu0 %728 }
0x10f9   :  { %2719 = vmatmul.mubr.msk.bf16.vlgmr.msra.gmra.mxu0 %vm250_vm3, %v729_v53 }
0x11b9   :  { %v767_v54 = vpop.f32.mrf.mxu0 }
0x11ba   :  { %v773_v55 = vadd.f32 %v767_v54, %v3467_v23 }
0x11bb   :  { %v2720_v56 = vpop.f32.mrf.mxu0 }
0x11bc   :  { %v2498_v58 = vmul.f32 -1.442695, %v773_v55 }
0x11bd   :  { %v770_v59 = vpop.f32.mrf.mxu0 }
0x11be   :  { %2926 = vpow2.f32 %v2498_v58 }
0x11bf   :  { %v2721_v60 = vpop.f32.mrf.mxu0  ;;  %2928 = vtanh.f32 %v773_v55 }
0x11cb   :  { %v2927_v61 = vpop.eup %2926 }
0x11cc   :  { %v777_v29 = vadd.f32 1.0, %v2927_v61  ;;  %v2929_v62 = vpop.eup %2928 }
0x11ce   :  { %2930 = vrcp.f32 %v777_v29 }
0x11db   :  { %v2931_v63 = vpop.eup %2930 }
0x11dc   :  { %v781_v0 = vsel %vm122_vm4, %v2931_v63, %v2929_v62 }
0x11dd   :  { %784 = vrot.lane.b32.xlu1 %v781_v0, %s3281_s5  ;;  %v782_v23 = vmul.f32 %v781_v0, %v713_v48 }
0x124f   :  { %v785_v1 = vpop.permute.xlu1 %784 }
0x1250   :  { %v787_v2 = vmul.f32 %v785_v1, %v781_v0 }
0x1252   :  { %789 = vrot.lane.b32.xlu0 %v787_v2, %s3281_s5 }
0x1256   :  { %328 = vrot.lane.b32.xlu0 %v3489_v57, %s3275_s20  ;;  %v2862_v57 = vld [vmem:[%s4126_s4 + $0x8] sm:$0xff]  }
0x1257   :  { %2730 = vmatprep.subr.bf16.mxu0 %v2862_v57 }
0x1258   :  { %2731 = vmatpush3.bf16.msra.mxu0 %v2862_v57 }
0x125a   :  { %487 = vrot.lane.b32.xlu0 %v3522_v46, %s3275_s20  ;;  %v2863_v46 = vld [vmem:[%s4126_s4] sm:$0xff]  }
0x125b   :  { %2732 = vmatprep.subr.bf16.mxu0 %v2863_v46 }
0x125c   :  { %2733 = vmatpush3.bf16.msra.mxu0 %v2863_v46 }
0x125d   :  { %2758 = vmatprep.subr.bf16.mxu0 %v3279_v14 }
0x12c4   :  { %v790_v4 = vpop.permute.xlu0 %789 }
0x12c5   :  { %v3586_v5 = vadd.f32 %v790_v4, %v782_v23 }
0x12c7   :  { %2932 = vtanh.f32 %v3586_v5 }
0x12c8   :  { %v329_v6 = vpop.permute.xlu0 %328 }
0x12c9   :  { %332 = vst.msk [vmem:[#allocation2] sm:$0xf] %vm331_vm5, %v329_v6 }
0x12cc   :  { %v488_v7 = vpop.permute.xlu0 %487 }
0x12cd   :  { %490 = vst.msk [vmem:[#allocation2 + $0x8] sm:$0xf] %vm331_vm5, %v488_v7 }
0x12d4   :  { %v2933_v8 = vpop.eup %2932 }
0x12d5   :  { %795 = vrot.lane.b32.xlu1 %v2933_v8, %s3281_s5 }
0x12d9   :  { %408 = vrot.lane.b32.xlu1 %v3505_v19, %s3275_s20 }
0x12dd   :  { %566 = vrot.lane.b32.xlu1 %v3539_v3, %s3275_s20  ;;  %v3613_v3 = vld [vmem:[%s4128_s6 + $0x8] sm:$0xff]  }
0x1347   :  { %v796_v9 = vpop.permute.xlu1 %795 }
0x1348   :  { %v798_v10 = vmul.f32 %v796_v9, %v781_v0 }
0x134a   :  { %v3603_v11 = vpack.c.bf16 %v798_v10, %v798_v10 }
0x134b   :  { %v409_v12 = vpop.permute.xlu1 %408 }
0x134c   :  { %411 = vst.msk [vmem:[#allocation2 + $0x4] sm:$0xf] %vm331_vm5, %v409_v12  ;;  %807 = vrot.lane.b32.xlu0 %v3603_v11, %s3275_s20 }
0x134f   :  { %v567_v13 = vpop.permute.xlu1 %566 }
0x1350   :  { %569 = vst.msk [vmem:[#allocation2 + $0xc] sm:$0xf] %vm331_vm5, %v567_v13  ;;  %1098 = vrot.lane.b32.xlu0 %v2515_v20, %s3281_s5 }
0x1353   :  { %v2864_v17 = vld [vmem:[#allocation2] sm:$0xff]  }
0x1354   :  { %2734 = vmatprep.mubr.msk.bf16.mxu0 %vm250_vm3, %v2864_v17 }
0x1357   :  { %v2865_v19 = vld [vmem:[#allocation2 + $0x8] sm:$0xff]  }
0x1358   :  { %2735 = vmatmul.mubr.msk.bf16.vlgmr.msra.gmra.mxu0 %vm250_vm3, %v2865_v19 }
0x1359   :  { %2759 = vmatpush3.bf16.msra.mxu0 %v3613_v3 }
0x135a   :  { %2760 = vmatprep.subr.bf16.mxu0 %v3279_v14 }
0x135d   :  { %2761 = vmatpush3.bf16.msra.mxu0 %v3621_v18 }
0x135e   :  { %2774 = vmatprep.subr.bf16.mxu0 %v3279_v14 }
0x13be   :  { %v808_v21 = vpop.permute.xlu0 %807 }
0x13bf   :  { %2727 = vmatmul.mubr.msk.bf16.vlgmr.msra.gmra.mxu1 %vm250_vm3, %v808_v21 }
0x13c0   :  { %2743 = vmatpush3.bf16.msra.mxu1 %v3613_v3  ;;  %2746 = vmatprep.mubr.msk.bf16.mxu1 %vm3280_vm2, %v3279_v14 }
0x13c1   :  { %2744 = vmatprep.subr.bf16.mxu1 %v3279_v14 }
0x13c2   :  { %v1099_v50 = vpop.permute.xlu0 %1098 }
0x13c4   :  { %2745 = vmatpush3.bf16.msra.mxu1 %v3621_v18 }
0x13c5   :  { %2750 = vmatprep.subr.bf16.mxu1 %v3279_v14 }
0x13c7   :  { %2747 = vmatmul.mubr.msk.bf16.vlgmr.msra.gmra.mxu1 %vm250_vm3, %v1032_v24 }
0x13c8   :  { %2751 = vmatpush3.bf16.msra.mxu1 %v3613_v3  ;;  %2754 = vmatprep.mubr.msk.bf16.mxu1 %vm3280_vm2, %v3279_v14 }
0x13c9   :  { %2752 = vmatprep.subr.bf16.mxu1 %v3279_v14 }
0x13cc   :  { %2753 = vmatpush3.bf16.msra.mxu1 %v3621_v18 }
0x13cd   :  { %2766 = vmatprep.subr.bf16.mxu1 %v3279_v14 }
0x1418   :  { %v3646_v25 = vpop.f32.mrf.mxu0 }
0x141a   :  { %v993_v34 = vpop.f32.mrf.mxu0 }
0x141b   :  { %v994_v38 = vadd.f32 %v3649_v36, %v993_v34 }
0x141c   :  { %v3684_v8 = vpop.f32.mrf.mxu0 }
0x141e   :  { %v996_v9 = vpop.f32.mrf.mxu0 }
0x141f   :  { %v997_v10 = vadd.f32 %v3649_v36, %v996_v9 }
0x147f   :  { %v846_v27 = vpop.f32.mrf.mxu1 }
0x1480   :  { %v852_v28 = vadd.f32 %v846_v27, %v3473_v30 }
0x1481   :  { %v2728_v31 = vpop.f32.mrf.mxu1 }
0x1482   :  { %v2501_v49 = vmul.f32 -1.442695, %v852_v28 }
0x1483   :  { %v849_v35 = vpop.f32.mrf.mxu1 }
0x1485   :  { %v2729_v37 = vpop.f32.mrf.mxu1 }
0x1487   :  { %v1082_v39 = vpop.f32.mrf.mxu1 }
0x1488   :  { %v1088_v22 = vadd.f32 %v1082_v39, %v994_v38 }
0x1489   :  { %v2748_v40 = vpop.f32.mrf.mxu1 }
0x148a   :  { %v2519_v41 = vmul.f32 -1.442695, %v1088_v22 }
0x148b   :  { %v1085_v15 = vpop.f32.mrf.mxu1 }
0x148c   :  { %2934 = vpow2.f32 %v2519_v41 }
0x148d   :  { %v2749_v42 = vpop.f32.mrf.mxu1  ;;  %2936 = vtanh.f32 %v1088_v22 }
0x1499   :  { %v2935_v44 = vpop.eup %2934 }
0x149a   :  { %v1092_v16 = vadd.f32 1.0, %v2935_v44  ;;  %v2937_v30 = vpop.eup %2936 }
0x149c   :  { %2938 = vrcp.f32 %v1092_v16 }
0x149d   :  { %2940 = vpow2.f32 %v2501_v49  ;;  %v1002_v49 = vadd.f32 %v3646_v25, %v3649_v36 }
0x14a9   :  { %v2939_v45 = vpop.eup %2938 }
0x14aa   :  { %v1096_v33 = vsel %vm122_vm4, %v2939_v45, %v2937_v30  ;;  %v2941_v51 = vpop.eup %2940 }
0x14ab   :  { %1103 = vrot.lane.b32.xlu1 %v1096_v33, %s3281_s5  ;;  %v1101_v53 = vmul.f32 %v1099_v50, %v1096_v33  ;;  %v856_v54 = vadd.f32 1.0, %v2941_v51 }
0x151d   :  { %v1104_v47 = vpop.permute.xlu1 %1103 }
0x151e   :  { %v1106_v48 = vmul.f32 %v1104_v47, %v1096_v33 }
0x1520   :  { %1108 = vrot.lane.b32.xlu1 %v1106_v48, %s3281_s5 }
0x1592   :  { %v1109_v55 = vpop.permute.xlu1 %1108 }
0x1593   :  { %v1111_v56 = vadd.f32 %v1109_v55, %v1101_v53 }
0x1595   :  { %2942 = vtanh.f32 %v1111_v56 }
0x1596   :  { %2944 = vrcp.f32 %v856_v54 }
0x1597   :  { %2946 = vtanh.f32 %v852_v28 }
0x15a2   :  { %v2943_v58 = vpop.eup %2942 }
0x15a3   :  { %v2945_v59 = vpop.eup %2944  ;;  %1114 = vrot.lane.b32.xlu0 %v2943_v58, %s3281_s5 }
0x15a4   :  { %v2947_v60 = vpop.eup %2946 }
0x15a5   :  { %v860_v61 = vsel %vm122_vm4, %v2945_v59, %v2947_v60 }
0x15a6   :  { %v861_v23 = vmul.f32 %v860_v61, %v3586_v5 }
0x15a7   :  { %863 = vrot.lane.b32.xlu0 %v860_v61, %s3281_s5 }
0x1615   :  { %v1115_v29 = vpop.permute.xlu0 %1114 }
0x1616   :  { %v3660_v62 = vmul.f32 %v1115_v29, %v1096_v33 }
0x1618   :  { %v1127_v63 = vpack.c.bf16 %v3660_v62, %v3660_v62 }
0x1619   :  { %v864_v0 = vpop.permute.xlu0 %863 }
0x161a   :  { %v866_v1 = vmul.f32 %v864_v0, %v860_v61  ;;  %1129 = vrot.lane.b32.xlu1 %v1127_v63, %s3275_s20 }
0x161c   :  { %868 = vrot.lane.b32.xlu0 %v866_v1, %s3281_s5 }
0x168c   :  { %v1130_v2 = vpop.permute.xlu1 %1129 }
0x168d   :  { %2755 = vmatmul.mubr.msk.bf16.vlgmr.msra.gmra.mxu1 %vm250_vm3, %v1130_v2 }
0x168e   :  { %v869_v4 = vpop.permute.xlu0 %868  ;;  %2767 = vmatpush3.bf16.msra.mxu1 %v3613_v3  ;;  %2770 = vmatprep.mubr.msk.bf16.mxu1 %vm3280_vm2, %v3279_v14 }
0x168f   :  { %v3671_v6 = vadd.f32 %v869_v4, %v861_v23  ;;  %2768 = vmatprep.subr.bf16.mxu1 %v3279_v14 }
0x1691   :  { %2948 = vtanh.f32 %v3671_v6 }
0x1692   :  { %2769 = vmatpush3.bf16.msra.mxu1 %v3621_v18 }
0x1693   :  { %2782 = vmatprep.subr.bf16.mxu1 %v3279_v14 }
0x169e   :  { %v2949_v7 = vpop.eup %2948 }
0x169f   :  { %874 = vrot.lane.b32.xlu0 %v2949_v7, %s3281_s5 }
0x16a3   :  { %645 = vrot.lane.b32.xlu0 %v3555_v32, %s3275_s20 }
0x16a7   :  { %803 = vrot.lane.b32.xlu0 %v3603_v11, %s3275_s20 }
0x1711   :  { %v875_v5 = vpop.permute.xlu0 %874 }
0x1712   :  { %v3692_v39 = vmul.f32 %v875_v5, %v860_v61 }
0x1714   :  { %v2572_v22 = vpack.c.bf16 %v3692_v39, %v3692_v39 }
0x1715   :  { %v646_v57 = vpop.permute.xlu0 %645 }
0x1716   :  { %648 = vst.msk [vmem:[#allocation2 + $0x10] sm:$0xf] %vm331_vm5, %v646_v57 }
0x1719   :  { %v804_v46 = vpop.permute.xlu0 %803 }
0x171a   :  { %806 = vst.msk [vmem:[#allocation2 + $0x18] sm:$0xf] %vm331_vm5, %v804_v46  ;;  %v1005_v46 = vadd.f32 %v3684_v8, %v3649_v36 }
0x174d   :  { %v1168_v12 = vpop.f32.mrf.mxu1 }
0x174e   :  { %v1174_v13 = vadd.f32 %v1168_v12, %v997_v10 }
0x174f   :  { %v2756_v17 = vpop.f32.mrf.mxu1 }
0x1750   :  { %v2522_v19 = vmul.f32 -1.442695, %v1174_v13 }
0x1751   :  { %v1171_v32 = vpop.f32.mrf.mxu1 }
0x1752   :  { %2950 = vpow2.f32 %v2522_v19 }
0x1753   :  { %v2757_v20 = vpop.f32.mrf.mxu1  ;;  %2952 = vtanh.f32 %v1174_v13 }
0x175f   :  { %v2951_v11 = vpop.eup %2950 }
0x1760   :  { %v1178_v21 = vadd.f32 1.0, %v2951_v11  ;;  %v2953_v26 = vpop.eup %2952 }
0x1762   :  { %2954 = vrcp.f32 %v1178_v21 }
0x176f   :  { %v2955_v24 = vpop.eup %2954 }
0x1770   :  { %v1182_v27 = vsel %vm122_vm4, %v2955_v24, %v2953_v26 }
0x1771   :  { %1185 = vrot.lane.b32.xlu1 %v1182_v27, %s3281_s5  ;;  %v1183_v34 = vmul.f32 %v1182_v27, %v1111_v56 }
0x17e3   :  { %v1186_v28 = vpop.permute.xlu1 %1185 }
0x17e4   :  { %v1188_v31 = vmul.f32 %v1186_v28, %v1182_v27 }
0x17e6   :  { %1190 = vrot.lane.b32.xlu1 %v1188_v31, %s3281_s5 }
0x1858   :  { %v1191_v35 = vpop.permute.xlu1 %1190 }
0x1859   :  { %v1193_v37 = vadd.f32 %v1191_v35, %v1183_v34 }
0x185b   :  { %2956 = vtanh.f32 %v1193_v37 }
0x1868   :  { %v2957_v38 = vpop.eup %2956 }
0x1869   :  { %1196 = vrot.lane.b32.xlu1 %v2957_v38, %s3281_s5 }
0x186d   :  { %724 = vrot.lane.b32.xlu1 %v3572_v52, %s3275_s20 }
0x1871   :  { %882 = vrot.lane.b32.xlu1 %v2572_v22, %s3275_s20 }
0x18db   :  { %v1197_v40 = vpop.permute.xlu1 %1196 }
0x18dc   :  { %v3699_v41 = vmul.f32 %v1197_v40, %v1182_v27 }
0x18de   :  { %v1209_v15 = vpack.c.bf16 %v3699_v41, %v3699_v41 }
0x18df   :  { %v725_v42 = vpop.permute.xlu1 %724 }
0x18e0   :  { %727 = vst.msk [vmem:[#allocation2 + $0x14] sm:$0xf] %vm331_vm5, %v725_v42  ;;  %1211 = vrot.lane.b32.xlu0 %v1209_v15, %s3275_s20 }
0x18e3   :  { %v883_v44 = vpop.permute.xlu1 %882 }
0x18e4   :  { %885 = vst.msk [vmem:[#allocation2 + $0x1c] sm:$0xf] %vm331_vm5, %v883_v44 }
0x18e7   :  { %v2868_v52 = vld [vmem:[#allocation2 + $0x10] sm:$0xff]  }
0x18e8   :  { %2738 = vmatprep.mubr.msk.bf16.mxu0 %vm250_vm3, %v2868_v52 }
0x18eb   :  { %v2869_v16 = vld [vmem:[#allocation2 + $0x18] sm:$0xff]  }
0x18ec   :  { %2739 = vmatmul.mubr.msk.bf16.gmra.mxu0 %vm250_vm3, %v2869_v16 }
0x18ed   :  { %2762 = vmatprep.mubr.msk.bf16.mxu0 %vm3280_vm2, %v3279_v14 }
0x1952   :  { %v1212_v30 = vpop.permute.xlu0 %1211 }
0x1953   :  { %2763 = vmatmul.mubr.msk.bf16.vlgmr.msra.gmra.mxu0 %vm250_vm3, %v1212_v30 }
0x1954   :  { %2775 = vmatpush3.bf16.msra.mxu0 %v3613_v3  ;;  %2778 = vmatprep.mubr.msk.bf16.mxu0 %vm3280_vm2, %v3279_v14 }
0x1955   :  { %2776 = vmatprep.subr.bf16.mxu0 %v3279_v14 }
0x1958   :  { %2777 = vmatpush3.bf16.msra.mxu0 %v3621_v18 }
0x1959   :  { %2790 = vmatprep.subr.bf16.mxu0 %v3279_v14 }
0x19ac   :  { %v3717_v45 = vpop.f32.mrf.mxu0 }
0x19ae   :  { %v3719_v33 = vpop.f32.mrf.mxu0 }
0x19af   :  { %v1010_v40 = vadd.f32 %v3649_v36, %v3719_v33 }
0x19b0   :  { %v3721_v47 = vpop.f32.mrf.mxu0 }
0x19b2   :  { %v3723_v48 = vpop.f32.mrf.mxu0 }
0x1a13   :  { %v1250_v50 = vpop.f32.mrf.mxu0 }
0x1a14   :  { %v1256_v51 = vadd.f32 %v1250_v50, %v1002_v49 }
0x1a15   :  { %v2764_v53 = vpop.f32.mrf.mxu0 }
0x1a16   :  { %v2525_v54 = vmul.f32 -1.442695, %v1256_v51 }
0x1a17   :  { %v1253_v55 = vpop.f32.mrf.mxu0 }
0x1a18   :  { %2958 = vpow2.f32 %v2525_v54 }
0x1a19   :  { %v2765_v56 = vpop.f32.mrf.mxu0  ;;  %2960 = vtanh.f32 %v1256_v51 }
0x1a25   :  { %v2959_v58 = vpop.eup %2958 }
0x1a26   :  { %v1260_v59 = vadd.f32 1.0, %v2959_v58  ;;  %v2961_v60 = vpop.eup %2960 }
0x1a28   :  { %2962 = vrcp.f32 %v1260_v59 }
0x1a35   :  { %v2963_v61 = vpop.eup %2962 }
0x1a36   :  { %v1264_v29 = vsel %vm122_vm4, %v2963_v61, %v2961_v60 }
0x1a37   :  { %1267 = vrot.lane.b32.xlu1 %v1264_v29, %s3281_s5  ;;  %v1265_v0 = vmul.f32 %v1264_v29, %v1193_v37 }
0x1aa9   :  { %v1268_v63 = vpop.permute.xlu1 %1267 }
0x1aaa   :  { %v1270_v25 = vmul.f32 %v1268_v63, %v1264_v29 }
0x1aac   :  { %1272 = vrot.lane.b32.xlu0 %v1270_v25, %s3281_s5 }
0x1b1e   :  { %v1273_v1 = vpop.permute.xlu0 %1272 }
0x1b1f   :  { %v1275_v2 = vadd.f32 %v1273_v1, %v1265_v0  ;;  %v1013_v0 = vadd.f32 %v3649_v36, %v3723_v48 }
0x1b21   :  { %2964 = vtanh.f32 %v1275_v2 }
0x1b2e   :  { %v2965_v23 = vpop.eup %2964 }
0x1b2f   :  { %1278 = vrot.lane.b32.xlu1 %v2965_v23, %s3281_s5 }
0x1ba1   :  { %v1279_v4 = vpop.permute.xlu1 %1278 }
0x1ba2   :  { %v3732_v7 = vmul.f32 %v1279_v4, %v1264_v29 }
0x1ba4   :  { %v1291_v5 = vpack.c.bf16 %v3732_v7, %v3732_v7 }
0x1ba6   :  { %1293 = vrot.lane.b32.xlu0 %v1291_v5, %s3275_s20 }
0x1c18   :  { %v1294_v57 = vpop.permute.xlu0 %1293 }
0x1c19   :  { %2771 = vmatmul.mubr.msk.bf16.vlgmr.msra.gmra.mxu1 %vm250_vm3, %v1294_v57 }
0x1c1a   :  { %2783 = vmatpush3.bf16.msra.mxu1 %v3613_v3  ;;  %2786 = vmatprep.mubr.msk.bf16.mxu1 %vm3280_vm2, %v3279_v14 }
0x1c1b   :  { %2784 = vmatprep.subr.bf16.mxu1 %v3279_v14 }
0x1c1e   :  { %2785 = vmatpush3.bf16.msra.mxu1 %v3621_v18 }
0x1c1f   :  { %2798 = vmatprep.subr.bf16.mxu1 %v3279_v14 }
0x1cd9   :  { %v1332_v9 = vpop.f32.mrf.mxu1 }
0x1cda   :  { %v1338_v10 = vadd.f32 %v1332_v9, %v1005_v46 }
0x1cdb   :  { %v2772_v12 = vpop.f32.mrf.mxu1 }
0x1cdc   :  { %v2528_v13 = vmul.f32 -1.442695, %v1338_v10 }
0x1cdd   :  { %v1335_v17 = vpop.f32.mrf.mxu1 }
0x1cde   :  { %2966 = vpow2.f32 %v2528_v13 }
0x1cdf   :  { %v2773_v19 = vpop.f32.mrf.mxu1  ;;  %2968 = vtanh.f32 %v1338_v10 }
0x1ceb   :  { %v2967_v32 = vpop.eup %2966 }
0x1cec   :  { %v1342_v20 = vadd.f32 1.0, %v2967_v32  ;;  %v2969_v11 = vpop.eup %2968 }
0x1cee   :  { %2970 = vrcp.f32 %v1342_v20 }
0x1cfb   :  { %v2971_v21 = vpop.eup %2970 }
0x1cfc   :  { %v1346_v26 = vsel %vm122_vm4, %v2971_v21, %v2969_v11 }
0x1cfd   :  { %1349 = vrot.lane.b32.xlu1 %v1346_v26, %s3281_s5  ;;  %v1347_v27 = vmul.f32 %v1346_v26, %v1275_v2 }
0x1d6f   :  { %v1350_v24 = vpop.permute.xlu1 %1349 }
0x1d70   :  { %v1352_v8 = vmul.f32 %v1350_v24, %v1346_v26 }
0x1d72   :  { %1354 = vrot.lane.b32.xlu0 %v1352_v8, %s3281_s5 }
0x1de4   :  { %v1355_v28 = vpop.permute.xlu0 %1354 }
0x1de5   :  { %v1357_v31 = vadd.f32 %v1355_v28, %v1347_v27 }
0x1de7   :  { %2972 = vtanh.f32 %v1357_v31 }
0x1df4   :  { %v2973_v34 = vpop.eup %2972 }
0x1df5   :  { %1360 = vrot.lane.b32.xlu1 %v2973_v34, %s3281_s5 }
0x1e67   :  { %v1361_v35 = vpop.permute.xlu1 %1360 }
0x1e68   :  { %v3751_v37 = vmul.f32 %v1361_v35, %v1346_v26  ;;  %v1018_v26 = vadd.f32 %v3717_v45, %v3649_v36 }
0x1e6a   :  { %v1373_v38 = vpack.c.bf16 %v3751_v37, %v3751_v37 }
0x1e6c   :  { %1375 = vrot.lane.b32.xlu0 %v1373_v38, %s3275_s20 }
0x1ede   :  { %v1376_v22 = vpop.permute.xlu0 %1375 }
0x1edf   :  { %2779 = vmatmul.mubr.msk.bf16.vlgmr.msra.gmra.mxu0 %vm250_vm3, %v1376_v22 }
0x1ee0   :  { %2791 = vmatpush3.bf16.msra.mxu0 %v3613_v3  ;;  %2794 = vmatprep.mubr.msk.bf16.mxu0 %vm3280_vm2, %v3279_v14 }
0x1ee1   :  { %2792 = vmatprep.subr.bf16.mxu0 %v3279_v14 }
0x1ee4   :  { %2793 = vmatpush3.bf16.msra.mxu0 %v3621_v18 }
0x1f9f   :  { %v1414_v15 = vpop.f32.mrf.mxu0 }
0x1fa0   :  { %v1420_v42 = vadd.f32 %v1414_v15, %v1010_v40 }
0x1fa1   :  { %v2780_v44 = vpop.f32.mrf.mxu0 }
0x1fa2   :  { %v2531_v52 = vmul.f32 -1.442695, %v1420_v42 }
0x1fa3   :  { %v1417_v16 = vpop.f32.mrf.mxu0 }
0x1fa4   :  { %2974 = vpow2.f32 %v2531_v52 }
0x1fa5   :  { %v2781_v30 = vpop.f32.mrf.mxu0  ;;  %2976 = vtanh.f32 %v1420_v42 }
0x1fb1   :  { %v2975_v49 = vpop.eup %2974 }
0x1fb2   :  { %v1424_v50 = vadd.f32 1.0, %v2975_v49  ;;  %v2977_v51 = vpop.eup %2976 }
0x1fb4   :  { %2978 = vrcp.f32 %v1424_v50 }
0x1fc1   :  { %v2979_v53 = vpop.eup %2978 }
0x1fc2   :  { %v1428_v54 = vsel %vm122_vm4, %v2979_v53, %v2977_v51 }
0x1fc3   :  { %1431 = vrot.lane.b32.xlu1 %v1428_v54, %s3281_s5  ;;  %v1429_v56 = vmul.f32 %v1428_v54, %v1357_v31 }
0x2035   :  { %v1432_v55 = vpop.permute.xlu1 %1431 }
0x2036   :  { %v1434_v33 = vmul.f32 %v1432_v55, %v1428_v54 }
0x2038   :  { %1436 = vrot.lane.b32.xlu0 %v1434_v33, %s3281_s5 }
0x20aa   :  { %v1437_v58 = vpop.permute.xlu0 %1436 }
0x20ab   :  { %v1439_v59 = vadd.f32 %v1437_v58, %v1429_v56 }
0x20ad   :  { %2980 = vtanh.f32 %v1439_v59 }
0x20ba   :  { %v2981_v60 = vpop.eup %2980 }
0x20bb   :  { %1442 = vrot.lane.b32.xlu1 %v2981_v60, %s3281_s5 }
0x212d   :  { %v1443_v61 = vpop.permute.xlu1 %1442 }
0x212e   :  { %v3769_v29 = vmul.f32 %v1443_v61, %v1428_v54  ;;  %v1021_v54 = vadd.f32 %v3721_v47, %v3649_v36 }
0x2130   :  { %v1455_v63 = vpack.c.bf16 %v3769_v29, %v3769_v29 }
0x2132   :  { %1457 = vrot.lane.b32.xlu0 %v1455_v63, %s3275_s20 }
0x21a4   :  { %v1458_v25 = vpop.permute.xlu0 %1457 }
0x21a5   :  { %2787 = vmatmul.mubr.msk.bf16.vlgmr.msra.gmra.mxu1 %vm250_vm3, %v1458_v25 }
0x21a6   :  { %2799 = vmatpush3.bf16.msra.mxu1 %v3613_v3  ;;  %2802 = vmatprep.mubr.msk.bf16.mxu1 %vm3280_vm2, %v3279_v14 }
0x21a7   :  { %2800 = vmatprep.subr.bf16.mxu1 %v3279_v14 }
0x21aa   :  { %2801 = vmatpush3.bf16.msra.mxu1 %v3621_v18 }
0x2265   :  { %v1496_v1 = vpop.f32.mrf.mxu1 }
0x2266   :  { %v1502_v2 = vadd.f32 %v1496_v1, %v1013_v0 }
0x2267   :  { %v2788_v23 = vpop.f32.mrf.mxu1 }
0x2268   :  { %v2534_v4 = vmul.f32 -1.442695, %v1502_v2 }
0x2269   :  { %v1499_v5 = vpop.f32.mrf.mxu1 }
0x226a   :  { %2982 = vpow2.f32 %v2534_v4 }
0x226b   :  { %v2789_v57 = vpop.f32.mrf.mxu1  ;;  %2984 = vtanh.f32 %v1502_v2 }
0x2277   :  { %v2983_v46 = vpop.eup %2982 }
0x2278   :  { %v1506_v9 = vadd.f32 1.0, %v2983_v46  ;;  %v2985_v3 = vpop.eup %2984 }
0x227a   :  { %2986 = vrcp.f32 %v1506_v9 }
0x2287   :  { %v2987_v10 = vpop.eup %2986 }
0x2288   :  { %v1510_v14 = vsel %vm122_vm4, %v2987_v10, %v2985_v3 }
0x2289   :  { %1513 = vrot.lane.b32.xlu1 %v1510_v14, %s3281_s5  ;;  %v1511_v12 = vmul.f32 %v1510_v14, %v1439_v59 }
0x22fb   :  { %v1514_v18 = vpop.permute.xlu1 %1513 }
0x22fc   :  { %v1516_v48 = vmul.f32 %v1514_v18, %v1510_v14  ;;  %v2870_v18 = vld [vmem:[%s4131_s9 + $0x8] sm:$0xff]  }
0x22fd   :  { %2806 = vmatprep.subr.bf16.mxu0 %v2870_v18 }
0x22fe   :  { %1518 = vrot.lane.b32.xlu0 %v1516_v48, %s3281_s5 }
0x2370   :  { %v1519_v13 = vpop.permute.xlu0 %1518 }
0x2371   :  { %v1521_v17 = vadd.f32 %v1519_v13, %v1511_v12  ;;  %v2871_v12 = vld [vmem:[%s4131_s9] sm:$0xff]  }
0x2373   :  { %2988 = vtanh.f32 %v1521_v17 }
0x2380   :  { %v2989_v19 = vpop.eup %2988 }
0x2381   :  { %1524 = vrot.lane.b32.xlu1 %v2989_v19, %s3281_s5 }
0x23f3   :  { %v1525_v32 = vpop.permute.xlu1 %1524 }
0x23f4   :  { %v3787_v20 = vmul.f32 %v1525_v32, %v1510_v14 }
0x23f6   :  { %v1537_v11 = vpack.c.bf16 %v3787_v20, %v3787_v20 }
0x23f8   :  { %1539 = vrot.lane.b32.xlu0 %v1537_v11, %s3275_s20 }
0x246a   :  { %v1540_v21 = vpop.permute.xlu0 %1539 }
0x246b   :  { %2795 = vmatmul.mubr.msk.bf16.vlgmr.msra.gmra.mxu0 %vm250_vm3, %v1540_v21 }
0x246c   :  { %2807 = vmatpush3.bf16.msra.mxu0 %v2870_v18 }
0x246d   :  { %2808 = vmatprep.subr.bf16.mxu0 %v2871_v12 }
0x2470   :  { %2809 = vmatpush3.bf16.msra.mxu0 %v2871_v12 }
0x252b   :  { %v1578_v24 = vpop.f32.mrf.mxu0 }
0x252c   :  { %v1584_v8 = vadd.f32 %v1578_v24, %v1018_v26 }
0x252d   :  { %v2796_v27 = vpop.f32.mrf.mxu0 }
0x252e   :  { %v2537_v28 = vmul.f32 -1.442695, %v1584_v8 }
0x252f   :  { %v1581_v31 = vpop.f32.mrf.mxu0 }
0x2530   :  { %2990 = vpow2.f32 %v2537_v28 }
0x2531   :  { %v2797_v34 = vpop.f32.mrf.mxu0  ;;  %2992 = vtanh.f32 %v1584_v8 }
0x253d   :  { %v2991_v35 = vpop.eup %2990 }
0x253e   :  { %v1588_v38 = vadd.f32 1.0, %v2991_v35  ;;  %v2993_v22 = vpop.eup %2992 }
0x2540   :  { %2994 = vrcp.f32 %v1588_v38 }
0x254d   :  { %v2995_v40 = vpop.eup %2994 }
0x254e   :  { %v1592_v15 = vsel %vm122_vm4, %v2995_v40, %v2993_v22  ;;  %v2876_v22 = vld [vmem:[#allocation9] sm:$0xff]  }
0x254f   :  { %1595 = vrot.lane.b32.xlu1 %v1592_v15, %s3281_s5  ;;  %v1593_v44 = vmul.f32 %v1592_v15, %v1521_v17  ;;  %2818 = vmatprep.subr.bf16.mxu1 %v2876_v22 }
0x25c1   :  { %v1596_v42 = vpop.permute.xlu1 %1595 }
0x25c2   :  { %v1598_v45 = vmul.f32 %v1596_v42, %v1592_v15  ;;  %v3850_v42 = vld [vmem:[%s4132_s10] ss:$0 sm:$0xff]  ;;  %s3282_s10 = smov 16  }
0x25c4   :  { %1600 = vrot.lane.b32.xlu0 %v1598_v45, %s3281_s5 }
0x2636   :  { %v1601_v52 = vpop.permute.xlu0 %1600 }
0x2637   :  { %v1603_v16 = vadd.f32 %v1601_v52, %v1593_v44 }
0x2639   :  { %2996 = vtanh.f32 %v1603_v16 }
0x2646   :  { %v2997_v30 = vpop.eup %2996 }
0x2647   :  { %1606 = vrot.lane.b32.xlu1 %v2997_v30, %s3281_s5 }
0x26b9   :  { %v1607_v49 = vpop.permute.xlu1 %1606 }
0x26ba   :  { %v1609_v50 = vmul.f32 %v1607_v49, %v1592_v15 }
0x26bc   :  { %v1619_v51 = vpack.c.bf16 %v1609_v50, %v1609_v50 }
0x26be   :  { %1621 = vrot.lane.b32.xlu0 %v1619_v51, %s3275_s20 }
0x2730   :  { %v1622_v53 = vpop.permute.xlu0 %1621 }
0x2731   :  { %2803 = vmatmul.mubr.msk.bf16.vlgmr.msra.gmra.mxu1 %vm250_vm3, %v1622_v53 }
0x2732   :  { %2819 = vmatpush3.bf16.msra.mxu1 %v2876_v22 }
0x27f1   :  { %v1660_v55 = vpop.f32.mrf.mxu1 }
0x27f2   :  { %v1666_v33 = vadd.f32 %v1660_v55, %v1021_v54 }
0x27f3   :  { %v2804_v56 = vpop.f32.mrf.mxu1 }
0x27f4   :  { %v2540_v58 = vmul.f32 -1.442695, %v1666_v33 }
0x27f5   :  { %v1663_v59 = vpop.f32.mrf.mxu1 }
0x27f6   :  { %2998 = vpow2.f32 %v2540_v58 }
0x27f7   :  { %v2805_v60 = vpop.f32.mrf.mxu1  ;;  %3000 = vtanh.f32 %v1666_v33 }
0x2803   :  { %v2999_v61 = vpop.eup %2998 }
0x2804   :  { %v1670_v63 = vadd.f32 1.0, %v2999_v61  ;;  %v3001_v25 = vpop.eup %3000 }
0x2806   :  { %3002 = vrcp.f32 %v1670_v63 }
0x2807   :  { %3004 = vtanh.f32 %v3660_v62 }
0x2808   :  { %3006 = vtanh.f32 %v3732_v7 }
0x2809   :  { %3008 = vtanh.f32 %v3769_v29 }
0x280a   :  { %3010 = vtanh.f32 %v1609_v50 }
0x280b   :  { %3012 = vtanh.f32 %v3699_v41 }
0x2813   :  { %v3003_v0 = vpop.eup %3002 }
0x2814   :  { %v1674_v1 = vsel %vm122_vm4, %v3003_v0, %v3001_v25  ;;  %v3005_v2 = vpop.eup %3004 }
0x2815   :  { %1677 = vrot.lane.b32.xlu1 %v1674_v1, %s3281_s5  ;;  %v2573_v23 = vpack.c.bf16 %v3005_v2, %v3005_v2  ;;  %v3007_v4 = vpop.eup %3006  ;;  %v1675_v29 = vmul.f32 %v1674_v1, %v1603_v16 }
0x2816   :  { %v2575_v5 = vpack.c.bf16 %v3007_v4, %v3007_v4  ;;  %v3009_v57 = vpop.eup %3008 }
0x2817   :  { %v2577_v46 = vpack.c.bf16 %v3009_v57, %v3009_v57  ;;  %v3011_v62 = vpop.eup %3010 }
0x2818   :  { %v2579_v7 = vpack.c.bf16 %v3011_v62, %v3011_v62  ;;  %v3013_v41 = vpop.eup %3012 }
0x2819   :  { %v2574_v17 = vpack.c.bf16 %v3013_v41, %v3013_v41 }
0x2887   :  { %v1678_v36 = vpop.permute.xlu1 %1677 }
0x2888   :  { %v1680_v47 = vmul.f32 %v1678_v36, %v1674_v1 }
0x288a   :  { %1682 = vrot.lane.b32.xlu0 %v1680_v47, %s3281_s5 }
0x288e   :  { %1123 = vrot.lane.b32.xlu0 %v2573_v23, %s3275_s20 }
0x2892   :  { %1287 = vrot.lane.b32.xlu0 %v2575_v5, %s3275_s20 }
0x2896   :  { %1451 = vrot.lane.b32.xlu0 %v2577_v46, %s3275_s20 }
0x289a   :  { %1615 = vrot.lane.b32.xlu0 %v2579_v7, %s3275_s20 }
0x28fc   :  { %v1683_v9 = vpop.permute.xlu0 %1682 }
0x28fd   :  { %v3815_v3 = vadd.f32 %v1683_v9, %v1675_v29 }
0x28ff   :  { %3014 = vtanh.f32 %v3815_v3 }
0x2900   :  { %v1124_v10 = vpop.permute.xlu0 %1123  ;;  %3016 = vtanh.f32 %v3751_v37 }
0x2901   :  { %1126 = vst.msk [vmem:[#allocation2] sm:$0xf] %vm331_vm5, %v1124_v10  ;;  %3018 = vtanh.f32 %v3787_v20 }
0x2904   :  { %v1288_v14 = vpop.permute.xlu0 %1287 }
0x2905   :  { %1290 = vst.msk [vmem:[#allocation2 + $0x8] sm:$0xf] %vm331_vm5, %v1288_v14 }
0x2908   :  { %v1452_v48 = vpop.permute.xlu0 %1451 }
0x2909   :  { %1454 = vst.msk [vmem:[#allocation2 + $0x10] sm:$0xf] %vm331_vm5, %v1452_v48 }
0x290c   :  { %v3015_v37 = vpop.eup %3014  ;;  %v1616_v13 = vpop.permute.xlu0 %1615 }
0x290d   :  { %1618 = vst.msk [vmem:[#allocation2 + $0x18] sm:$0xf] %vm331_vm5, %v1616_v13  ;;  %1688 = vrot.lane.b32.xlu1 %v3015_v37, %s3281_s5  ;;  %v3017_v19 = vpop.eup %3016 }
0x290e   :  { %v2576_v32 = vpack.c.bf16 %v3017_v19, %v3017_v19  ;;  %v3019_v20 = vpop.eup %3018 }
0x290f   :  { %v2578_v11 = vpack.c.bf16 %v3019_v20, %v3019_v20 }
0x2911   :  { %1205 = vrot.lane.b32.xlu1 %v2574_v17, %s3275_s20 }
0x2915   :  { %1369 = vrot.lane.b32.xlu1 %v2576_v32, %s3275_s20 }
0x2919   :  { %1533 = vrot.lane.b32.xlu1 %v2578_v11, %s3275_s20 }
0x297f   :  { %v1689_v21 = vpop.permute.xlu1 %1688 }
0x2980   :  { %v3835_v26 = vmul.f32 %v1689_v21, %v1674_v1 }
0x2982   :  { %3020 = vtanh.f32 %v3835_v26 }
0x2983   :  { %v1206_v24 = vpop.permute.xlu1 %1205 }
0x2984   :  { %1208 = vst.msk [vmem:[#allocation2 + $0x4] sm:$0xf] %vm331_vm5, %v1206_v24 }
0x2987   :  { %v1370_v8 = vpop.permute.xlu1 %1369 }
0x2988   :  { %1372 = vst.msk [vmem:[#allocation2 + $0xc] sm:$0xf] %vm331_vm5, %v1370_v8 }
0x298b   :  { %v1534_v27 = vpop.permute.xlu1 %1533  ;;  %v2872_v28 = vld [vmem:[#allocation2] sm:$0xff]  }
0x298c   :  { %1536 = vst.msk [vmem:[#allocation2 + $0x14] sm:$0xf] %vm331_vm5, %v1534_v27  ;;  %2810 = vmatprep.mubr.msk.bf16.mxu0 %vm250_vm3, %v2872_v28 }
0x298f   :  { %v3021_v31 = vpop.eup %3020  ;;  %v2873_v34 = vld [vmem:[#allocation2 + $0x8] sm:$0xff]  }
0x2990   :  { %v2580_v35 = vpack.c.bf16 %v3021_v31, %v3021_v31  ;;  %2811 = vmatmul.mubr.msk.bf16.vlgmr.msra.gmra.mxu0 %vm250_vm3, %v2873_v34 }
0x2992   :  { %1697 = vrot.lane.b32.xlu1 %v2580_v35, %s3275_s20 }
0x2993   :  { %v2874_v38 = vld [vmem:[#allocation2 + $0x10] sm:$0xff]  }
0x2994   :  { %2814 = vmatprep.mubr.msk.bf16.mxu0 %vm250_vm3, %v2874_v38 }
0x2a04   :  { %v1698_v40 = vpop.permute.xlu1 %1697 }
0x2a05   :  { %1700 = vst.msk [vmem:[#allocation2 + $0x1c] sm:$0xf] %vm331_vm5, %v1698_v40 }
0x2a0c   :  { %v2875_v15 = vld [vmem:[#allocation2 + $0x18] sm:$0xff]  }
0x2a0d   :  { %2815 = vmatmul.mubr.msk.bf16.gmra.mxu0 %vm250_vm3, %v2875_v15 }
0x2a50   :  { %v2812_v45 = vpop.f32.mrf.mxu0 }
0x2a51   :  { %v3853_v44 = vadd.f32 %v2812_v45, %v3850_v42 }
0x2a52   :  { %v1810_v52 = vpop.f32.mrf.mxu0 }
0x2a53   :  { %v1868_v16 = vand.u32 2147483647, %v3853_v44  ;;  %v3857_v30 = vadd.f32 %v3850_v42, %v1810_v52  ;;  %v1844_v17 = vmax.f32 %v3853_v44, 0.0  ;;  %vm1852_vm10 = vcmp.ne.f32.partialorder %v3853_v44, %v3853_v44 }
0x2a54   :  { %v2813_v49 = vpop.f32.mrf.mxu0 }
0x2a55   :  { %v1876_v50 = vsub.f32 0.0, %v1868_v16  ;;  %v1866_v51 = vand.u32 2147483647, %v3857_v30  ;;  %v3861_v53 = vadd.f32 %v2813_v49, %v3850_v42  ;;  %v1842_v8 = vmax.f32 %v3857_v30, 0.0 }
0x2a56   :  { %v1813_v54 = vpop.f32.mrf.mxu0  ;;  %vm1850_vm9 = vcmp.ne.f32.partialorder %v3857_v30, %v3857_v30 }
0x2a57   :  { %v1886_v55 = vmul.f32 1.442695, %v1876_v50  ;;  %v1874_v33 = vsub.f32 0.0, %v1866_v51  ;;  %v1869_v56 = vand.u32 2147483647, %v3861_v53  ;;  %v3865_v58 = vadd.f32 %v3850_v42, %v1813_v54 }
0x2a58   :  { %v1845_v38 = vmax.f32 %v3861_v53, 0.0  ;;  %vm1853_vm12 = vcmp.ne.f32.partialorder %v3861_v53, %v3861_v53 }
0x2a59   :  { %3022 = vpow2.f32 %v1886_v55  ;;  %v1882_v59 = vmul.f32 1.442695, %v1874_v33  ;;  %v1877_v60 = vsub.f32 0.0, %v1869_v56  ;;  %v1867_v61 = vand.u32 2147483647, %v3865_v58 }
0x2a5a   :  { %v1843_v54 = vmax.f32 %v3865_v58, 0.0  ;;  %vm1851_vm14 = vcmp.ne.f32.partialorder %v3865_v58, %v3865_v58 }
0x2a5b   :  { %3024 = vpow2.f32 %v1882_v59  ;;  %v1888_v63 = vmul.f32 1.442695, %v1877_v60  ;;  %v1875_v25 = vsub.f32 0.0, %v1867_v61 }
0x2a5d   :  { %3026 = vpow2.f32 %v1888_v63  ;;  %v1884_v0 = vmul.f32 1.442695, %v1875_v25 }
0x2a5f   :  { %3028 = vpow2.f32 %v1884_v0 }
0x2a66   :  { %v3023_v1 = vpop.eup %3022 }
0x2a67   :  { %v1916_v36 = vadd.f32 1.0, %v3023_v1  ;;  %v1919_v46 = vmul.f32 -0.5, %v3023_v1  ;;  %v1922_v9 = vand.u32 2147483647, %v3023_v1 }
0x2a68   :  { %v3025_v47 = vpop.eup %3024 }
0x2a69   :  { %v1898_v2 = vadd.f32 1.0, %v3025_v47  ;;  %3030 = vlog2.f32 %v1916_v36  ;;  %v1901_v62 = vmul.f32 -0.5, %v3025_v47  ;;  %v1920_v7 = vadd.f32 1.0, %v1919_v46 }
0x2a6a   :  { %v3027_v23 = vpop.eup %3026  ;;  %v1904_v48 = vand.u32 2147483647, %v3025_v47  ;;  %vm1923_vm6 = vcmp.lt.f32.partialorder %v1922_v9, 0.0004427343 }
0x2a6b   :  { %3032 = vlog2.f32 %v1898_v2  ;;  %v1925_v4 = vadd.f32 1.0, %v3027_v23  ;;  %v1928_v29 = vmul.f32 -0.5, %v3027_v23  ;;  %v1902_v10 = vadd.f32 1.0, %v1901_v62 }
0x2a6c   :  { %v3029_v5 = vpop.eup %3028  ;;  %v1921_v12 = vmul.f32 %v3023_v1, %v1920_v7  ;;  %v1931_v19 = vand.u32 2147483647, %v3027_v23  ;;  %vm1905_vm7 = vcmp.lt.f32.partialorder %v1904_v48, 0.0004427343 }
0x2a6d   :  { %3034 = vlog2.f32 %v1925_v4  ;;  %v1907_v57 = vadd.f32 1.0, %v3029_v5  ;;  %v1910_v14 = vmul.f32 -0.5, %v3029_v5  ;;  %v1929_v37 = vadd.f32 1.0, %v1928_v29 }
0x2a6e   :  { %v1903_v20 = vmul.f32 %v3025_v47, %v1902_v10  ;;  %v1913_v31 = vand.u32 2147483647, %v3029_v5  ;;  %vm1932_vm8 = vcmp.lt.f32.partialorder %v1931_v19, 0.0004427343 }
0x2a6f   :  { %3036 = vlog2.f32 %v1907_v57  ;;  %v1911_v11 = vadd.f32 1.0, %v1910_v14  ;;  %v1930_v35 = vmul.f32 %v3027_v23, %v1929_v37 }
0x2a70   :  { %vm1914_vm11 = vcmp.lt.f32.partialorder %v1913_v31, 0.0004427343 }
0x2a71   :  { %v1912_v15 = vmul.f32 %v3029_v5, %v1911_v11 }
0x2a76   :  { %v3031_v18 = vpop.eup %3030 }
0x2a77   :  { %v1918_v41 = vmul.f32 0.6931472, %v3031_v18 }
0x2a78   :  { %v3033_v13 = vpop.eup %3032 }
0x2a79   :  { %v1900_v32 = vmul.f32 0.6931472, %v3033_v13  ;;  %v1924_v21 = vsel %vm1923_vm6, %v1921_v12, %v1918_v41  ;;  %v2877_v12 = vld [vmem:[#allocation11] sm:$0xff]  }
0x2a7a   :  { %v3035_v24 = vpop.eup %3034  ;;  %v1972_v27 = vadd.f32 %v1924_v21, %v1844_v17  ;;  %2828 = vmatprep.subr.bf16.mxu0 %v2877_v12 }
0x2a7b   :  { %v1906_v28 = vsel %vm1905_vm7, %v1903_v20, %v1900_v32  ;;  %v1927_v34 = vmul.f32 0.6931472, %v3035_v24  ;;  %2829 = vmatpush3.bf16.msra.mxu0 %v2877_v12 }
0x2a7c   :  { %v1970_v22 = vadd.f32 %v1906_v28, %v1842_v8  ;;  %v3037_v40 = vpop.eup %3036  ;;  %v1980_v50 = vsel %vm1852_vm10, %v3853_v44, %v1972_v27  ;;  %vm2404_vm10 = vcmask 392192  }
0x2a7d   :  { %v1933_v45 = vsel %vm1932_vm8, %v1930_v35, %v1927_v34  ;;  %v1909_v16 = vmul.f32 0.6931472, %v3037_v40  ;;  %v1988_v60 = vadd.f32 0.0001, %v1980_v50 }
0x2a7e   :  { %v1978_v52 = vsel %vm1850_vm9, %v3857_v30, %v1970_v22  ;;  %v1973_v49 = vadd.f32 %v1933_v45, %v1845_v38 }
0x2a7f   :  { %v1986_v51 = vadd.f32 0.0001, %v1978_v52  ;;  %v1915_v55 = vsel %vm1914_vm11, %v1912_v15, %v1909_v16  ;;  %v1996_v0 = vsel %vm1841_vm13, %v3853_v44, %v1988_v60 }
0x2a80   :  { %v1981_v33 = vsel %vm1853_vm12, %v3861_v53, %v1973_v49  ;;  %v1971_v59 = vadd.f32 %v1915_v55, %v1843_v54 }
0x2a81   :  { %v1994_v56 = vsel %vm1841_vm13, %v3857_v30, %v1986_v51  ;;  %v1989_v61 = vadd.f32 0.0001, %v1981_v33 }
0x2a82   :  { %2372 = vrot.lane.b32.xlu0 %v1994_v56, %s3282_s10  ;;  %v1979_v63 = vsel %vm1851_vm14, %v3865_v58, %v1971_v59 }
0x2a83   :  { %v1987_v25 = vadd.f32 0.0001, %v1979_v63  ;;  %v1997_v30 = vsel %vm1841_vm13, %v3861_v53, %v1989_v61 }
0x2a84   :  { %v2006_v47 = vpack.c.bf16 %v1997_v30, %v1996_v0 }
0x2a85   :  { %v1995_v1 = vsel %vm1841_vm13, %v3865_v58, %v1987_v25 }
0x2a86   :  { %2376 = vrot.lane.b32.xlu0 %v1996_v0, %s3282_s10  ;;  %2374 = vrot.lane.b32.xlu1 %v1995_v1, %s3282_s10  ;;  %v2005_v36 = vpack.c.bf16 %v1995_v1, %v1994_v56 }
0x2a88   :  { %2820 = vmatprep.mubr.msk.bf16.mxu1 %vm2021_vm15, %v2005_v36 }
0x2a89   :  { %2821 = vmatmul.mubr.msk.bf16.vlgmr.msra.gmra.mxu1 %vm2021_vm15, %v2006_v47 }
0x2a8a   :  { %887 = vrot.lane.b32.xlu0 %v3692_v39, %s3275_s20  ;;  %2378 = vrot.lane.b32.xlu1 %v1997_v30, %s3282_s10 }
0x2a8e   :  { %1702 = vrot.lane.b32.xlu1 %v3835_v26, %s3275_s20  ;;  %s3283_s20 = smov 96  }
0x2acd   :  { %v2816_v44 = vpop.f32.mrf.mxu0 }
0x2ace   :  { %v3908_v53 = vadd.f32 %v2816_v44, %v3850_v42 }
0x2acf   :  { %v1826_v58 = vpop.f32.mrf.mxu0 }
0x2ad0   :  { %v1872_v2 = vand.u32 2147483647, %v3908_v53  ;;  %v3912_v23 = vadd.f32 %v3850_v42, %v1826_v58  ;;  %v1848_v52 = vmax.f32 %v3908_v53, 0.0  ;;  %vm1856_vm1 = vcmp.ne.f32.partialorder %v3908_v53, %v3908_v53 }
0x2ad1   :  { %v2817_v4 = vpop.f32.mrf.mxu0 }
0x2ad2   :  { %v1880_v5 = vsub.f32 0.0, %v1872_v2  ;;  %v1870_v57 = vand.u32 2147483647, %v3912_v23  ;;  %v3916_v39 = vadd.f32 %v2817_v4, %v3850_v42  ;;  %v1846_v54 = vmax.f32 %v3912_v23, 0.0 }
0x2ad3   :  { %v1829_v46 = vpop.f32.mrf.mxu0  ;;  %vm1854_vm5 = vcmp.ne.f32.partialorder %v3912_v23, %v3912_v23 }
0x2ad4   :  { %v1894_v62 = vmul.f32 1.442695, %v1880_v5  ;;  %v1878_v26 = vsub.f32 0.0, %v1870_v57  ;;  %v1873_v7 = vand.u32 2147483647, %v3916_v39  ;;  %v3920_v29 = vadd.f32 %v3850_v42, %v1829_v46 }
0x2ad5   :  { %v1849_v63 = vmax.f32 %v3916_v39, 0.0  ;;  %vm1857_vm7 = vcmp.ne.f32.partialorder %v3916_v39, %v3916_v39 }
0x2ad6   :  { %3038 = vpow2.f32 %v1894_v62  ;;  %v1890_v9 = vmul.f32 1.442695, %v1878_v26  ;;  %v1881_v10 = vsub.f32 0.0, %v1873_v7  ;;  %v1871_v14 = vand.u32 2147483647, %v3920_v29 }
0x2ad7   :  { %v1847_v46 = vmax.f32 %v3920_v29, 0.0  ;;  %vm1855_vm8 = vcmp.ne.f32.partialorder %v3920_v29, %v3920_v29 }
0x2ad8   :  { %3040 = vpow2.f32 %v1890_v9  ;;  %v1896_v18 = vmul.f32 1.442695, %v1881_v10  ;;  %v1879_v48 = vsub.f32 0.0, %v1871_v14 }
0x2ada   :  { %3042 = vpow2.f32 %v1896_v18  ;;  %v1892_v41 = vmul.f32 1.442695, %v1879_v48 }
0x2adc   :  { %3044 = vpow2.f32 %v1892_v41 }
0x2ae3   :  { %v3039_v37 = vpop.eup %3038 }
0x2ae4   :  { %v1952_v13 = vadd.f32 1.0, %v3039_v37  ;;  %v1955_v21 = vmul.f32 -0.5, %v3039_v37  ;;  %v1958_v28 = vand.u32 2147483647, %v3039_v37 }
0x2ae5   :  { %v3041_v17 = vpop.eup %3040 }
0x2ae6   :  { %3046 = vlog2.f32 %v1952_v13  ;;  %v1934_v42 = vadd.f32 1.0, %v3041_v17  ;;  %v1937_v24 = vmul.f32 -0.5, %v3041_v17  ;;  %v1956_v8 = vadd.f32 1.0, %v1955_v21 }
0x2ae7   :  { %v3043_v19 = vpop.eup %3042  ;;  %v1940_v45 = vand.u32 2147483647, %v3041_v17  ;;  %vm1959_vm0 = vcmp.lt.f32.partialorder %v1958_v28, 0.0004427343 }
0x2ae8   :  { %v1961_v32 = vadd.f32 1.0, %v3043_v19  ;;  %3048 = vlog2.f32 %v1934_v42  ;;  %v1964_v27 = vmul.f32 -0.5, %v3043_v19  ;;  %v1938_v35 = vadd.f32 1.0, %v1937_v24 }
0x2ae9   :  { %v3045_v20 = vpop.eup %3044  ;;  %v1957_v40 = vmul.f32 %v3039_v37, %v1956_v8  ;;  %v1967_v16 = vand.u32 2147483647, %v3043_v19  ;;  %vm1941_vm2 = vcmp.lt.f32.partialorder %v1940_v45, 0.0004427343 }
0x2aea   :  { %3050 = vlog2.f32 %v1961_v32  ;;  %v1943_v11 = vadd.f32 1.0, %v3045_v20  ;;  %v1946_v31 = vmul.f32 -0.5, %v3045_v20  ;;  %v1965_v15 = vadd.f32 1.0, %v1964_v27 }
0x2aeb   :  { %v1939_v59 = vmul.f32 %v3041_v17, %v1938_v35  ;;  %v1949_v60 = vand.u32 2147483647, %v3045_v20  ;;  %vm1968_vm4 = vcmp.lt.f32.partialorder %v1967_v16, 0.0004427343 }
0x2aec   :  { %3052 = vlog2.f32 %v1943_v11  ;;  %v1947_v49 = vadd.f32 1.0, %v1946_v31  ;;  %v1966_v0 = vmul.f32 %v3043_v19, %v1965_v15 }
0x2aed   :  { %vm1950_vm6 = vcmp.lt.f32.partialorder %v1949_v60, 0.0004427343 }
0x2aee   :  { %v1948_v44 = vmul.f32 %v3045_v20, %v1947_v49 }
0x2af3   :  { %v3047_v34 = vpop.eup %3046 }
0x2af4   :  { %v3923_v38 = vpop.permute.xlu0 %2372  ;;  %v1954_v22 = vmul.f32 0.6931472, %v3047_v34 }
0x2af5   :  { %v3049_v50 = vpop.eup %3048 }
0x2af6   :  { %v1960_v51 = vsel %vm1959_vm0, %v1957_v40, %v1954_v22  ;;  %v1936_v56 = vmul.f32 0.6931472, %v3049_v50 }
0x2af7   :  { %v3051_v55 = vpop.eup %3050  ;;  %v1976_v33 = vadd.f32 %v1960_v51, %v1848_v52 }
0x2af8   :  { %v3929_v61 = vpop.permute.xlu0 %2376  ;;  %v1963_v25 = vmul.f32 0.6931472, %v3051_v55  ;;  %v3932_v1 = vpop.permute.xlu1 %2374  ;;  %v1942_v47 = vsel %vm1941_vm2, %v1939_v59, %v1936_v56 }
0x2af9   :  { %v3053_v30 = vpop.eup %3052  ;;  %v1984_v36 = vsel %vm1856_vm1, %v3908_v53, %v1976_v33  ;;  %v1974_v4 = vadd.f32 %v1942_v47, %v1846_v54  ;;  %v3989_v47 = vld [vmem:[%s4136_s14] ss:$0 sm:$0xff]  ;;  %s3284_s14 = smov [#allocation13]  }
0x2afa   :  { %v1992_v58 = vadd.f32 0.0001, %v1984_v36  ;;  %v1969_v2 = vsel %vm1968_vm4, %v1966_v0, %v1963_v25  ;;  %v1945_v5 = vmul.f32 0.6931472, %v3053_v30  ;;  %s2438_s5 = sshll.u32 %s3284_s14, 4  ;;  %s2439_s5 = int_to_ptr.vmem [resolvable:$true] %s2438_s5 }
0x2afb   :  { %v1977_v57 = vadd.f32 %v1969_v2, %v1849_v63  ;;  %v1982_v7 = vsel %vm1854_vm5, %v3912_v23, %v1974_v4  ;;  %s3202_s25 = scalar_lea.vmem %s2439_s5, 256  ;;  %p3207_p12 = scmp.lt.s32.totalorder %s2439_s5, %s2439_s5 }
0x2afc   :  { %v888_v62 = vpop.permute.xlu0 %887  ;;  %v2000_v26 = vsel %vm1841_vm13, %v3908_v53, %v1992_v58  ;;  %v1951_v9 = vsel %vm1950_vm6, %v1948_v44, %v1945_v5  ;;  %v3945_v10 = vpop.permute.xlu1 %2378  ;;  %v1990_v18 = vadd.f32 0.0001, %v1982_v7  ;;  %p3203_p11 = scmp.ne.s32.totalorder %s2439_s5, %s3202_s25  ;;  %p3208_p13 = scmp.lt.s32.totalorder %s3202_s25, %s3202_s25 }
0x2afd   :  { %890 = vst.msk [vmem:[#allocation13] sm:$0xff] %vm250_vm3, %v888_v62  ;;  %2384 = vrot.lane.b32.xlu0 %v2000_v26, %s3282_s10  ;;  %v1985_v14 = vsel %vm1857_vm7, %v3916_v39, %v1977_v57  ;;  %v1975_v48 = vadd.f32 %v1951_v9, %v1847_v46 }
0x2afe   :  { %v1993_v41 = vadd.f32 0.0001, %v1985_v14  ;;  %v1998_v37 = vsel %vm1841_vm13, %v3912_v23, %v1990_v18  ;;  %p3209_p0 = por %p3208_p13, %p3207_p12 }
0x2aff   :  { %v1983_v53 = vsel %vm1855_vm8, %v3920_v29, %v1975_v48 }
0x2b00   :  { %v2001_v12 = vsel %vm1841_vm13, %v3916_v39, %v1993_v41  ;;  %v1991_v13 = vadd.f32 0.0001, %v1983_v53  ;;  %v1703_v17 = vpop.permute.xlu1 %1702  ;;  %v2553_v39 = vld [vmem:[%s4134_s12] ss:$0 sm:$0xff]  ;;  %p3210_p1 = pnand %p3209_p0, %p3203_p11 }
0x2b01   :  { %2386 = vrot.lane.b32.xlu1 %v2001_v12, %s3282_s10  ;;  %2380 = vrot.lane.b32.xlu0 %v1998_v37, %s3282_s10  ;;  %1706 = vst.msk [vmem:[#allocation13 + $0x8] sm:$0xff] %vm250_vm3, %v1703_v17  ;;  %v2008_v32 = vpack.c.bf16 %v2001_v12, %v2000_v26 }
0x2b02   :  { %v1999_v42 = vsel %vm1841_vm13, %v3920_v29, %v1991_v13 }
0x2b03   :  { %v2007_v19 = vpack.c.bf16 %v1999_v42, %v1998_v37 }
0x2b05   :  { %2382 = vrot.lane.b32.xlu1 %v1999_v42, %s3282_s10  ;;  %892 = vrot.lane.b32.xlu0 %v3671_v6, %s3283_s20 }
0x2b06   :  { %2824 = vmatprep.mubr.msk.bf16.mxu1 %vm2021_vm15, %v2007_v19 }
0x2b07   :  { %2825 = vmatmul.mubr.msk.bf16.gmra.mxu1 %vm2021_vm15, %v2008_v32 }
0x2b09   :  { %1708 = vrot.lane.b32.xlu1 %v3815_v3, %s3283_s20 }
0x2b49   :  { %v2822_v23 = vpop.f32.mrf.mxu1 }
0x2b4a   :  { %v2077_v24 = vadd.f32 %v2822_v23, %v2553_v39 }
0x2b4b   :  { %v2068_v20 = vpop.f32.mrf.mxu1 }
0x2b4c   :  { %v2069_v29 = vadd.f32 %v2553_v39, %v2068_v20 }
0x2b4d   :  { %v2823_v11 = vpop.f32.mrf.mxu1 }
0x2b4e   :  { %v2080_v21 = vadd.f32 %v2823_v11, %v2553_v39  ;;  %3054 = vtanh.f32 %v2069_v29 }
0x2b4f   :  { %v2071_v8 = vpop.f32.mrf.mxu1 }
0x2b50   :  { %v2072_v27 = vadd.f32 %v2553_v39, %v2071_v8  ;;  %3056 = vtanh.f32 %v2080_v21 }
0x2b52   :  { %3058 = vtanh.f32 %v2072_v27 }
0x2b53   :  { %3060 = vtanh.f32 %v2077_v24 }
0x2b5b   :  { %v3055_v6 = vpop.eup %3054 }
0x2b5d   :  { %v3057_v28 = vpop.eup %3056 }
0x2b5f   :  { %v3059_v31 = vpop.eup %3058 }
0x2b60   :  { %v3061_v3 = vpop.eup %3060  ;;  %v2107_v34 = vpack.c.bf16 %v3059_v31, %v3055_v6 }
0x2b61   :  { %v2108_v35 = vpack.c.bf16 %v3057_v28, %v3061_v3 }
0x2b62   :  { %2830 = vmatprep.mubr.msk.bf16.mxu0 %vm2021_vm15, %v2107_v34 }
0x2b63   :  { %2831 = vmatmul.mubr.msk.bf16.vlgmr.msra.gmra.mxu0 %vm2021_vm15, %v2108_v35 }
0x2b6f   :  { %v3974_v22 = vpop.permute.xlu0 %2384 }
0x2b73   :  { %v3976_v40 = vpop.permute.xlu0 %2380  ;;  %v3978_v15 = vpop.permute.xlu1 %2386 }
0x2b77   :  { %v893_v45 = vpop.permute.xlu0 %892  ;;  %v3980_v52 = vpop.permute.xlu1 %2382 }
0x2b78   :  { %895 = vst.msk [vmem:[#allocation15] sm:$0xff] %vm250_vm3, %v893_v45 }
0x2b7b   :  { %v1709_v16 = vpop.permute.xlu1 %1708 }
0x2b7c   :  { %1712 = vst.msk [vmem:[#allocation15 + $0x8] sm:$0xff] %vm250_vm3, %v1709_v16  ;;  %vm2203_vm3 = vcmp.lt.s32.totalorder %v3477_v43, 8 }
0x2bc7   :  { %v2826_v49 = vpop.f32.mrf.mxu1 }
0x2bc8   :  { %v2093_v33 = vadd.f32 %v2826_v49, %v2553_v39 }
0x2bc9   :  { %v2084_v50 = vpop.f32.mrf.mxu1 }
0x2bca   :  { %v2085_v51 = vadd.f32 %v2553_v39, %v2084_v50 }
0x2bcb   :  { %v2827_v54 = vpop.f32.mrf.mxu1 }
0x2bcc   :  { %v2096_v55 = vadd.f32 %v2827_v54, %v2553_v39  ;;  %3062 = vtanh.f32 %v2085_v51 }
0x2bcd   :  { %v2087_v56 = vpop.f32.mrf.mxu1 }
0x2bce   :  { %v2088_v59 = vadd.f32 %v2553_v39, %v2087_v56  ;;  %3064 = vtanh.f32 %v2096_v55 }
0x2bd0   :  { %3066 = vtanh.f32 %v2088_v59 }
0x2bd1   :  { %3068 = vtanh.f32 %v2093_v33 }
0x2bd9   :  { %v3063_v60 = vpop.eup %3062 }
0x2bdb   :  { %v3065_v63 = vpop.eup %3064 }
0x2bdd   :  { %v3067_v25 = vpop.eup %3066 }
0x2bde   :  { %v3069_v0 = vpop.eup %3068  ;;  %v2109_v30 = vpack.c.bf16 %v3067_v25, %v3063_v60 }
0x2bdf   :  { %v2110_v36 = vpack.c.bf16 %v3065_v63, %v3069_v0 }
0x2be0   :  { %2834 = vmatprep.mubr.msk.bf16.mxu0 %vm2021_vm15, %v2109_v30 }
0x2be1   :  { %2835 = vmatmul.mubr.msk.bf16.gmra.mxu0 %vm2021_vm15, %v2110_v36 }
0x2c23   :  { %v2832_v44 = vpop.f32.mrf.mxu0 }
0x2c24   :  { %v3992_v58 = vadd.f32 %v2832_v44, %v3989_v47 }
0x2c25   :  { %v2172_v2 = vpop.f32.mrf.mxu0 }
0x2c26   :  { %v2230_v4 = vand.u32 2147483647, %v3992_v58  ;;  %v3996_v5 = vadd.f32 %v3989_v47, %v2172_v2  ;;  %v2206_v49 = vmax.f32 %v3992_v58, 0.0  ;;  %vm2214_vm12 = vcmp.ne.f32.partialorder %v3992_v58, %v3992_v58 }
0x2c27   :  { %v2833_v57 = vpop.f32.mrf.mxu0 }
0x2c28   :  { %v2238_v46 = vsub.f32 0.0, %v2230_v4  ;;  %v2228_v62 = vand.u32 2147483647, %v3996_v5  ;;  %v4000_v26 = vadd.f32 %v2833_v57, %v3989_v47  ;;  %v2204_v59 = vmax.f32 %v3996_v5, 0.0 }
0x2c29   :  { %v2175_v7 = vpop.f32.mrf.mxu0  ;;  %vm2212_vm13 = vcmp.ne.f32.partialorder %v3996_v5, %v3996_v5 }
0x2c2a   :  { %v2248_v9 = vmul.f32 1.442695, %v2238_v46  ;;  %v2236_v14 = vsub.f32 0.0, %v2228_v62  ;;  %v4003_v18 = vadd.f32 %v3989_v47, %v2175_v7  ;;  %v2231_v48 = vand.u32 2147483647, %v4000_v26 }
0x2c2b   :  { %v2207_v46 = vmax.f32 %v4000_v26, 0.0  ;;  %vm2215_vm1 = vcmp.ne.f32.partialorder %v4000_v26, %v4000_v26 }
0x2c2c   :  { %3070 = vpow2.f32 %v2248_v9  ;;  %v2244_v41 = vmul.f32 1.442695, %v2236_v14  ;;  %v2239_v53 = vsub.f32 0.0, %v2231_v48  ;;  %v2229_v12 = vand.u32 2147483647, %v4003_v18 }
0x2c2d   :  { %v2205_v62 = vmax.f32 %v4003_v18, 0.0  ;;  %vm2213_vm2 = vcmp.ne.f32.partialorder %v4003_v18, %v4003_v18 }
0x2c2e   :  { %3072 = vpow2.f32 %v2244_v41  ;;  %v2250_v37 = vmul.f32 1.442695, %v2239_v53  ;;  %v2237_v13 = vsub.f32 0.0, %v2229_v12 }
0x2c30   :  { %3074 = vpow2.f32 %v2250_v37  ;;  %v2246_v17 = vmul.f32 1.442695, %v2237_v13 }
0x2c32   :  { %3076 = vpow2.f32 %v2246_v17 }
0x2c39   :  { %v3071_v42 = vpop.eup %3070 }
0x2c3a   :  { %v2278_v19 = vadd.f32 1.0, %v3071_v42  ;;  %v2281_v21 = vmul.f32 -0.5, %v3071_v42  ;;  %v2284_v27 = vand.u32 2147483647, %v3071_v42 }
0x2c3b   :  { %v3073_v32 = vpop.eup %3072 }
0x2c3c   :  { %3078 = vlog2.f32 %v2278_v19  ;;  %v2260_v23 = vadd.f32 1.0, %v3073_v32  ;;  %v2263_v24 = vmul.f32 -0.5, %v3073_v32  ;;  %v2282_v8 = vadd.f32 1.0, %v2281_v21 }
0x2c3d   :  { %v3075_v39 = vpop.eup %3074  ;;  %v2266_v3 = vand.u32 2147483647, %v3073_v32  ;;  %vm2285_vm9 = vcmp.lt.f32.partialorder %v2284_v27, 0.0004427343 }
0x2c3e   :  { %3080 = vlog2.f32 %v2260_v23  ;;  %v2287_v20 = vadd.f32 1.0, %v3075_v39  ;;  %v2290_v6 = vmul.f32 -0.5, %v3075_v39  ;;  %v2264_v28 = vadd.f32 1.0, %v2263_v24 }
0x2c3f   :  { %v3077_v29 = vpop.eup %3076  ;;  %v2283_v45 = vmul.f32 %v3071_v42, %v2282_v8  ;;  %v2293_v33 = vand.u32 2147483647, %v3075_v39  ;;  %vm2267_vm11 = vcmp.lt.f32.partialorder %v2266_v3, 0.0004427343 }
0x2c40   :  { %3082 = vlog2.f32 %v2287_v20  ;;  %v2269_v11 = vadd.f32 1.0, %v3077_v29  ;;  %v2272_v34 = vmul.f32 -0.5, %v3077_v29  ;;  %v2291_v50 = vadd.f32 1.0, %v2290_v6 }
0x2c41   :  { %v2265_v55 = vmul.f32 %v3073_v32, %v2264_v28  ;;  %v2275_v0 = vand.u32 2147483647, %v3077_v29  ;;  %vm2294_vm14 = vcmp.lt.f32.partialorder %v2293_v33, 0.0004427343 }
0x2c42   :  { %3084 = vlog2.f32 %v2269_v11  ;;  %v2273_v60 = vadd.f32 1.0, %v2272_v34  ;;  %v2292_v2 = vmul.f32 %v3075_v39, %v2291_v50 }
0x2c43   :  { %vm2276_vm0 = vcmp.lt.f32.partialorder %v2275_v0, 0.0004427343 }
0x2c44   :  { %v2274_v48 = vmul.f32 %v3077_v29, %v2273_v60 }
0x2c49   :  { %v3079_v31 = vpop.eup %3078 }
0x2c4a   :  { %v2280_v35 = vmul.f32 0.6931472, %v3079_v31 }
0x2c4b   :  { %v3081_v16 = vpop.eup %3080 }
0x2c4c   :  { %v2286_v51 = vsel %vm2285_vm9, %v2283_v45, %v2280_v35  ;;  %v2262_v54 = vmul.f32 0.6931472, %v3081_v16 }
0x2c4d   :  { %v2334_v56 = vadd.f32 %v2286_v51, %v2206_v49  ;;  %v3083_v63 = vpop.eup %3082 }
0x2c4e   :  { %v2268_v25 = vsel %vm2267_vm11, %v2265_v55, %v2262_v54  ;;  %v2289_v44 = vmul.f32 0.6931472, %v3083_v63 }
0x2c4f   :  { %v2342_v30 = vsel %vm2214_vm12, %v3992_v58, %v2334_v56  ;;  %v2332_v36 = vadd.f32 %v2268_v25, %v2204_v59  ;;  %v3085_v4 = vpop.eup %3084 }
0x2c50   :  { %v2350_v57 = vadd.f32 0.0001, %v2342_v30  ;;  %v2295_v9 = vsel %vm2294_vm14, %v2292_v2, %v2289_v44  ;;  %v2271_v14 = vmul.f32 0.6931472, %v3085_v4 }
0x2c51   :  { %v2340_v7 = vsel %vm2212_vm13, %v3996_v5, %v2332_v36  ;;  %v2335_v12 = vadd.f32 %v2295_v9, %v2207_v46 }
0x2c52   :  { %v2358_v41 = vsel %vm2203_vm3, %v3992_v58, %v2350_v57  ;;  %v2348_v53 = vadd.f32 0.0001, %v2340_v7  ;;  %v2277_v13 = vsel %vm2276_vm0, %v2274_v48, %v2271_v14 }
0x2c53   :  { %v2398_v37 = vsel %vm2021_vm15, %v2358_v41, %v3929_v61  ;;  %v2343_v19 = vsel %vm2215_vm1, %v4000_v26, %v2335_v12  ;;  %v2333_v32 = vadd.f32 %v2277_v13, %v2205_v62 }
0x2c54   :  { %v2407_v17 = vsel %vm2404_vm10, %v2398_v37, 0.0  ;;  %v2356_v42 = vsel %vm2203_vm3, %v3996_v5, %v2348_v53  ;;  %v2351_v23 = vadd.f32 0.0001, %v2343_v19 }
0x2c55   :  { %2415 = vst [vmem:[#allocation12 + $0x10] sm:$0xff] %v2407_v17  ;;  %v2396_v58 = vsel %vm2021_vm15, %v2356_v42, %v3923_v38  ;;  %v2341_v39 = vsel %vm2213_vm2, %v4003_v18, %v2333_v32 }
0x2c56   :  { %v2405_v61 = vsel %vm2404_vm10, %v2396_v58, 0.0  ;;  %v2359_v5 = vsel %vm2203_vm3, %v4000_v26, %v2351_v23  ;;  %v2349_v20 = vadd.f32 0.0001, %v2341_v39 }
0x2c57   :  { %2413 = vst [vmem:[#allocation12] sm:$0xff] %v2405_v61  ;;  %v2399_v29 = vsel %vm2021_vm15, %v2359_v5, %v3945_v10 }
0x2c58   :  { %v2408_v38 = vsel %vm2404_vm10, %v2399_v29, 0.0  ;;  %v2357_v11 = vsel %vm2203_vm3, %v4003_v18, %v2349_v20 }
0x2c59   :  { %2416 = vst [vmem:[#allocation12 + $0x18] sm:$0xff] %v2408_v38  ;;  %v2397_v21 = vsel %vm2021_vm15, %v2357_v11, %v3932_v1 }
0x2c5a   :  { %v2406_v24 = vsel %vm2404_vm10, %v2397_v21, 0.0 }
0x2c5b   :  { %3213 = shalt.err (!%p3210_p1)
}
0x2c5c   :  { %s3285_s26 = smov 128   ;;  %s3286_s13 = smov 8   ;;  %2414 = vst [vmem:[#allocation12 + $0x8] sm:$0xff] %v2406_v24 }
0x2c5d   :  { %2444 = dma.vmem_to_hbm [thread:$0]  %s2439_s5, 256, %s4138_s16, [#allocation14], %s3285_s26, %s3285_s26, %s3286_s13  }
0x2c5e   :  { %s3287_s28 = smov [#allocation15]  }
0x2c5f   :  { %s2450_s4 = sshll.u32 %s3287_s28, 4  ;;  %s2451_s4 = int_to_ptr.vmem [resolvable:$true] %s2450_s4 }
0x2c60   :  { %s3222_s11 = scalar_lea.vmem %s2451_s4, 256  ;;  %p3227_p3 = scmp.lt.s32.totalorder %s2451_s4, %s2451_s4 }
0x2c61   :  { %p3223_p2 = scmp.ne.s32.totalorder %s2451_s4, %s3222_s11  ;;  %p3228_p4 = scmp.lt.s32.totalorder %s3222_s11, %s3222_s11 }
0x2c63   :  { %p3229_p5 = por %p3228_p4, %p3227_p3 }
0x2c65   :  { %p3230_p6 = pnand %p3229_p5, %p3223_p2 }
0x2c67   :  { %3233 = shalt.err (!%p3230_p6)
}
0x2c68   :  { %2456 = dma.vmem_to_hbm [thread:$0]  %s2451_s4, 256, %s4139_s17, [#allocation14], %s3285_s26, %s3285_s26, %s3286_s13  }
0x2c69   :  { %s3288_s16 = smov [#allocation12]  }
0x2c6a   :  { %s2426_s17 = sshll.u32 %s3288_s16, 4  ;;  %s2427_s17 = int_to_ptr.vmem [resolvable:$true] %s2426_s17 }
0x2c6b   :  { %s3242_s30 = scalar_lea.vmem %s2427_s17, 1024  ;;  %p3247_p8 = scmp.lt.s32.totalorder %s2427_s17, %s2427_s17 }
0x2c6c   :  { %p3243_p7 = scmp.ne.s32.totalorder %s2427_s17, %s3242_s30  ;;  %p3248_p9 = scmp.lt.s32.totalorder %s3242_s30, %s3242_s30 }
0x2c6e   :  { %p3249_p10 = por %p3248_p9, %p3247_p8 }
0x2c70   :  { %p3250_p11 = pnand %p3249_p10, %p3243_p7 }
0x2ca1   :  { %v2836_v1 = vpop.f32.mrf.mxu0 }
0x2ca2   :  { %v4061_v10 = vadd.f32 %v2836_v1, %v3989_v47 }
0x2ca3   :  { %v2188_v26 = vpop.f32.mrf.mxu0 }
0x2ca4   :  { %v2234_v18 = vand.u32 2147483647, %v4061_v10  ;;  %v4065_v8 = vadd.f32 %v3989_v47, %v2188_v26  ;;  %v2210_v53 = vmax.f32 %v4061_v10, 0.0  ;;  %vm2218_vm6 = vcmp.ne.f32.partialorder %v4061_v10, %v4061_v10 }
0x2ca5   :  { %v2837_v27 = vpop.f32.mrf.mxu0 }
0x2ca6   :  { %v2242_v6 = vsub.f32 0.0, %v2234_v18  ;;  %v2232_v28 = vand.u32 2147483647, %v4065_v8  ;;  %v4069_v31 = vadd.f32 %v2837_v27, %v3989_v47  ;;  %v2208_v32 = vmax.f32 %v4065_v8, 0.0 }
0x2ca7   :  { %v2191_v3 = vpop.f32.mrf.mxu0  ;;  %vm2216_vm7 = vcmp.ne.f32.partialorder %v4065_v8, %v4065_v8 }
0x2ca8   :  { %v2256_v34 = vmul.f32 1.442695, %v2242_v6  ;;  %v2240_v35 = vsub.f32 0.0, %v2232_v28  ;;  %v4072_v45 = vadd.f32 %v3989_v47, %v2191_v3  ;;  %v2235_v16 = vand.u32 2147483647, %v4069_v31 }
0x2ca9   :  { %v2211_v24 = vmax.f32 %v4069_v31, 0.0  ;;  %vm2219_vm11 = vcmp.ne.f32.partialorder %v4069_v31, %v4069_v31 }
0x2caa   :  { %3086 = vpow2.f32 %v2256_v34  ;;  %v2252_v49 = vmul.f32 1.442695, %v2240_v35  ;;  %v2243_v50 = vsub.f32 0.0, %v2235_v16  ;;  %v2233_v51 = vand.u32 2147483647, %v4072_v45 }
0x2cab   :  { %v2209_v1 = vmax.f32 %v4072_v45, 0.0  ;;  %vm2217_vm12 = vcmp.ne.f32.partialorder %v4072_v45, %v4072_v45 }
0x2cac   :  { %3088 = vpow2.f32 %v2252_v49  ;;  %v2258_v54 = vmul.f32 1.442695, %v2243_v50  ;;  %v2241_v55 = vsub.f32 0.0, %v2233_v51 }
0x2cae   :  { %3090 = vpow2.f32 %v2258_v54  ;;  %v2254_v33 = vmul.f32 1.442695, %v2241_v55 }
0x2cb0   :  { %3092 = vpow2.f32 %v2254_v33 }
0x2cb7   :  { %v3087_v56 = vpop.eup %3086 }
0x2cb8   :  { %v2314_v59 = vadd.f32 1.0, %v3087_v56  ;;  %v2317_v36 = vmul.f32 -0.5, %v3087_v56  ;;  %v2320_v4 = vand.u32 2147483647, %v3087_v56 }
0x2cb9   :  { %v3089_v60 = vpop.eup %3088 }
0x2cba   :  { %3094 = vlog2.f32 %v2314_v59  ;;  %v2296_v63 = vadd.f32 1.0, %v3089_v60  ;;  %v2299_v44 = vmul.f32 -0.5, %v3089_v60  ;;  %v2318_v2 = vadd.f32 1.0, %v2317_v36 }
0x2cbb   :  { %v3091_v47 = vpop.eup %3090  ;;  %v2302_v7 = vand.u32 2147483647, %v3089_v60  ;;  %vm2321_vm4 = vcmp.lt.f32.partialorder %v2320_v4, 0.0004427343 }
0x2cbc   :  { %3096 = vlog2.f32 %v2296_v63  ;;  %v2323_v25 = vadd.f32 1.0, %v3091_v47  ;;  %v2326_v57 = vmul.f32 -0.5, %v3091_v47  ;;  %v2300_v46 = vadd.f32 1.0, %v2299_v44 }
0x2cbd   :  { %v3093_v0 = vpop.eup %3092  ;;  %v2319_v48 = vmul.f32 %v3087_v56, %v2318_v2  ;;  %v2329_v42 = vand.u32 2147483647, %v3091_v47  ;;  %vm2303_vm5 = vcmp.lt.f32.partialorder %v2302_v7, 0.0004427343 }
0x2cbe   :  { %3098 = vlog2.f32 %v2323_v25  ;;  %v2305_v30 = vadd.f32 1.0, %v3093_v0  ;;  %v2308_v9 = vmul.f32 -0.5, %v3093_v0  ;;  %v2327_v12 = vadd.f32 1.0, %v2326_v57 }
0x2cbf   :  { %v2301_v17 = vmul.f32 %v3089_v60, %v2300_v46  ;;  %v2311_v39 = vand.u32 2147483647, %v3093_v0  ;;  %vm2330_vm8 = vcmp.lt.f32.partialorder %v2329_v42, 0.0004427343 }
0x2cc0   :  { %3100 = vlog2.f32 %v2305_v30  ;;  %v2309_v58 = vadd.f32 1.0, %v2308_v9  ;;  %v2328_v38 = vmul.f32 %v3091_v47, %v2327_v12 }
0x2cc1   :  { %vm2312_vm9 = vcmp.lt.f32.partialorder %v2311_v39, 0.0004427343 }
0x2cc2   :  { %v2310_v6 = vmul.f32 %v3093_v0, %v2309_v58 }
0x2cc7   :  { %v3095_v62 = vpop.eup %3094 }
0x2cc8   :  { %v2316_v14 = vmul.f32 0.6931472, %v3095_v62 }
0x2cc9   :  { %v3097_v41 = vpop.eup %3096 }
0x2cca   :  { %v2322_v37 = vsel %vm2321_vm4, %v2319_v48, %v2316_v14  ;;  %v2298_v13 = vmul.f32 0.6931472, %v3097_v41 }
0x2ccb   :  { %v2338_v19 = vadd.f32 %v2322_v37, %v2210_v53  ;;  %v3099_v23 = vpop.eup %3098 }
0x2ccc   :  { %v2304_v61 = vsel %vm2303_vm5, %v2301_v17, %v2298_v13  ;;  %v2325_v29 = vmul.f32 0.6931472, %v3099_v23 }
0x2ccd   :  { %v2346_v5 = vsel %vm2218_vm6, %v4061_v10, %v2338_v19  ;;  %v2336_v20 = vadd.f32 %v2304_v61, %v2208_v32  ;;  %v3101_v11 = vpop.eup %3100 }
0x2cce   :  { %v2354_v21 = vadd.f32 0.0001, %v2346_v5  ;;  %v2331_v18 = vsel %vm2330_vm8, %v2328_v38, %v2325_v29  ;;  %v2307_v27 = vmul.f32 0.6931472, %v3101_v11 }
0x2ccf   :  { %v2344_v26 = vsel %vm2216_vm7, %v4065_v8, %v2336_v20  ;;  %v2339_v34 = vadd.f32 %v2331_v18, %v2211_v24 }
0x2cd0   :  { %v2362_v28 = vsel %vm2203_vm3, %v4061_v10, %v2354_v21  ;;  %v2352_v3 = vadd.f32 0.0001, %v2344_v26  ;;  %v2313_v16 = vsel %vm2312_vm9, %v2310_v6, %v2307_v27 }
0x2cd1   :  { %v2402_v35 = vsel %vm2021_vm15, %v2362_v28, %v3974_v22  ;;  %v2347_v51 = vsel %vm2219_vm11, %v4069_v31, %v2339_v34  ;;  %v2337_v54 = vadd.f32 %v2313_v16, %v2209_v1 }
0x2cd2   :  { %v2411_v49 = vsel %vm2404_vm10, %v2402_v35, 0.0  ;;  %v2360_v50 = vsel %vm2203_vm3, %v4065_v8, %v2352_v3  ;;  %v2355_v55 = vadd.f32 0.0001, %v2347_v51 }
0x2cd3   :  { %2419 = vst [vmem:[#allocation12 + $0x30] sm:$0xff] %v2411_v49  ;;  %v2400_v10 = vsel %vm2021_vm15, %v2360_v50, %v3976_v40  ;;  %v2345_v33 = vsel %vm2217_vm12, %v4072_v45, %v2337_v54 }
0x2cd4   :  { %v2409_v22 = vsel %vm2404_vm10, %v2400_v10, 0.0  ;;  %v2363_v8 = vsel %vm2203_vm3, %v4069_v31, %v2355_v55  ;;  %v2353_v56 = vadd.f32 0.0001, %v2345_v33 }
0x2cd5   :  { %2417 = vst [vmem:[#allocation12 + $0x20] sm:$0xff] %v2409_v22  ;;  %v2403_v59 = vsel %vm2021_vm15, %v2363_v8, %v3978_v15 }
0x2cd6   :  { %v2412_v40 = vsel %vm2404_vm10, %v2403_v59, 0.0  ;;  %v2361_v60 = vsel %vm2203_vm3, %v4072_v45, %v2353_v56 }
0x2cd7   :  { %2420 = vst [vmem:[#allocation12 + $0x38] sm:$0xff] %v2412_v40  ;;  %v2401_v63 = vsel %vm2021_vm15, %v2361_v60, %v3980_v52 }
0x2cd8   :  { %v2410_v47 = vsel %vm2404_vm10, %v2401_v63, 0.0 }
0x2cd9   :  { %2418 = vst [vmem:[#allocation12 + $0x28] sm:$0xff] %v2410_v47 }
0x2cda   :  { %3253 = shalt.err (!%p3250_p11)
}
0x2cdb   :  { %2432 = dma.vmem_to_hbm [thread:$0]  %s2427_s17, 1024, %s4137_s15, [#allocation5], %s3285_s26, %s3285_s26, %s3286_s13  }
0x2cdc   :  { %3268 = dma.done.wait [#allocation5], 1024  }
0x2cdd   :  { %3269 = vsyncadd [#allocation5], 4294966272 }
0x2cde   :  { %3270 = dma.done.wait [#allocation14], 512  }
0x2cdf   :  { %3271 = vsyncadd [#allocation14], 4294966784 }
0x2ce0   :  { %2466 = vsyncpa [#allocation4], 1 }
0x2ce1   :  { %2467 = vsyncpa [#allocation7], 1 }
0x2ce2   :  { %2468 = vsyncpa [#allocation10], 1 }
0x2ce3   :  { %2469 = vsyncpa [#allocation5], 1 }
0x2ce4   :  { %2470 = vsyncpa [#allocation14], 1 }

</bundles_post_ra>
